<compile_context>
chip_gen: v5e
topology: v5e:2x2
jax: 0.10.0
libtpu: 0.0.40
codegen_flags: <defaults>
</compile_context>

<pallas_src>
import functools
import numpy as np
import jax
import jax.numpy as jnp
from jax.experimental import pallas as pl
from jax.experimental.pallas import tpu as pltpu

EPS = 1e-4      # COSAM eps
BN_EPS = 1e-5   # nn.BatchNorm default eps (folded into conv weights in glue)


# ------------------------------ fused kernel ------------------------------- #

def _cosam_group_kernel(feat_ref, w_dr_ref, b_dr_ref, w1_ref, b1_ref, w2_ref,
                        b2_ref, wc1_ref, bc1_ref, wc2_ref, bc2_ref,
                        out_ref, mask_ref, gm_ref,
                        xn_scr, xnt_scr, pooled_scr, *, t, mid):
    f32 = jnp.float32
    bf16 = jnp.bfloat16

    # --- stage 1: 1x1 dim-reduction conv (+folded BN) + ReLU, then per-pixel
    #     channel standardization ((x-mean)/(std_unbiased+eps)).  Keep the
    #     normalized maps in VMEM in BOTH orientations:
    #       xn_scr  (t, mid, hw)  for the stage-3 (64,mid)x(mid,hw) dot
    #       xnt_scr (t, hw, mid)  for MXU-native stage-2 (64,hw)x(hw,mid) dots
    w_dr = w_dr_ref[...]                          # (mid, cin) bf16
    b_dr = b_dr_ref[...]                          # (mid, 1)   f32
    for f in range(t):
        x = feat_ref[f].astype(bf16)              # (cin, hw)
        y = jnp.dot(w_dr, x, preferred_element_type=f32) + b_dr
        y = jnp.maximum(y, 0.0)                   # (mid, hw) f32
        mean = jnp.mean(y, axis=0, keepdims=True)             # (1, hw)
        d = y - mean
        var = jnp.sum(d * d, axis=0, keepdims=True) * (1.0 / (mid - 1))
        inv = pl.reciprocal(jnp.sqrt(var) + EPS, approx=True)
        xn = d * inv                              # (mid, hw) f32
        xn_scr[f] = xn.astype(bf16)
        xnt_scr[f] = jnp.transpose(xn).astype(bf16)            # (hw, mid)

    # --- stage 2: running projection.  proj_i = sum_k (W1_k/mid)·xn_{sel(i,k)}^T
    #     with sel(i,k) = k if k < i else k+1.  Start with i=0 (all "hi" frames)
    #     and update with a single difference product per frame.
    w1 = w1_ref[...]                              # (t-1, 64, hw) bf16, BN+1/mid folded
    b1 = b1_ref[...]                              # (64, 1)
    w2 = w2_ref[...]                              # (1, 64)
    b2 = b2_ref[...]                              # (1, 1)

    proj = jnp.dot(w1[0], xnt_scr[1], preferred_element_type=f32)   # (64, mid)
    for k in range(1, t - 1):
        proj = proj + jnp.dot(w1[k], xnt_scr[k + 1], preferred_element_type=f32)

    # --- stage 3: per-frame spatial mask + pooled statistics (no output write yet).
    for i in range(t):                            # t is small; static unroll
        if i > 0:
            diff = xnt_scr[i - 1] - xnt_scr[i]    # bf16 (hw, mid)
            proj = proj + jnp.dot(w1[i - 1], diff, preferred_element_type=f32)
        h1 = jnp.dot(proj.astype(bf16), xn_scr[i],
                     preferred_element_type=f32) + b1               # (64, hw)
        h1 = jnp.maximum(h1, 0.0)
        logit = jnp.dot(w2, h1, preferred_element_type=f32) + b2    # (1, hw)
        mask = jax.nn.sigmoid(logit)
        mask_ref[i] = mask                        # lane-dense (1, hw) store
        att = feat_ref[i] * mask                  # (cin, hw) f32, NOT stored
        pooled_scr[:, i:i + 1] = jnp.mean(att, axis=1, keepdims=True)   # (cin, 1)

    # --- stage 4: batched channelwise MLP over all t pooled columns.
    pooled = pooled_scr[...].astype(bf16)         # (cin, t)
    hmlp = jnp.tanh(jnp.dot(wc1_ref[...], pooled,
                            preferred_element_type=f32) + bc1_ref[...])   # (mid, t)
    ca = jax.nn.sigmoid(jnp.dot(wc2_ref[...], hmlp.astype(bf16),
                                preferred_element_type=f32) + bc2_ref[...])  # (cin, t)
    gm = jnp.mean(ca, axis=1, keepdims=True)      # (cin, 1)
    gm_ref[...] = gm

    # --- stage 5: single-pass output write  out = feat * mask * (1 + gm)  (bf16).
    scale = 1.0 + gm                              # (cin, 1)
    for i in range(t):
        out_ref[i] = (feat_ref[i] * mask_ref[i] * scale).astype(out_ref.dtype)


# -------------------------------- wrapper ----------------------------------- #

def _weight_spec(shape):
    """Constant-index weight/bias spec, single-buffered when supported."""
    n = len(shape)

    def index_map(g):
        return (0,) * n

    try:
        return pl.BlockSpec(shape, index_map,
                            pipeline_mode=pl.Buffered(buffer_count=1))
    except (AttributeError, TypeError):
        # Older JAX without BlockSpec.pipeline_mode: fall back to default buffering.
        return pl.BlockSpec(shape, index_map)


def cosam_forward(feat_nchw, params, b, t, out_dtype=jnp.bfloat16):
    total, cin, H, W = feat_nchw.shape
    hw = H * W
    mid = params['w_dr'].shape[0]
    assert t >= 2 and total == b * t
    feat_g = feat_nchw.reshape(b, t, cin, hw)          # pure reshape, no transpose

    # bf16 copies for the MXU operands (biases / epilogues stay f32).
    w_dr_bf = params['w_dr'].astype(jnp.bfloat16)      # (mid, cin)
    w1_bf = params['w1'].astype(jnp.bfloat16)          # (t-1, 64, hw)
    wc1_bf = params['wc1'].astype(jnp.bfloat16)        # (mid, cin)
    wc2_bf = params['wc2'].astype(jnp.bfloat16)        # (cin, mid)

    out_isz = jnp.dtype(out_dtype).itemsize
    flops = (2 * b * t * mid * cin * hw               # stage-1 dim reduction
             + 2 * b * 2 * (t - 1) * 64 * hw * mid    # stage-2 pair products
             + 2 * b * t * 64 * mid * hw              # stage-3 h1
             + 2 * b * t * 64 * hw                    # logits
             + 2 * b * 2 * mid * cin * t              # channel MLP
             + 8 * b * t * cin * hw)                  # elementwise epilogue
    transcendentals = b * t * (2 * hw + mid + cin)
    bytes_accessed = (b * t * cin * hw * 4            # feat read
                      + b * t * cin * hw * out_isz    # attended write
                      + b * t * hw * 4 + b * cin * 4  # mask / gm writes
                      + 2 * mid * cin * 2 + 2 * cin * mid * 2
                      + (t - 1) * 64 * hw * 2)

    out_g, mask_g, gm_g = pl.pallas_call(
        functools.partial(_cosam_group_kernel, t=t, mid=mid),
        out_shape=(jax.ShapeDtypeStruct((b, t, cin, hw), out_dtype),
                   jax.ShapeDtypeStruct((b, t, 1, hw), jnp.float32),
                   jax.ShapeDtypeStruct((b, cin, 1), jnp.float32)),
        grid=(b,),
        in_specs=[pl.BlockSpec((None, t, cin, hw), lambda g: (g, 0, 0, 0)),
                  _weight_spec((mid, cin)),        # w_dr
                  _weight_spec((mid, 1)),          # b_dr
                  _weight_spec((t - 1, 64, hw)),   # w1
                  _weight_spec((64, 1)),           # b1
                  _weight_spec((1, 64)),           # w2
                  _weight_spec((1, 1)),            # b2
                  _weight_spec((mid, cin)),        # wc1
                  _weight_spec((mid, 1)),          # bc1
                  _weight_spec((cin, mid)),        # wc2
                  _weight_spec((cin, 1))],         # bc2
        out_specs=(pl.BlockSpec((None, t, cin, hw), lambda g: (g, 0, 0, 0)),
                   pl.BlockSpec((None, t, 1, hw), lambda g: (g, 0, 0, 0)),
                   pl.BlockSpec((None, cin, 1), lambda g: (g, 0, 0))),
        scratch_shapes=[pltpu.VMEM((t, mid, hw), jnp.bfloat16),
                        pltpu.VMEM((t, hw, mid), jnp.bfloat16),
                        pltpu.VMEM((cin, t), jnp.float32)],
        compiler_params=pltpu.CompilerParams(
            dimension_semantics=("parallel",),
            vmem_limit_bytes=48 * 1024 * 1024),
        cost_estimate=pl.CostEstimate(flops=int(flops),
                                      transcendentals=int(transcendentals),
                                      bytes_accessed=int(bytes_accessed)),
    )(feat_g, w_dr_bf, params['b_dr'], w1_bf, params['b1'],
      params['w2'], params['b2'], wc1_bf, params['bc1'],
      wc2_bf, params['bc2'])

    attended_out = out_g.reshape(total, cin, H, W)
    spatial_mask = mask_g.reshape(total, 1, H, W)
    channelwise_mask = jnp.broadcast_to(
        gm_g[:, None, :, :], (b, t, cin, 1)).reshape(total, cin, 1, 1)
    return attended_out, channelwise_mask, spatial_mask


# ---------------------------- pure-JAX reference ---------------------------- #

def cosam_reference(feat_nchw, params, b, t):
    total, cin, H, W = feat_nchw.shape
    hw = H * W
    mid = params['w_dr'].shape[0]
    x = feat_nchw.reshape(total, cin, hw)
    dr = jnp.einsum('mc,nch->nmh', params['w_dr'], x) + params['b_dr'][None]
    dr = jnp.maximum(dr, 0.0)                                   # (N, mid, hw)
    idw = dr.reshape(b, t, mid, hw)
    index_list = np.asarray([[j for j in range(t) if j != i] for i in range(t)])
    others = idw[:, index_list]                                 # (b, t, t-1, mid, hw)
    others = others.reshape(total, t - 1, mid, hw).transpose(0, 2, 1, 3)
    others = others.reshape(total, mid, (t - 1) * hw)
    drp = dr.transpose(0, 2, 1)                                 # (N, hw, mid)

    def std_norm(a, axis):
        m = jnp.mean(a, axis=axis, keepdims=True)
        sd = jnp.sqrt(jnp.sum((a - m) ** 2, axis=axis, keepdims=True)
                      / (a.shape[axis] - 1))
        return (a - m) / (sd + EPS)

    drp = std_norm(drp, 2)
    others = std_norm(others, 1)
    mc = jnp.einsum('npm,nmq->npq', drp, others) / mid          # (N, hw, (t-1)hw)
    mc_perm = mc.transpose(0, 2, 1)                             # (N, (t-1)hw, hw)
    w1_flat = params['w1_raw'].transpose(1, 0, 2).reshape(64, (t - 1) * hw)
    h1 = jnp.einsum('oq,nqp->nop', w1_flat, mc_perm) + params['b1'][None]
    h1 = jnp.maximum(h1, 0.0)
    logit = jnp.einsum('oc,ncp->nop', params['w2'], h1) + params['b2'][None]
    spatial_mask = jax.nn.sigmoid(logit).reshape(total, 1, H, W)
    attended = feat_nchw * spatial_mask
    pooled = attended.mean(axis=(2, 3))                         # (N, cin)
    hmlp = jnp.tanh(pooled @ params['wc1'].T + params['bc1'][:, 0])
    ca = jax.nn.sigmoid(hmlp @ params['wc2'].T + params['bc2'][:, 0])
    gm = ca.reshape(b, t, cin).mean(axis=1, keepdims=True)
    gm = jnp.broadcast_to(gm, (b, t, cin)).reshape(total, cin, 1, 1)
    out = attended + attended * gm
    return out, gm, spatial_mask


# ----------------------------------- main ------------------------------------ #

if __name__ == "__main__":
    B, T = 2, 4
    CIN = 8
    H, W = 8, 16          # hw = 128 -> exercises full (8,128) lane tiles
    MID = 64 if CIN <= 256 else 256
    HW = H * W
    total = B * T

    key = jax.random.PRNGKey(0)
    ks = jax.random.split(key, 20)
    nrm = lambda k, s, sc=0.1: sc * jax.random.normal(k, s, jnp.float32)

    # dim_reduction: Conv2d(CIN, MID, 1) + BN(MID) (eval, folded) + ReLU
    w_dr = nrm(ks[0], (MID, CIN))
    b_dr0 = nrm(ks[1], (MID,))
    g1 = 1.0 + nrm(ks[2], (MID,)); be1 = nrm(ks[3], (MID,))
    rm1 = nrm(ks[4], (MID,))
    rv1 = 1.0 + 0.1 * jax.random.uniform(ks[5], (MID,), jnp.float32)
    s1 = g1 / jnp.sqrt(rv1 + BN_EPS)
    w_dr_eff = w_dr * s1[:, None]
    b_dr_eff = (b_dr0 - rm1) * s1 + be1

    # spatial_mask_summary: Conv((T-1)*HW, 64, 1) + BN(64) + ReLU + Conv(64, 1, 1)
    w_s1 = nrm(ks[6], (64, (T - 1) * HW))
    b_s10 = nrm(ks[7], (64,))
    g2 = 1.0 + nrm(ks[8], (64,)); be2 = nrm(ks[9], (64,))
    rm2 = nrm(ks[10], (64,))
    rv2 = 1.0 + 0.1 * jax.random.uniform(ks[11], (64,), jnp.float32)
    s2 = g2 / jnp.sqrt(rv2 + BN_EPS)
    w_s1_eff = w_s1 * s2[:, None]
    b_s1_eff = (b_s10 - rm2) * s2 + be2
    w_s2 = nrm(ks[12], (1, 64)); b_s2 = nrm(ks[13], (1,))

    # channelwise_attention: Linear(CIN, MID) + Tanh + Linear(MID, CIN) + Sigmoid
    w_c1 = nrm(ks[14], (MID, CIN)); b_c1 = nrm(ks[15], (MID,))
    w_c2 = nrm(ks[16], (CIN, MID)); b_c2 = nrm(ks[17], (CIN,))

    # W1 reshaped per selected-frame block: w1_raw[k, o, p] = W1[o, k*HW + p]
    w1_raw = w_s1_eff.reshape(64, T - 1, HW).transpose(1, 0, 2)   # (T-1, 64, HW)

    params = dict(
        w_dr=w_dr_eff,                                            # (MID, CIN)
        b_dr=b_dr_eff.reshape(MID, 1),
        w1=w1_raw / MID,           # 1/mid correlation scale folded (kernel only)
        w1_raw=w1_raw,             # unscaled blocks for the reference
        b1=b_s1_eff.reshape(64, 1),
        w2=w_s2,                                                  # (1, 64)
        b2=b_s2.reshape(1, 1),
        wc1=w_c1, bc1=b_c1.reshape(MID, 1),
        wc2=w_c2, bc2=b_c2.reshape(CIN, 1),
    )

    feat = jax.random.normal(ks[18], (total, CIN, H, W), jnp.float32)

    out, cmask, smask = cosam_forward(feat, params, B, T)
    jax.block_until_ready((out, cmask, smask))

    ref_out, ref_cmask, ref_smask = cosam_reference(feat, params, B, T)
    np.testing.assert_allclose(np.asarray(smask), np.asarray(ref_smask),
                               rtol=2e-2, atol=2e-2)
    np.testing.assert_allclose(np.asarray(cmask), np.asarray(ref_cmask),
                               rtol=2e-2, atol=2e-2)
    np.testing.assert_allclose(np.asarray(out.astype(jnp.float32)),
                               np.asarray(ref_out), rtol=2e-2, atol=2e-2)
    print("KERNEL_OK")
</pallas_src>

<mosaic_0001>
module attributes {stable_mosaic.version = 11 : i64} {
  func.func @_cosam_group_kernel(%arg0: i32, %arg1: memref<1x4x8x128xf32, #tpu.memory_space<vmem>>, %arg2: memref<64x8xbf16, #tpu.memory_space<vmem>>, %arg3: memref<64x1xf32, #tpu.memory_space<vmem>>, %arg4: memref<3x64x128xbf16, #tpu.memory_space<vmem>>, %arg5: memref<64x1xf32, #tpu.memory_space<vmem>>, %arg6: memref<1x64xf32, #tpu.memory_space<vmem>>, %arg7: memref<1x1xf32, #tpu.memory_space<vmem>>, %arg8: memref<64x8xbf16, #tpu.memory_space<vmem>>, %arg9: memref<64x1xf32, #tpu.memory_space<vmem>>, %arg10: memref<8x64xbf16, #tpu.memory_space<vmem>>, %arg11: memref<8x1xf32, #tpu.memory_space<vmem>>, %arg12: memref<1x4x8x128xbf16, #tpu.memory_space<vmem>>, %arg13: memref<1x4x1x128xf32, #tpu.memory_space<vmem>>, %arg14: memref<1x8x1xf32, #tpu.memory_space<vmem>>, %arg15: memref<4x64x128xbf16, #tpu.memory_space<vmem>>, %arg16: memref<4x128x64xbf16, #tpu.memory_space<vmem>>, %arg17: memref<8x4xf32, #tpu.memory_space<vmem>>) attributes {dimension_semantics = [#tpu.dimension_semantics<parallel>], iteration_bounds = array<i64: 2>, scalar_prefetch = 0 : i64, scratch_operands = 3 : i64, tpu.core_type = #tpu.core_type<tc>, window_params = [{transform_indices = @transform_0, window_bounds = array<i64: 1, 4, 8, 128>}, {pipeline_mode = #tpu.pipeline_mode<synchronous>, transform_indices = @transform_1, window_bounds = array<i64: 64, 8>}, {pipeline_mode = #tpu.pipeline_mode<synchronous>, transform_indices = @transform_2, window_bounds = array<i64: 64, 1>}, {pipeline_mode = #tpu.pipeline_mode<synchronous>, transform_indices = @transform_3, window_bounds = array<i64: 3, 64, 128>}, {pipeline_mode = #tpu.pipeline_mode<synchronous>, transform_indices = @transform_4, window_bounds = array<i64: 64, 1>}, {pipeline_mode = #tpu.pipeline_mode<synchronous>, transform_indices = @transform_5, window_bounds = array<i64: 1, 64>}, {pipeline_mode = #tpu.pipeline_mode<synchronous>, transform_indices = @transform_6, window_bounds = array<i64: 1, 1>}, {pipeline_mode = #tpu.pipeline_mode<synchronous>, transform_indices = @transform_7, window_bounds = array<i64: 64, 8>}, {pipeline_mode = #tpu.pipeline_mode<synchronous>, transform_indices = @transform_8, window_bounds = array<i64: 64, 1>}, {pipeline_mode = #tpu.pipeline_mode<synchronous>, transform_indices = @transform_9, window_bounds = array<i64: 8, 64>}, {pipeline_mode = #tpu.pipeline_mode<synchronous>, transform_indices = @transform_10, window_bounds = array<i64: 8, 1>}, {transform_indices = @transform_11, window_bounds = array<i64: 1, 4, 8, 128>}, {transform_indices = @transform_12, window_bounds = array<i64: 1, 4, 1, 128>}, {transform_indices = @transform_13, window_bounds = array<i64: 1, 8, 1>}]} {
    %c0 = arith.constant 0 : index
    %c0_0 = arith.constant 0 : index
    %0 = vector.load %arg2[%c0, %c0_0] : memref<64x8xbf16, #tpu.memory_space<vmem>>, vector<64x8xbf16>
    %c0_1 = arith.constant 0 : index
    %c0_2 = arith.constant 0 : index
    %1 = vector.load %arg3[%c0_1, %c0_2] : memref<64x1xf32, #tpu.memory_space<vmem>>, vector<64x1xf32>
    %c0_3 = arith.constant 0 : index
    %c0_4 = arith.constant 0 : index
    %c0_5 = arith.constant 0 : index
    %c0_6 = arith.constant 0 : index
    %2 = vector.load %arg1[%c0_3, %c0_4, %c0_5, %c0_6] : memref<1x4x8x128xf32, #tpu.memory_space<vmem>>, vector<1x1x8x128xf32>
    %3 = vector.shape_cast %2 : vector<1x1x8x128xf32> to vector<8x128xf32>
    %4 = arith.truncf %3 : vector<8x128xf32> to vector<8x128xbf16>
    %cst = arith.constant dense<0.000000e+00> : vector<64x128xf32>
    %5 = tpu.matmul %0, %4, %cst {dimension_numbers = #tpu.dot_dimension_numbers<[1], [0], [0], [1], [0, 0, 1, 1], [], []>} : vector<64x8xbf16>, vector<8x128xbf16>, vector<64x128xf32> -> vector<64x128xf32>
    %6 = vector.broadcast %1 : vector<64x1xf32> to vector<64x128xf32>
    %7 = arith.addf %5, %6 : vector<64x128xf32>
    %cst_7 = arith.constant 0.000000e+00 : f32
    %8 = vector.broadcast %cst_7 : f32 to vector<64x128xf32>
    %9 = arith.maximumf %7, %8 : vector<64x128xf32>
    %cst_8 = arith.constant dense<0.000000e+00> : vector<128xf32>
    %10 = vector.multi_reduction <add>, %9, %cst_8 [0] : vector<64x128xf32> to vector<128xf32>
    %11 = vector.shape_cast %10 : vector<128xf32> to vector<1x128xf32>
    %cst_9 = arith.constant 6.400000e+01 : f32
    %12 = vector.broadcast %cst_9 : f32 to vector<1x128xf32>
    %13 = arith.divf %11, %12 : vector<1x128xf32>
    %14 = vector.broadcast %13 : vector<1x128xf32> to vector<64x128xf32>
    %15 = arith.subf %9, %14 : vector<64x128xf32>
    %16 = arith.mulf %15, %15 : vector<64x128xf32>
    %cst_10 = arith.constant dense<0.000000e+00> : vector<128xf32>
    %17 = vector.multi_reduction <add>, %16, %cst_10 [0] : vector<64x128xf32> to vector<128xf32>
    %18 = vector.shape_cast %17 : vector<128xf32> to vector<1x128xf32>
    %cst_11 = arith.constant 0.0158730168 : f32
    %19 = vector.broadcast %cst_11 : f32 to vector<1x128xf32>
    %20 = arith.mulf %18, %19 : vector<1x128xf32>
    %21 = math.sqrt %20 : vector<1x128xf32>
    %cst_12 = arith.constant 9.99999974E-5 : f32
    %22 = vector.broadcast %cst_12 : f32 to vector<1x128xf32>
    %23 = arith.addf %21, %22 : vector<1x128xf32>
    %24 = tpu.reciprocal %23 {approx = true} : vector<1x128xf32> -> vector<1x128xf32>
    %25 = vector.broadcast %24 : vector<1x128xf32> to vector<64x128xf32>
    %26 = arith.mulf %15, %25 : vector<64x128xf32>
    %27 = arith.truncf %26 : vector<64x128xf32> to vector<64x128xbf16>
    %c0_13 = arith.constant 0 : index
    %c0_14 = arith.constant 0 : index
    %c0_15 = arith.constant 0 : index
    %28 = vector.load %arg15[%c0_13, %c0_14, %c0_15] : memref<4x64x128xbf16, #tpu.memory_space<vmem>>, vector<1x64x128xbf16>
    %29 = vector.shape_cast %28 : vector<1x64x128xbf16> to vector<64x128xbf16>
    %30 = vector.shape_cast %27 : vector<64x128xbf16> to vector<1x64x128xbf16>
    tpu.vector_store %arg15[%c0_13, %c0_14, %c0_15], %30 {strides = array<i32>} : memref<4x64x128xbf16, #tpu.memory_space<vmem>>, vector<1x64x128xbf16>,
    %31 = tpu.transpose %26, [1, 0] : vector<64x128xf32> -> vector<128x64xf32>
    %32 = arith.truncf %31 : vector<128x64xf32> to vector<128x64xbf16>
    %c0_16 = arith.constant 0 : index
    %c0_17 = arith.constant 0 : index
    %c0_18 = arith.constant 0 : index
    %33 = vector.load %arg16[%c0_16, %c0_17, %c0_18] : memref<4x128x64xbf16, #tpu.memory_space<vmem>>, vector<1x128x64xbf16>
    %34 = vector.shape_cast %33 : vector<1x128x64xbf16> to vector<128x64xbf16>
    %35 = vector.shape_cast %32 : vector<128x64xbf16> to vector<1x128x64xbf16>
    tpu.vector_store %arg16[%c0_16, %c0_17, %c0_18], %35 {strides = array<i32>} : memref<4x128x64xbf16, #tpu.memory_space<vmem>>, vector<1x128x64xbf16>,
    %c0_19 = arith.constant 0 : index
    %c1 = arith.constant 1 : index
    %c0_20 = arith.constant 0 : index
    %c0_21 = arith.constant 0 : index
    %36 = vector.load %arg1[%c0_19, %c1, %c0_20, %c0_21] : memref<1x4x8x128xf32, #tpu.memory_space<vmem>>, vector<1x1x8x128xf32>
    %37 = vector.shape_cast %36 : vector<1x1x8x128xf32> to vector<8x128xf32>
    %38 = arith.truncf %37 : vector<8x128xf32> to vector<8x128xbf16>
    %cst_22 = arith.constant dense<0.000000e+00> : vector<64x128xf32>
    %39 = tpu.matmul %0, %38, %cst_22 {dimension_numbers = #tpu.dot_dimension_numbers<[1], [0], [0], [1], [0, 0, 1, 1], [], []>} : vector<64x8xbf16>, vector<8x128xbf16>, vector<64x128xf32> -> vector<64x128xf32>
    %40 = vector.broadcast %1 : vector<64x1xf32> to vector<64x128xf32>
    %41 = arith.addf %39, %40 : vector<64x128xf32>
    %cst_23 = arith.constant 0.000000e+00 : f32
    %42 = vector.broadcast %cst_23 : f32 to vector<64x128xf32>
    %43 = arith.maximumf %41, %42 : vector<64x128xf32>
    %cst_24 = arith.constant dense<0.000000e+00> : vector<128xf32>
    %44 = vector.multi_reduction <add>, %43, %cst_24 [0] : vector<64x128xf32> to vector<128xf32>
    %45 = vector.shape_cast %44 : vector<128xf32> to vector<1x128xf32>
    %cst_25 = arith.constant 6.400000e+01 : f32
    %46 = vector.broadcast %cst_25 : f32 to vector<1x128xf32>
    %47 = arith.divf %45, %46 : vector<1x128xf32>
    %48 = vector.broadcast %47 : vector<1x128xf32> to vector<64x128xf32>
    %49 = arith.subf %43, %48 : vector<64x128xf32>
    %50 = arith.mulf %49, %49 : vector<64x128xf32>
    %cst_26 = arith.constant dense<0.000000e+00> : vector<128xf32>
    %51 = vector.multi_reduction <add>, %50, %cst_26 [0] : vector<64x128xf32> to vector<128xf32>
    %52 = vector.shape_cast %51 : vector<128xf32> to vector<1x128xf32>
    %cst_27 = arith.constant 0.0158730168 : f32
    %53 = vector.broadcast %cst_27 : f32 to vector<1x128xf32>
    %54 = arith.mulf %52, %53 : vector<1x128xf32>
    %55 = math.sqrt %54 : vector<1x128xf32>
    %cst_28 = arith.constant 9.99999974E-5 : f32
    %56 = vector.broadcast %cst_28 : f32 to vector<1x128xf32>
    %57 = arith.addf %55, %56 : vector<1x128xf32>
    %58 = tpu.reciprocal %57 {approx = true} : vector<1x128xf32> -> vector<1x128xf32>
    %59 = vector.broadcast %58 : vector<1x128xf32> to vector<64x128xf32>
    %60 = arith.mulf %49, %59 : vector<64x128xf32>
    %61 = arith.truncf %60 : vector<64x128xf32> to vector<64x128xbf16>
    %c1_29 = arith.constant 1 : index
    %c0_30 = arith.constant 0 : index
    %c0_31 = arith.constant 0 : index
    %62 = vector.load %arg15[%c1_29, %c0_30, %c0_31] : memref<4x64x128xbf16, #tpu.memory_space<vmem>>, vector<1x64x128xbf16>
    %63 = vector.shape_cast %62 : vector<1x64x128xbf16> to vector<64x128xbf16>
    %64 = vector.shape_cast %61 : vector<64x128xbf16> to vector<1x64x128xbf16>
    tpu.vector_store %arg15[%c1_29, %c0_30, %c0_31], %64 {strides = array<i32>} : memref<4x64x128xbf16, #tpu.memory_space<vmem>>, vector<1x64x128xbf16>,
    %65 = tpu.transpose %60, [1, 0] : vector<64x128xf32> -> vector<128x64xf32>
    %66 = arith.truncf %65 : vector<128x64xf32> to vector<128x64xbf16>
    %c1_32 = arith.constant 1 : index
    %c0_33 = arith.constant 0 : index
    %c0_34 = arith.constant 0 : index
    %67 = vector.load %arg16[%c1_32, %c0_33, %c0_34] : memref<4x128x64xbf16, #tpu.memory_space<vmem>>, vector<1x128x64xbf16>
    %68 = vector.shape_cast %67 : vector<1x128x64xbf16> to vector<128x64xbf16>
    %69 = vector.shape_cast %66 : vector<128x64xbf16> to vector<1x128x64xbf16>
    tpu.vector_store %arg16[%c1_32, %c0_33, %c0_34], %69 {strides = array<i32>} : memref<4x128x64xbf16, #tpu.memory_space<vmem>>, vector<1x128x64xbf16>,
    %c0_35 = arith.constant 0 : index
    %c2 = arith.constant 2 : index
    %c0_36 = arith.constant 0 : index
    %c0_37 = arith.constant 0 : index
    %70 = vector.load %arg1[%c0_35, %c2, %c0_36, %c0_37] : memref<1x4x8x128xf32, #tpu.memory_space<vmem>>, vector<1x1x8x128xf32>
    %71 = vector.shape_cast %70 : vector<1x1x8x128xf32> to vector<8x128xf32>
    %72 = arith.truncf %71 : vector<8x128xf32> to vector<8x128xbf16>
    %cst_38 = arith.constant dense<0.000000e+00> : vector<64x128xf32>
    %73 = tpu.matmul %0, %72, %cst_38 {dimension_numbers = #tpu.dot_dimension_numbers<[1], [0], [0], [1], [0, 0, 1, 1], [], []>} : vector<64x8xbf16>, vector<8x128xbf16>, vector<64x128xf32> -> vector<64x128xf32>
    %74 = vector.broadcast %1 : vector<64x1xf32> to vector<64x128xf32>
    %75 = arith.addf %73, %74 : vector<64x128xf32>
    %cst_39 = arith.constant 0.000000e+00 : f32
    %76 = vector.broadcast %cst_39 : f32 to vector<64x128xf32>
    %77 = arith.maximumf %75, %76 : vector<64x128xf32>
    %cst_40 = arith.constant dense<0.000000e+00> : vector<128xf32>
    %78 = vector.multi_reduction <add>, %77, %cst_40 [0] : vector<64x128xf32> to vector<128xf32>
    %79 = vector.shape_cast %78 : vector<128xf32> to vector<1x128xf32>
    %cst_41 = arith.constant 6.400000e+01 : f32
    %80 = vector.broadcast %cst_41 : f32 to vector<1x128xf32>
    %81 = arith.divf %79, %80 : vector<1x128xf32>
    %82 = vector.broadcast %81 : vector<1x128xf32> to vector<64x128xf32>
    %83 = arith.subf %77, %82 : vector<64x128xf32>
    %84 = arith.mulf %83, %83 : vector<64x128xf32>
    %cst_42 = arith.constant dense<0.000000e+00> : vector<128xf32>
    %85 = vector.multi_reduction <add>, %84, %cst_42 [0] : vector<64x128xf32> to vector<128xf32>
    %86 = vector.shape_cast %85 : vector<128xf32> to vector<1x128xf32>
    %cst_43 = arith.constant 0.0158730168 : f32
    %87 = vector.broadcast %cst_43 : f32 to vector<1x128xf32>
    %88 = arith.mulf %86, %87 : vector<1x128xf32>
    %89 = math.sqrt %88 : vector<1x128xf32>
    %cst_44 = arith.constant 9.99999974E-5 : f32
    %90 = vector.broadcast %cst_44 : f32 to vector<1x128xf32>
    %91 = arith.addf %89, %90 : vector<1x128xf32>
    %92 = tpu.reciprocal %91 {approx = true} : vector<1x128xf32> -> vector<1x128xf32>
    %93 = vector.broadcast %92 : vector<1x128xf32> to vector<64x128xf32>
    %94 = arith.mulf %83, %93 : vector<64x128xf32>
    %95 = arith.truncf %94 : vector<64x128xf32> to vector<64x128xbf16>
    %c2_45 = arith.constant 2 : index
    %c0_46 = arith.constant 0 : index
    %c0_47 = arith.constant 0 : index
    %96 = vector.load %arg15[%c2_45, %c0_46, %c0_47] : memref<4x64x128xbf16, #tpu.memory_space<vmem>>, vector<1x64x128xbf16>
    %97 = vector.shape_cast %96 : vector<1x64x128xbf16> to vector<64x128xbf16>
    %98 = vector.shape_cast %95 : vector<64x128xbf16> to vector<1x64x128xbf16>
    tpu.vector_store %arg15[%c2_45, %c0_46, %c0_47], %98 {strides = array<i32>} : memref<4x64x128xbf16, #tpu.memory_space<vmem>>, vector<1x64x128xbf16>,
    %99 = tpu.transpose %94, [1, 0] : vector<64x128xf32> -> vector<128x64xf32>
    %100 = arith.truncf %99 : vector<128x64xf32> to vector<128x64xbf16>
    %c2_48 = arith.constant 2 : index
    %c0_49 = arith.constant 0 : index
    %c0_50 = arith.constant 0 : index
    %101 = vector.load %arg16[%c2_48, %c0_49, %c0_50] : memref<4x128x64xbf16, #tpu.memory_space<vmem>>, vector<1x128x64xbf16>
    %102 = vector.shape_cast %101 : vector<1x128x64xbf16> to vector<128x64xbf16>
    %103 = vector.shape_cast %100 : vector<128x64xbf16> to vector<1x128x64xbf16>
    tpu.vector_store %arg16[%c2_48, %c0_49, %c0_50], %103 {strides = array<i32>} : memref<4x128x64xbf16, #tpu.memory_space<vmem>>, vector<1x128x64xbf16>,
    %c0_51 = arith.constant 0 : index
    %c3 = arith.constant 3 : index
    %c0_52 = arith.constant 0 : index
    %c0_53 = arith.constant 0 : index
    %104 = vector.load %arg1[%c0_51, %c3, %c0_52, %c0_53] : memref<1x4x8x128xf32, #tpu.memory_space<vmem>>, vector<1x1x8x128xf32>
    %105 = vector.shape_cast %104 : vector<1x1x8x128xf32> to vector<8x128xf32>
    %106 = arith.truncf %105 : vector<8x128xf32> to vector<8x128xbf16>
    %cst_54 = arith.constant dense<0.000000e+00> : vector<64x128xf32>
    %107 = tpu.matmul %0, %106, %cst_54 {dimension_numbers = #tpu.dot_dimension_numbers<[1], [0], [0], [1], [0, 0, 1, 1], [], []>} : vector<64x8xbf16>, vector<8x128xbf16>, vector<64x128xf32> -> vector<64x128xf32>
    %108 = vector.broadcast %1 : vector<64x1xf32> to vector<64x128xf32>
    %109 = arith.addf %107, %108 : vector<64x128xf32>
    %cst_55 = arith.constant 0.000000e+00 : f32
    %110 = vector.broadcast %cst_55 : f32 to vector<64x128xf32>
    %111 = arith.maximumf %109, %110 : vector<64x128xf32>
    %cst_56 = arith.constant dense<0.000000e+00> : vector<128xf32>
    %112 = vector.multi_reduction <add>, %111, %cst_56 [0] : vector<64x128xf32> to vector<128xf32>
    %113 = vector.shape_cast %112 : vector<128xf32> to vector<1x128xf32>
    %cst_57 = arith.constant 6.400000e+01 : f32
    %114 = vector.broadcast %cst_57 : f32 to vector<1x128xf32>
    %115 = arith.divf %113, %114 : vector<1x128xf32>
    %116 = vector.broadcast %115 : vector<1x128xf32> to vector<64x128xf32>
    %117 = arith.subf %111, %116 : vector<64x128xf32>
    %118 = arith.mulf %117, %117 : vector<64x128xf32>
    %cst_58 = arith.constant dense<0.000000e+00> : vector<128xf32>
    %119 = vector.multi_reduction <add>, %118, %cst_58 [0] : vector<64x128xf32> to vector<128xf32>
    %120 = vector.shape_cast %119 : vector<128xf32> to vector<1x128xf32>
    %cst_59 = arith.constant 0.0158730168 : f32
    %121 = vector.broadcast %cst_59 : f32 to vector<1x128xf32>
    %122 = arith.mulf %120, %121 : vector<1x128xf32>
    %123 = math.sqrt %122 : vector<1x128xf32>
    %cst_60 = arith.constant 9.99999974E-5 : f32
    %124 = vector.broadcast %cst_60 : f32 to vector<1x128xf32>
    %125 = arith.addf %123, %124 : vector<1x128xf32>
    %126 = tpu.reciprocal %125 {approx = true} : vector<1x128xf32> -> vector<1x128xf32>
    %127 = vector.broadcast %126 : vector<1x128xf32> to vector<64x128xf32>
    %128 = arith.mulf %117, %127 : vector<64x128xf32>
    %129 = arith.truncf %128 : vector<64x128xf32> to vector<64x128xbf16>
    %c3_61 = arith.constant 3 : index
    %c0_62 = arith.constant 0 : index
    %c0_63 = arith.constant 0 : index
    %130 = vector.load %arg15[%c3_61, %c0_62, %c0_63] : memref<4x64x128xbf16, #tpu.memory_space<vmem>>, vector<1x64x128xbf16>
    %131 = vector.shape_cast %130 : vector<1x64x128xbf16> to vector<64x128xbf16>
    %132 = vector.shape_cast %129 : vector<64x128xbf16> to vector<1x64x128xbf16>
    tpu.vector_store %arg15[%c3_61, %c0_62, %c0_63], %132 {strides = array<i32>} : memref<4x64x128xbf16, #tpu.memory_space<vmem>>, vector<1x64x128xbf16>,
    %133 = tpu.transpose %128, [1, 0] : vector<64x128xf32> -> vector<128x64xf32>
    %134 = arith.truncf %133 : vector<128x64xf32> to vector<128x64xbf16>
    %c3_64 = arith.constant 3 : index
    %c0_65 = arith.constant 0 : index
    %c0_66 = arith.constant 0 : index
    %135 = vector.load %arg16[%c3_64, %c0_65, %c0_66] : memref<4x128x64xbf16, #tpu.memory_space<vmem>>, vector<1x128x64xbf16>
    %136 = vector.shape_cast %135 : vector<1x128x64xbf16> to vector<128x64xbf16>
    %137 = vector.shape_cast %134 : vector<128x64xbf16> to vector<1x128x64xbf16>
    tpu.vector_store %arg16[%c3_64, %c0_65, %c0_66], %137 {strides = array<i32>} : memref<4x128x64xbf16, #tpu.memory_space<vmem>>, vector<1x128x64xbf16>,
    %c0_67 = arith.constant 0 : index
    %c0_68 = arith.constant 0 : index
    %c0_69 = arith.constant 0 : index
    %138 = vector.load %arg4[%c0_67, %c0_68, %c0_69] : memref<3x64x128xbf16, #tpu.memory_space<vmem>>, vector<3x64x128xbf16>
    %c0_70 = arith.constant 0 : index
    %c0_71 = arith.constant 0 : index
    %139 = vector.load %arg5[%c0_70, %c0_71] : memref<64x1xf32, #tpu.memory_space<vmem>>, vector<64x1xf32>
    %c0_72 = arith.constant 0 : index
    %c0_73 = arith.constant 0 : index
    %140 = vector.load %arg6[%c0_72, %c0_73] : memref<1x64xf32, #tpu.memory_space<vmem>>, vector<1x64xf32>
    %c0_74 = arith.constant 0 : index
    %c0_75 = arith.constant 0 : index
    %141 = vector.load %arg7[%c0_74, %c0_75] : memref<1x1xf32, #tpu.memory_space<vmem>>, vector<1x1xf32>
    %142 = vector.extract_strided_slice %138 {offsets = [0, 0, 0], sizes = [1, 64, 128], strides = [1, 1, 1]} : vector<3x64x128xbf16> to vector<1x64x128xbf16>
    %143 = vector.shape_cast %142 : vector<1x64x128xbf16> to vector<64x128xbf16>
    %c1_76 = arith.constant 1 : index
    %c0_77 = arith.constant 0 : index
    %c0_78 = arith.constant 0 : index
    %144 = vector.load %arg16[%c1_76, %c0_77, %c0_78] : memref<4x128x64xbf16, #tpu.memory_space<vmem>>, vector<1x128x64xbf16>
    %145 = vector.shape_cast %144 : vector<1x128x64xbf16> to vector<128x64xbf16>
    %cst_79 = arith.constant dense<0.000000e+00> : vector<64x64xf32>
    %146 = tpu.matmul %143, %145, %cst_79 {dimension_numbers = #tpu.dot_dimension_numbers<[1], [0], [0], [1], [0, 0, 1, 1], [], []>} : vector<64x128xbf16>, vector<128x64xbf16>, vector<64x64xf32> -> vector<64x64xf32>
    %147 = vector.extract_strided_slice %138 {offsets = [1, 0, 0], sizes = [1, 64, 128], strides = [1, 1, 1]} : vector<3x64x128xbf16> to vector<1x64x128xbf16>
    %148 = vector.shape_cast %147 : vector<1x64x128xbf16> to vector<64x128xbf16>
    %c2_80 = arith.constant 2 : index
    %c0_81 = arith.constant 0 : index
    %c0_82 = arith.constant 0 : index
    %149 = vector.load %arg16[%c2_80, %c0_81, %c0_82] : memref<4x128x64xbf16, #tpu.memory_space<vmem>>, vector<1x128x64xbf16>
    %150 = vector.shape_cast %149 : vector<1x128x64xbf16> to vector<128x64xbf16>
    %cst_83 = arith.constant dense<0.000000e+00> : vector<64x64xf32>
    %151 = tpu.matmul %148, %150, %cst_83 {dimension_numbers = #tpu.dot_dimension_numbers<[1], [0], [0], [1], [0, 0, 1, 1], [], []>} : vector<64x128xbf16>, vector<128x64xbf16>, vector<64x64xf32> -> vector<64x64xf32>
    %152 = arith.addf %146, %151 : vector<64x64xf32>
    %153 = vector.extract_strided_slice %138 {offsets = [2, 0, 0], sizes = [1, 64, 128], strides = [1, 1, 1]} : vector<3x64x128xbf16> to vector<1x64x128xbf16>
    %154 = vector.shape_cast %153 : vector<1x64x128xbf16> to vector<64x128xbf16>
    %c3_84 = arith.constant 3 : index
    %c0_85 = arith.constant 0 : index
    %c0_86 = arith.constant 0 : index
    %155 = vector.load %arg16[%c3_84, %c0_85, %c0_86] : memref<4x128x64xbf16, #tpu.memory_space<vmem>>, vector<1x128x64xbf16>
    %156 = vector.shape_cast %155 : vector<1x128x64xbf16> to vector<128x64xbf16>
    %cst_87 = arith.constant dense<0.000000e+00> : vector<64x64xf32>
    %157 = tpu.matmul %154, %156, %cst_87 {dimension_numbers = #tpu.dot_dimension_numbers<[1], [0], [0], [1], [0, 0, 1, 1], [], []>} : vector<64x128xbf16>, vector<128x64xbf16>, vector<64x64xf32> -> vector<64x64xf32>
    %158 = arith.addf %152, %157 : vector<64x64xf32>
    %159 = arith.truncf %158 : vector<64x64xf32> to vector<64x64xbf16>
    %c0_88 = arith.constant 0 : index
    %c0_89 = arith.constant 0 : index
    %c0_90 = arith.constant 0 : index
    %160 = vector.load %arg15[%c0_88, %c0_89, %c0_90] : memref<4x64x128xbf16, #tpu.memory_space<vmem>>, vector<1x64x128xbf16>
    %161 = vector.shape_cast %160 : vector<1x64x128xbf16> to vector<64x128xbf16>
    %cst_91 = arith.constant dense<0.000000e+00> : vector<64x128xf32>
    %162 = tpu.matmul %159, %161, %cst_91 {dimension_numbers = #tpu.dot_dimension_numbers<[1], [0], [0], [1], [0, 0, 1, 1], [], []>} : vector<64x64xbf16>, vector<64x128xbf16>, vector<64x128xf32> -> vector<64x128xf32>
    %163 = vector.broadcast %139 : vector<64x1xf32> to vector<64x128xf32>
    %164 = arith.addf %162, %163 : vector<64x128xf32>
    %cst_92 = arith.constant 0.000000e+00 : f32
    %165 = vector.broadcast %cst_92 : f32 to vector<64x128xf32>
    %166 = arith.maximumf %164, %165 : vector<64x128xf32>
    %cst_93 = arith.constant dense<0.000000e+00> : vector<1x128xf32>
    %167 = tpu.matmul %140, %166, %cst_93 {dimension_numbers = #tpu.dot_dimension_numbers<[1], [0], [0], [1], [0, 0, 1, 1], [], []>} : vector<1x64xf32>, vector<64x128xf32>, vector<1x128xf32> -> vector<1x128xf32>
    %168 = vector.broadcast %141 : vector<1x1xf32> to vector<1x128xf32>
    %169 = arith.addf %167, %168 : vector<1x128xf32>
    %170 = arith.negf %169 : vector<1x128xf32>
    %171 = math.exp %170 : vector<1x128xf32>
    %cst_94 = arith.constant 1.000000e+00 : f32
    %172 = vector.broadcast %cst_94 : f32 to vector<1x128xf32>
    %173 = arith.addf %172, %171 : vector<1x128xf32>
    %174 = arith.divf %172, %173 : vector<1x128xf32>
    %c0_95 = arith.constant 0 : index
    %c0_96 = arith.constant 0 : index
    %c0_97 = arith.constant 0 : index
    %c0_98 = arith.constant 0 : index
    %175 = vector.load %arg13[%c0_95, %c0_96, %c0_97, %c0_98] : memref<1x4x1x128xf32, #tpu.memory_space<vmem>>, vector<1x1x1x128xf32>
    %176 = vector.shape_cast %175 : vector<1x1x1x128xf32> to vector<1x128xf32>
    %177 = vector.shape_cast %174 : vector<1x128xf32> to vector<1x1x1x128xf32>
    tpu.vector_store %arg13[%c0_95, %c0_96, %c0_97, %c0_98], %177 {strides = array<i32>} : memref<1x4x1x128xf32, #tpu.memory_space<vmem>>, vector<1x1x1x128xf32>,
    %c0_99 = arith.constant 0 : index
    %c0_100 = arith.constant 0 : index
    %c0_101 = arith.constant 0 : index
    %c0_102 = arith.constant 0 : index
    %178 = vector.load %arg1[%c0_99, %c0_100, %c0_101, %c0_102] : memref<1x4x8x128xf32, #tpu.memory_space<vmem>>, vector<1x1x8x128xf32>
    %179 = vector.shape_cast %178 : vector<1x1x8x128xf32> to vector<8x128xf32>
    %180 = vector.broadcast %174 : vector<1x128xf32> to vector<8x128xf32>
    %181 = arith.mulf %179, %180 : vector<8x128xf32>
    %cst_103 = arith.constant dense<0.000000e+00> : vector<8xf32>
    %182 = vector.multi_reduction <add>, %181, %cst_103 [1] : vector<8x128xf32> to vector<8xf32>
    %183 = vector.shape_cast %182 : vector<8xf32> to vector<8x1xf32>
    %cst_104 = arith.constant 1.280000e+02 : f32
    %184 = vector.broadcast %cst_104 : f32 to vector<8x1xf32>
    %185 = arith.divf %183, %184 : vector<8x1xf32>
    %c0_105 = arith.constant 0 : index
    %c0_106 = arith.constant 0 : index
    %186 = vector.load %arg17[%c0_105, %c0_106] : memref<8x4xf32, #tpu.memory_space<vmem>>, vector<8x1xf32>
    tpu.vector_store %arg17[%c0_105, %c0_106], %185 {strides = array<i32>} : memref<8x4xf32, #tpu.memory_space<vmem>>, vector<8x1xf32>,
    %c0_107 = arith.constant 0 : index
    %c0_108 = arith.constant 0 : index
    %c0_109 = arith.constant 0 : index
    %187 = vector.load %arg16[%c0_107, %c0_108, %c0_109] : memref<4x128x64xbf16, #tpu.memory_space<vmem>>, vector<1x128x64xbf16>
    %188 = vector.shape_cast %187 : vector<1x128x64xbf16> to vector<128x64xbf16>
    %c1_110 = arith.constant 1 : index
    %c0_111 = arith.constant 0 : index
    %c0_112 = arith.constant 0 : index
    %189 = vector.load %arg16[%c1_110, %c0_111, %c0_112] : memref<4x128x64xbf16, #tpu.memory_space<vmem>>, vector<1x128x64xbf16>
    %190 = vector.shape_cast %189 : vector<1x128x64xbf16> to vector<128x64xbf16>
    %191 = arith.subf %188, %190 : vector<128x64xbf16>
    %192 = vector.extract_strided_slice %138 {offsets = [0, 0, 0], sizes = [1, 64, 128], strides = [1, 1, 1]} : vector<3x64x128xbf16> to vector<1x64x128xbf16>
    %193 = vector.shape_cast %192 : vector<1x64x128xbf16> to vector<64x128xbf16>
    %cst_113 = arith.constant dense<0.000000e+00> : vector<64x64xf32>
    %194 = tpu.matmul %193, %191, %cst_113 {dimension_numbers = #tpu.dot_dimension_numbers<[1], [0], [0], [1], [0, 0, 1, 1], [], []>} : vector<64x128xbf16>, vector<128x64xbf16>, vector<64x64xf32> -> vector<64x64xf32>
    %195 = arith.addf %158, %194 : vector<64x64xf32>
    %196 = arith.truncf %195 : vector<64x64xf32> to vector<64x64xbf16>
    %c1_114 = arith.constant 1 : index
    %c0_115 = arith.constant 0 : index
    %c0_116 = arith.constant 0 : index
    %197 = vector.load %arg15[%c1_114, %c0_115, %c0_116] : memref<4x64x128xbf16, #tpu.memory_space<vmem>>, vector<1x64x128xbf16>
    %198 = vector.shape_cast %197 : vector<1x64x128xbf16> to vector<64x128xbf16>
    %cst_117 = arith.constant dense<0.000000e+00> : vector<64x128xf32>
    %199 = tpu.matmul %196, %198, %cst_117 {dimension_numbers = #tpu.dot_dimension_numbers<[1], [0], [0], [1], [0, 0, 1, 1], [], []>} : vector<64x64xbf16>, vector<64x128xbf16>, vector<64x128xf32> -> vector<64x128xf32>
    %200 = vector.broadcast %139 : vector<64x1xf32> to vector<64x128xf32>
    %201 = arith.addf %199, %200 : vector<64x128xf32>
    %cst_118 = arith.constant 0.000000e+00 : f32
    %202 = vector.broadcast %cst_118 : f32 to vector<64x128xf32>
    %203 = arith.maximumf %201, %202 : vector<64x128xf32>
    %cst_119 = arith.constant dense<0.000000e+00> : vector<1x128xf32>
    %204 = tpu.matmul %140, %203, %cst_119 {dimension_numbers = #tpu.dot_dimension_numbers<[1], [0], [0], [1], [0, 0, 1, 1], [], []>} : vector<1x64xf32>, vector<64x128xf32>, vector<1x128xf32> -> vector<1x128xf32>
    %205 = vector.broadcast %141 : vector<1x1xf32> to vector<1x128xf32>
    %206 = arith.addf %204, %205 : vector<1x128xf32>
    %207 = arith.negf %206 : vector<1x128xf32>
    %208 = math.exp %207 : vector<1x128xf32>
    %cst_120 = arith.constant 1.000000e+00 : f32
    %209 = vector.broadcast %cst_120 : f32 to vector<1x128xf32>
    %210 = arith.addf %209, %208 : vector<1x128xf32>
    %211 = arith.divf %209, %210 : vector<1x128xf32>
    %c0_121 = arith.constant 0 : index
    %c1_122 = arith.constant 1 : index
    %c0_123 = arith.constant 0 : index
    %c0_124 = arith.constant 0 : index
    %212 = vector.load %arg13[%c0_121, %c1_122, %c0_123, %c0_124] : memref<1x4x1x128xf32, #tpu.memory_space<vmem>>, vector<1x1x1x128xf32>
    %213 = vector.shape_cast %212 : vector<1x1x1x128xf32> to vector<1x128xf32>
    %214 = vector.shape_cast %211 : vector<1x128xf32> to vector<1x1x1x128xf32>
    tpu.vector_store %arg13[%c0_121, %c1_122, %c0_123, %c0_124], %214 {strides = array<i32>} : memref<1x4x1x128xf32, #tpu.memory_space<vmem>>, vector<1x1x1x128xf32>,
    %c0_125 = arith.constant 0 : index
    %c1_126 = arith.constant 1 : index
    %c0_127 = arith.constant 0 : index
    %c0_128 = arith.constant 0 : index
    %215 = vector.load %arg1[%c0_125, %c1_126, %c0_127, %c0_128] : memref<1x4x8x128xf32, #tpu.memory_space<vmem>>, vector<1x1x8x128xf32>
    %216 = vector.shape_cast %215 : vector<1x1x8x128xf32> to vector<8x128xf32>
    %217 = vector.broadcast %211 : vector<1x128xf32> to vector<8x128xf32>
    %218 = arith.mulf %216, %217 : vector<8x128xf32>
    %cst_129 = arith.constant dense<0.000000e+00> : vector<8xf32>
    %219 = vector.multi_reduction <add>, %218, %cst_129 [1] : vector<8x128xf32> to vector<8xf32>
    %220 = vector.shape_cast %219 : vector<8xf32> to vector<8x1xf32>
    %cst_130 = arith.constant 1.280000e+02 : f32
    %221 = vector.broadcast %cst_130 : f32 to vector<8x1xf32>
    %222 = arith.divf %220, %221 : vector<8x1xf32>
    %c0_131 = arith.constant 0 : index
    %c1_132 = arith.constant 1 : index
    %223 = vector.load %arg17[%c0_131, %c1_132] : memref<8x4xf32, #tpu.memory_space<vmem>>, vector<8x1xf32>
    tpu.vector_store %arg17[%c0_131, %c1_132], %222 {strides = array<i32>} : memref<8x4xf32, #tpu.memory_space<vmem>>, vector<8x1xf32>,
    %c1_133 = arith.constant 1 : index
    %c0_134 = arith.constant 0 : index
    %c0_135 = arith.constant 0 : index
    %224 = vector.load %arg16[%c1_133, %c0_134, %c0_135] : memref<4x128x64xbf16, #tpu.memory_space<vmem>>, vector<1x128x64xbf16>
    %225 = vector.shape_cast %224 : vector<1x128x64xbf16> to vector<128x64xbf16>
    %c2_136 = arith.constant 2 : index
    %c0_137 = arith.constant 0 : index
    %c0_138 = arith.constant 0 : index
    %226 = vector.load %arg16[%c2_136, %c0_137, %c0_138] : memref<4x128x64xbf16, #tpu.memory_space<vmem>>, vector<1x128x64xbf16>
    %227 = vector.shape_cast %226 : vector<1x128x64xbf16> to vector<128x64xbf16>
    %228 = arith.subf %225, %227 : vector<128x64xbf16>
    %229 = vector.extract_strided_slice %138 {offsets = [1, 0, 0], sizes = [1, 64, 128], strides = [1, 1, 1]} : vector<3x64x128xbf16> to vector<1x64x128xbf16>
    %230 = vector.shape_cast %229 : vector<1x64x128xbf16> to vector<64x128xbf16>
    %cst_139 = arith.constant dense<0.000000e+00> : vector<64x64xf32>
    %231 = tpu.matmul %230, %228, %cst_139 {dimension_numbers = #tpu.dot_dimension_numbers<[1], [0], [0], [1], [0, 0, 1, 1], [], []>} : vector<64x128xbf16>, vector<128x64xbf16>, vector<64x64xf32> -> vector<64x64xf32>
    %232 = arith.addf %195, %231 : vector<64x64xf32>
    %233 = arith.truncf %232 : vector<64x64xf32> to vector<64x64xbf16>
    %c2_140 = arith.constant 2 : index
    %c0_141 = arith.constant 0 : index
    %c0_142 = arith.constant 0 : index
    %234 = vector.load %arg15[%c2_140, %c0_141, %c0_142] : memref<4x64x128xbf16, #tpu.memory_space<vmem>>, vector<1x64x128xbf16>
    %235 = vector.shape_cast %234 : vector<1x64x128xbf16> to vector<64x128xbf16>
    %cst_143 = arith.constant dense<0.000000e+00> : vector<64x128xf32>
    %236 = tpu.matmul %233, %235, %cst_143 {dimension_numbers = #tpu.dot_dimension_numbers<[1], [0], [0], [1], [0, 0, 1, 1], [], []>} : vector<64x64xbf16>, vector<64x128xbf16>, vector<64x128xf32> -> vector<64x128xf32>
    %237 = vector.broadcast %139 : vector<64x1xf32> to vector<64x128xf32>
    %238 = arith.addf %236, %237 : vector<64x128xf32>
    %cst_144 = arith.constant 0.000000e+00 : f32
    %239 = vector.broadcast %cst_144 : f32 to vector<64x128xf32>
    %240 = arith.maximumf %238, %239 : vector<64x128xf32>
    %cst_145 = arith.constant dense<0.000000e+00> : vector<1x128xf32>
    %241 = tpu.matmul %140, %240, %cst_145 {dimension_numbers = #tpu.dot_dimension_numbers<[1], [0], [0], [1], [0, 0, 1, 1], [], []>} : vector<1x64xf32>, vector<64x128xf32>, vector<1x128xf32> -> vector<1x128xf32>
    %242 = vector.broadcast %141 : vector<1x1xf32> to vector<1x128xf32>
    %243 = arith.addf %241, %242 : vector<1x128xf32>
    %244 = arith.negf %243 : vector<1x128xf32>
    %245 = math.exp %244 : vector<1x128xf32>
    %cst_146 = arith.constant 1.000000e+00 : f32
    %246 = vector.broadcast %cst_146 : f32 to vector<1x128xf32>
    %247 = arith.addf %246, %245 : vector<1x128xf32>
    %248 = arith.divf %246, %247 : vector<1x128xf32>
    %c0_147 = arith.constant 0 : index
    %c2_148 = arith.constant 2 : index
    %c0_149 = arith.constant 0 : index
    %c0_150 = arith.constant 0 : index
    %249 = vector.load %arg13[%c0_147, %c2_148, %c0_149, %c0_150] : memref<1x4x1x128xf32, #tpu.memory_space<vmem>>, vector<1x1x1x128xf32>
    %250 = vector.shape_cast %249 : vector<1x1x1x128xf32> to vector<1x128xf32>
    %251 = vector.shape_cast %248 : vector<1x128xf32> to vector<1x1x1x128xf32>
    tpu.vector_store %arg13[%c0_147, %c2_148, %c0_149, %c0_150], %251 {strides = array<i32>} : memref<1x4x1x128xf32, #tpu.memory_space<vmem>>, vector<1x1x1x128xf32>,
    %c0_151 = arith.constant 0 : index
    %c2_152 = arith.constant 2 : index
    %c0_153 = arith.constant 0 : index
    %c0_154 = arith.constant 0 : index
    %252 = vector.load %arg1[%c0_151, %c2_152, %c0_153, %c0_154] : memref<1x4x8x128xf32, #tpu.memory_space<vmem>>, vector<1x1x8x128xf32>
    %253 = vector.shape_cast %252 : vector<1x1x8x128xf32> to vector<8x128xf32>
    %254 = vector.broadcast %248 : vector<1x128xf32> to vector<8x128xf32>
    %255 = arith.mulf %253, %254 : vector<8x128xf32>
    %cst_155 = arith.constant dense<0.000000e+00> : vector<8xf32>
    %256 = vector.multi_reduction <add>, %255, %cst_155 [1] : vector<8x128xf32> to vector<8xf32>
    %257 = vector.shape_cast %256 : vector<8xf32> to vector<8x1xf32>
    %cst_156 = arith.constant 1.280000e+02 : f32
    %258 = vector.broadcast %cst_156 : f32 to vector<8x1xf32>
    %259 = arith.divf %257, %258 : vector<8x1xf32>
    %c0_157 = arith.constant 0 : index
    %c2_158 = arith.constant 2 : index
    %260 = vector.load %arg17[%c0_157, %c2_158] : memref<8x4xf32, #tpu.memory_space<vmem>>, vector<8x1xf32>
    tpu.vector_store %arg17[%c0_157, %c2_158], %259 {strides = array<i32>} : memref<8x4xf32, #tpu.memory_space<vmem>>, vector<8x1xf32>,
    %c2_159 = arith.constant 2 : index
    %c0_160 = arith.constant 0 : index
    %c0_161 = arith.constant 0 : index
    %261 = vector.load %arg16[%c2_159, %c0_160, %c0_161] : memref<4x128x64xbf16, #tpu.memory_space<vmem>>, vector<1x128x64xbf16>
    %262 = vector.shape_cast %261 : vector<1x128x64xbf16> to vector<128x64xbf16>
    %c3_162 = arith.constant 3 : index
    %c0_163 = arith.constant 0 : index
    %c0_164 = arith.constant 0 : index
    %263 = vector.load %arg16[%c3_162, %c0_163, %c0_164] : memref<4x128x64xbf16, #tpu.memory_space<vmem>>, vector<1x128x64xbf16>
    %264 = vector.shape_cast %263 : vector<1x128x64xbf16> to vector<128x64xbf16>
    %265 = arith.subf %262, %264 : vector<128x64xbf16>
    %266 = vector.extract_strided_slice %138 {offsets = [2, 0, 0], sizes = [1, 64, 128], strides = [1, 1, 1]} : vector<3x64x128xbf16> to vector<1x64x128xbf16>
    %267 = vector.shape_cast %266 : vector<1x64x128xbf16> to vector<64x128xbf16>
    %cst_165 = arith.constant dense<0.000000e+00> : vector<64x64xf32>
    %268 = tpu.matmul %267, %265, %cst_165 {dimension_numbers = #tpu.dot_dimension_numbers<[1], [0], [0], [1], [0, 0, 1, 1], [], []>} : vector<64x128xbf16>, vector<128x64xbf16>, vector<64x64xf32> -> vector<64x64xf32>
    %269 = arith.addf %232, %268 : vector<64x64xf32>
    %270 = arith.truncf %269 : vector<64x64xf32> to vector<64x64xbf16>
    %c3_166 = arith.constant 3 : index
    %c0_167 = arith.constant 0 : index
    %c0_168 = arith.constant 0 : index
    %271 = vector.load %arg15[%c3_166, %c0_167, %c0_168] : memref<4x64x128xbf16, #tpu.memory_space<vmem>>, vector<1x64x128xbf16>
    %272 = vector.shape_cast %271 : vector<1x64x128xbf16> to vector<64x128xbf16>
    %cst_169 = arith.constant dense<0.000000e+00> : vector<64x128xf32>
    %273 = tpu.matmul %270, %272, %cst_169 {dimension_numbers = #tpu.dot_dimension_numbers<[1], [0], [0], [1], [0, 0, 1, 1], [], []>} : vector<64x64xbf16>, vector<64x128xbf16>, vector<64x128xf32> -> vector<64x128xf32>
    %274 = vector.broadcast %139 : vector<64x1xf32> to vector<64x128xf32>
    %275 = arith.addf %273, %274 : vector<64x128xf32>
    %cst_170 = arith.constant 0.000000e+00 : f32
    %276 = vector.broadcast %cst_170 : f32 to vector<64x128xf32>
    %277 = arith.maximumf %275, %276 : vector<64x128xf32>
    %cst_171 = arith.constant dense<0.000000e+00> : vector<1x128xf32>
    %278 = tpu.matmul %140, %277, %cst_171 {dimension_numbers = #tpu.dot_dimension_numbers<[1], [0], [0], [1], [0, 0, 1, 1], [], []>} : vector<1x64xf32>, vector<64x128xf32>, vector<1x128xf32> -> vector<1x128xf32>
    %279 = vector.broadcast %141 : vector<1x1xf32> to vector<1x128xf32>
    %280 = arith.addf %278, %279 : vector<1x128xf32>
    %281 = arith.negf %280 : vector<1x128xf32>
    %282 = math.exp %281 : vector<1x128xf32>
    %cst_172 = arith.constant 1.000000e+00 : f32
    %283 = vector.broadcast %cst_172 : f32 to vector<1x128xf32>
    %284 = arith.addf %283, %282 : vector<1x128xf32>
    %285 = arith.divf %283, %284 : vector<1x128xf32>
    %c0_173 = arith.constant 0 : index
    %c3_174 = arith.constant 3 : index
    %c0_175 = arith.constant 0 : index
    %c0_176 = arith.constant 0 : index
    %286 = vector.load %arg13[%c0_173, %c3_174, %c0_175, %c0_176] : memref<1x4x1x128xf32, #tpu.memory_space<vmem>>, vector<1x1x1x128xf32>
    %287 = vector.shape_cast %286 : vector<1x1x1x128xf32> to vector<1x128xf32>
    %288 = vector.shape_cast %285 : vector<1x128xf32> to vector<1x1x1x128xf32>
    tpu.vector_store %arg13[%c0_173, %c3_174, %c0_175, %c0_176], %288 {strides = array<i32>} : memref<1x4x1x128xf32, #tpu.memory_space<vmem>>, vector<1x1x1x128xf32>,
    %c0_177 = arith.constant 0 : index
    %c3_178 = arith.constant 3 : index
    %c0_179 = arith.constant 0 : index
    %c0_180 = arith.constant 0 : index
    %289 = vector.load %arg1[%c0_177, %c3_178, %c0_179, %c0_180] : memref<1x4x8x128xf32, #tpu.memory_space<vmem>>, vector<1x1x8x128xf32>
    %290 = vector.shape_cast %289 : vector<1x1x8x128xf32> to vector<8x128xf32>
    %291 = vector.broadcast %285 : vector<1x128xf32> to vector<8x128xf32>
    %292 = arith.mulf %290, %291 : vector<8x128xf32>
    %cst_181 = arith.constant dense<0.000000e+00> : vector<8xf32>
    %293 = vector.multi_reduction <add>, %292, %cst_181 [1] : vector<8x128xf32> to vector<8xf32>
    %294 = vector.shape_cast %293 : vector<8xf32> to vector<8x1xf32>
    %cst_182 = arith.constant 1.280000e+02 : f32
    %295 = vector.broadcast %cst_182 : f32 to vector<8x1xf32>
    %296 = arith.divf %294, %295 : vector<8x1xf32>
    %c0_183 = arith.constant 0 : index
    %c3_184 = arith.constant 3 : index
    %297 = vector.load %arg17[%c0_183, %c3_184] : memref<8x4xf32, #tpu.memory_space<vmem>>, vector<8x1xf32>
    tpu.vector_store %arg17[%c0_183, %c3_184], %296 {strides = array<i32>} : memref<8x4xf32, #tpu.memory_space<vmem>>, vector<8x1xf32>,
    %c0_185 = arith.constant 0 : index
    %c0_186 = arith.constant 0 : index
    %298 = vector.load %arg17[%c0_185, %c0_186] : memref<8x4xf32, #tpu.memory_space<vmem>>, vector<8x4xf32>
    %299 = arith.truncf %298 : vector<8x4xf32> to vector<8x4xbf16>
    %c0_187 = arith.constant 0 : index
    %c0_188 = arith.constant 0 : index
    %300 = vector.load %arg8[%c0_187, %c0_188] : memref<64x8xbf16, #tpu.memory_space<vmem>>, vector<64x8xbf16>
    %cst_189 = arith.constant dense<0.000000e+00> : vector<64x4xf32>
    %301 = tpu.matmul %300, %299, %cst_189 {dimension_numbers = #tpu.dot_dimension_numbers<[1], [0], [0], [1], [0, 0, 1, 1], [], []>} : vector<64x8xbf16>, vector<8x4xbf16>, vector<64x4xf32> -> vector<64x4xf32>
    %c0_190 = arith.constant 0 : index
    %c0_191 = arith.constant 0 : index
    %302 = vector.load %arg9[%c0_190, %c0_191] : memref<64x1xf32, #tpu.memory_space<vmem>>, vector<64x1xf32>
    %303 = vector.broadcast %302 : vector<64x1xf32> to vector<64x4xf32>
    %304 = arith.addf %301, %303 : vector<64x4xf32>
    %305 = math.tanh %304 : vector<64x4xf32>
    %c0_192 = arith.constant 0 : index
    %c0_193 = arith.constant 0 : index
    %306 = vector.load %arg10[%c0_192, %c0_193] : memref<8x64xbf16, #tpu.memory_space<vmem>>, vector<8x64xbf16>
    %307 = arith.truncf %305 : vector<64x4xf32> to vector<64x4xbf16>
    %cst_194 = arith.constant dense<0.000000e+00> : vector<8x4xf32>
    %308 = tpu.matmul %306, %307, %cst_194 {dimension_numbers = #tpu.dot_dimension_numbers<[1], [0], [0], [1], [0, 0, 1, 1], [], []>} : vector<8x64xbf16>, vector<64x4xbf16>, vector<8x4xf32> -> vector<8x4xf32>
    %c0_195 = arith.constant 0 : index
    %c0_196 = arith.constant 0 : index
    %309 = vector.load %arg11[%c0_195, %c0_196] : memref<8x1xf32, #tpu.memory_space<vmem>>, vector<8x1xf32>
    %310 = vector.broadcast %309 : vector<8x1xf32> to vector<8x4xf32>
    %311 = arith.addf %308, %310 : vector<8x4xf32>
    %312 = arith.negf %311 : vector<8x4xf32>
    %313 = math.exp %312 : vector<8x4xf32>
    %cst_197 = arith.constant 1.000000e+00 : f32
    %314 = vector.broadcast %cst_197 : f32 to vector<8x4xf32>
    %315 = arith.addf %314, %313 : vector<8x4xf32>
    %316 = arith.divf %314, %315 : vector<8x4xf32>
    %cst_198 = arith.constant dense<0.000000e+00> : vector<8xf32>
    %317 = vector.multi_reduction <add>, %316, %cst_198 [1] : vector<8x4xf32> to vector<8xf32>
    %318 = vector.shape_cast %317 : vector<8xf32> to vector<8x1xf32>
    %cst_199 = arith.constant 4.000000e+00 : f32
    %319 = vector.broadcast %cst_199 : f32 to vector<8x1xf32>
    %320 = arith.divf %318, %319 : vector<8x1xf32>
    %c0_200 = arith.constant 0 : index
    %c0_201 = arith.constant 0 : index
    %c0_202 = arith.constant 0 : index
    %321 = vector.load %arg14[%c0_200, %c0_201, %c0_202] : memref<1x8x1xf32, #tpu.memory_space<vmem>>, vector<1x8x1xf32>
    %322 = vector.shape_cast %321 : vector<1x8x1xf32> to vector<8x1xf32>
    %323 = vector.shape_cast %320 : vector<8x1xf32> to vector<1x8x1xf32>
    tpu.vector_store %arg14[%c0_200, %c0_201, %c0_202], %323 {strides = array<i32>} : memref<1x8x1xf32, #tpu.memory_space<vmem>>, vector<1x8x1xf32>,
    %cst_203 = arith.constant 1.000000e+00 : f32
    %324 = vector.broadcast %cst_203 : f32 to vector<8x1xf32>
    %325 = arith.addf %324, %320 : vector<8x1xf32>
    %c0_204 = arith.constant 0 : index
    %c0_205 = arith.constant 0 : index
    %c0_206 = arith.constant 0 : index
    %c0_207 = arith.constant 0 : index
    %326 = vector.load %arg1[%c0_204, %c0_205, %c0_206, %c0_207] : memref<1x4x8x128xf32, #tpu.memory_space<vmem>>, vector<1x1x8x128xf32>
    %327 = vector.shape_cast %326 : vector<1x1x8x128xf32> to vector<8x128xf32>
    %c0_208 = arith.constant 0 : index
    %c0_209 = arith.constant 0 : index
    %c0_210 = arith.constant 0 : index
    %c0_211 = arith.constant 0 : index
    %328 = vector.load %arg13[%c0_208, %c0_209, %c0_210, %c0_211] : memref<1x4x1x128xf32, #tpu.memory_space<vmem>>, vector<1x1x1x128xf32>
    %329 = vector.shape_cast %328 : vector<1x1x1x128xf32> to vector<1x128xf32>
    %330 = vector.broadcast %329 : vector<1x128xf32> to vector<8x128xf32>
    %331 = arith.mulf %327, %330 : vector<8x128xf32>
    %332 = vector.broadcast %325 : vector<8x1xf32> to vector<8x128xf32>
    %333 = arith.mulf %331, %332 : vector<8x128xf32>
    %334 = arith.truncf %333 : vector<8x128xf32> to vector<8x128xbf16>
    %c0_212 = arith.constant 0 : index
    %c0_213 = arith.constant 0 : index
    %c0_214 = arith.constant 0 : index
    %c0_215 = arith.constant 0 : index
    %335 = vector.load %arg12[%c0_212, %c0_213, %c0_214, %c0_215] : memref<1x4x8x128xbf16, #tpu.memory_space<vmem>>, vector<1x1x8x128xbf16>
    %336 = vector.shape_cast %335 : vector<1x1x8x128xbf16> to vector<8x128xbf16>
    %337 = vector.shape_cast %334 : vector<8x128xbf16> to vector<1x1x8x128xbf16>
    tpu.vector_store %arg12[%c0_212, %c0_213, %c0_214, %c0_215], %337 {strides = array<i32>} : memref<1x4x8x128xbf16, #tpu.memory_space<vmem>>, vector<1x1x8x128xbf16>,
    %c0_216 = arith.constant 0 : index
    %c1_217 = arith.constant 1 : index
    %c0_218 = arith.constant 0 : index
    %c0_219 = arith.constant 0 : index
    %338 = vector.load %arg1[%c0_216, %c1_217, %c0_218, %c0_219] : memref<1x4x8x128xf32, #tpu.memory_space<vmem>>, vector<1x1x8x128xf32>
    %339 = vector.shape_cast %338 : vector<1x1x8x128xf32> to vector<8x128xf32>
    %c0_220 = arith.constant 0 : index
    %c1_221 = arith.constant 1 : index
    %c0_222 = arith.constant 0 : index
    %c0_223 = arith.constant 0 : index
    %340 = vector.load %arg13[%c0_220, %c1_221, %c0_222, %c0_223] : memref<1x4x1x128xf32, #tpu.memory_space<vmem>>, vector<1x1x1x128xf32>
    %341 = vector.shape_cast %340 : vector<1x1x1x128xf32> to vector<1x128xf32>
    %342 = vector.broadcast %341 : vector<1x128xf32> to vector<8x128xf32>
    %343 = arith.mulf %339, %342 : vector<8x128xf32>
    %344 = vector.broadcast %325 : vector<8x1xf32> to vector<8x128xf32>
    %345 = arith.mulf %343, %344 : vector<8x128xf32>
    %346 = arith.truncf %345 : vector<8x128xf32> to vector<8x128xbf16>
    %c0_224 = arith.constant 0 : index
    %c1_225 = arith.constant 1 : index
    %c0_226 = arith.constant 0 : index
    %c0_227 = arith.constant 0 : index
    %347 = vector.load %arg12[%c0_224, %c1_225, %c0_226, %c0_227] : memref<1x4x8x128xbf16, #tpu.memory_space<vmem>>, vector<1x1x8x128xbf16>
    %348 = vector.shape_cast %347 : vector<1x1x8x128xbf16> to vector<8x128xbf16>
    %349 = vector.shape_cast %346 : vector<8x128xbf16> to vector<1x1x8x128xbf16>
    tpu.vector_store %arg12[%c0_224, %c1_225, %c0_226, %c0_227], %349 {strides = array<i32>} : memref<1x4x8x128xbf16, #tpu.memory_space<vmem>>, vector<1x1x8x128xbf16>,
    %c0_228 = arith.constant 0 : index
    %c2_229 = arith.constant 2 : index
    %c0_230 = arith.constant 0 : index
    %c0_231 = arith.constant 0 : index
    %350 = vector.load %arg1[%c0_228, %c2_229, %c0_230, %c0_231] : memref<1x4x8x128xf32, #tpu.memory_space<vmem>>, vector<1x1x8x128xf32>
    %351 = vector.shape_cast %350 : vector<1x1x8x128xf32> to vector<8x128xf32>
    %c0_232 = arith.constant 0 : index
    %c2_233 = arith.constant 2 : index
    %c0_234 = arith.constant 0 : index
    %c0_235 = arith.constant 0 : index
    %352 = vector.load %arg13[%c0_232, %c2_233, %c0_234, %c0_235] : memref<1x4x1x128xf32, #tpu.memory_space<vmem>>, vector<1x1x1x128xf32>
    %353 = vector.shape_cast %352 : vector<1x1x1x128xf32> to vector<1x128xf32>
    %354 = vector.broadcast %353 : vector<1x128xf32> to vector<8x128xf32>
    %355 = arith.mulf %351, %354 : vector<8x128xf32>
    %356 = vector.broadcast %325 : vector<8x1xf32> to vector<8x128xf32>
    %357 = arith.mulf %355, %356 : vector<8x128xf32>
    %358 = arith.truncf %357 : vector<8x128xf32> to vector<8x128xbf16>
    %c0_236 = arith.constant 0 : index
    %c2_237 = arith.constant 2 : index
    %c0_238 = arith.constant 0 : index
    %c0_239 = arith.constant 0 : index
    %359 = vector.load %arg12[%c0_236, %c2_237, %c0_238, %c0_239] : memref<1x4x8x128xbf16, #tpu.memory_space<vmem>>, vector<1x1x8x128xbf16>
    %360 = vector.shape_cast %359 : vector<1x1x8x128xbf16> to vector<8x128xbf16>
    %361 = vector.shape_cast %358 : vector<8x128xbf16> to vector<1x1x8x128xbf16>
    tpu.vector_store %arg12[%c0_236, %c2_237, %c0_238, %c0_239], %361 {strides = array<i32>} : memref<1x4x8x128xbf16, #tpu.memory_space<vmem>>, vector<1x1x8x128xbf16>,
    %c0_240 = arith.constant 0 : index
    %c3_241 = arith.constant 3 : index
    %c0_242 = arith.constant 0 : index
    %c0_243 = arith.constant 0 : index
    %362 = vector.load %arg1[%c0_240, %c3_241, %c0_242, %c0_243] : memref<1x4x8x128xf32, #tpu.memory_space<vmem>>, vector<1x1x8x128xf32>
    %363 = vector.shape_cast %362 : vector<1x1x8x128xf32> to vector<8x128xf32>
    %c0_244 = arith.constant 0 : index
    %c3_245 = arith.constant 3 : index
    %c0_246 = arith.constant 0 : index
    %c0_247 = arith.constant 0 : index
    %364 = vector.load %arg13[%c0_244, %c3_245, %c0_246, %c0_247] : memref<1x4x1x128xf32, #tpu.memory_space<vmem>>, vector<1x1x1x128xf32>
    %365 = vector.shape_cast %364 : vector<1x1x1x128xf32> to vector<1x128xf32>
    %366 = vector.broadcast %365 : vector<1x128xf32> to vector<8x128xf32>
    %367 = arith.mulf %363, %366 : vector<8x128xf32>
    %368 = vector.broadcast %325 : vector<8x1xf32> to vector<8x128xf32>
    %369 = arith.mulf %367, %368 : vector<8x128xf32>
    %370 = arith.truncf %369 : vector<8x128xf32> to vector<8x128xbf16>
    %c0_248 = arith.constant 0 : index
    %c3_249 = arith.constant 3 : index
    %c0_250 = arith.constant 0 : index
    %c0_251 = arith.constant 0 : index
    %371 = vector.load %arg12[%c0_248, %c3_249, %c0_250, %c0_251] : memref<1x4x8x128xbf16, #tpu.memory_space<vmem>>, vector<1x1x8x128xbf16>
    %372 = vector.shape_cast %371 : vector<1x1x8x128xbf16> to vector<8x128xbf16>
    %373 = vector.shape_cast %370 : vector<8x128xbf16> to vector<1x1x8x128xbf16>
    tpu.vector_store %arg12[%c0_248, %c3_249, %c0_250, %c0_251], %373 {strides = array<i32>} : memref<1x4x8x128xbf16, #tpu.memory_space<vmem>>, vector<1x1x8x128xbf16>,
    return
  }
  func.func @transform_0(%arg0: i32) -> (i32, i32, i32, i32) {
    %c0_i32 = arith.constant 0 : i32
    %c0_i32_0 = arith.constant 0 : i32
    %c0_i32_1 = arith.constant 0 : i32
    %c0_i32_2 = arith.constant 0 : i32
    return %arg0, %c0_i32, %c0_i32_0, %c0_i32_1 : i32, i32, i32, i32
  }
  func.func @transform_1(%arg0: i32) -> (i32, i32) {
    %c0_i32 = arith.constant 0 : i32
    %c0_i32_0 = arith.constant 0 : i32
    %c0_i32_1 = arith.constant 0 : i32
    return %c0_i32, %c0_i32_0 : i32, i32
  }
  func.func @transform_2(%arg0: i32) -> (i32, i32) {
    %c0_i32 = arith.constant 0 : i32
    %c0_i32_0 = arith.constant 0 : i32
    %c0_i32_1 = arith.constant 0 : i32
    return %c0_i32, %c0_i32_0 : i32, i32
  }
  func.func @transform_3(%arg0: i32) -> (i32, i32, i32) {
    %c0_i32 = arith.constant 0 : i32
    %c0_i32_0 = arith.constant 0 : i32
    %c0_i32_1 = arith.constant 0 : i32
    %c0_i32_2 = arith.constant 0 : i32
    return %c0_i32, %c0_i32_0, %c0_i32_1 : i32, i32, i32
  }
  func.func @transform_4(%arg0: i32) -> (i32, i32) {
    %c0_i32 = arith.constant 0 : i32
    %c0_i32_0 = arith.constant 0 : i32
    %c0_i32_1 = arith.constant 0 : i32
    return %c0_i32, %c0_i32_0 : i32, i32
  }
  func.func @transform_5(%arg0: i32) -> (i32, i32) {
    %c0_i32 = arith.constant 0 : i32
    %c0_i32_0 = arith.constant 0 : i32
    %c0_i32_1 = arith.constant 0 : i32
    return %c0_i32, %c0_i32_0 : i32, i32
  }
  func.func @transform_6(%arg0: i32) -> (i32, i32) {
    %c0_i32 = arith.constant 0 : i32
    %c0_i32_0 = arith.constant 0 : i32
    %c0_i32_1 = arith.constant 0 : i32
    return %c0_i32, %c0_i32_0 : i32, i32
  }
  func.func @transform_7(%arg0: i32) -> (i32, i32) {
    %c0_i32 = arith.constant 0 : i32
    %c0_i32_0 = arith.constant 0 : i32
    %c0_i32_1 = arith.constant 0 : i32
    return %c0_i32, %c0_i32_0 : i32, i32
  }
  func.func @transform_8(%arg0: i32) -> (i32, i32) {
    %c0_i32 = arith.constant 0 : i32
    %c0_i32_0 = arith.constant 0 : i32
    %c0_i32_1 = arith.constant 0 : i32
    return %c0_i32, %c0_i32_0 : i32, i32
  }
  func.func @transform_9(%arg0: i32) -> (i32, i32) {
    %c0_i32 = arith.constant 0 : i32
    %c0_i32_0 = arith.constant 0 : i32
    %c0_i32_1 = arith.constant 0 : i32
    return %c0_i32, %c0_i32_0 : i32, i32
  }
  func.func @transform_10(%arg0: i32) -> (i32, i32) {
    %c0_i32 = arith.constant 0 : i32
    %c0_i32_0 = arith.constant 0 : i32
    %c0_i32_1 = arith.constant 0 : i32
    return %c0_i32, %c0_i32_0 : i32, i32
  }
  func.func @transform_11(%arg0: i32) -> (i32, i32, i32, i32) {
    %c0_i32 = arith.constant 0 : i32
    %c0_i32_0 = arith.constant 0 : i32
    %c0_i32_1 = arith.constant 0 : i32
    %c0_i32_2 = arith.constant 0 : i32
    return %arg0, %c0_i32, %c0_i32_0, %c0_i32_1 : i32, i32, i32, i32
  }
  func.func @transform_12(%arg0: i32) -> (i32, i32, i32, i32) {
    %c0_i32 = arith.constant 0 : i32
    %c0_i32_0 = arith.constant 0 : i32
    %c0_i32_1 = arith.constant 0 : i32
    %c0_i32_2 = arith.constant 0 : i32
    return %arg0, %c0_i32, %c0_i32_0, %c0_i32_1 : i32, i32, i32, i32
  }
  func.func @transform_13(%arg0: i32) -> (i32, i32, i32) {
    %c0_i32 = arith.constant 0 : i32
    %c0_i32_0 = arith.constant 0 : i32
    %c0_i32_1 = arith.constant 0 : i32
    return %arg0, %c0_i32, %c0_i32_0 : i32, i32, i32
  }
}

</mosaic_0001>

<bundles_post_ra>
// kernel: tpu_custom_call.1
= control target key start
LH: loop header
LB: loop body
LE: loop exit
PB: predicated region body
PF: predicated region fallthrough
CT: control target
= control target key end

     0   :  { %s5487_s0 = inlined_call_operand.vmem [shape: f32[2,4,8,128], index: 0, kind: input, shape index: {}]   ;;  %s5488_s1 = inlined_call_operand.vmem [shape: bf16[64,8], index: 1, kind: input, shape index: {}]   ;;  %s5489_s2 = inlined_call_operand.vmem [shape: f32[64,1], index: 2, kind: input, shape index: {}]   ;;  %s5490_s3 = inlined_call_operand.vmem [shape: bf16[3,64,128], index: 3, kind: input, shape index: {}]   ;;  %s5491_s4 = inlined_call_operand.vmem [shape: f32[64,1], index: 4, kind: input, shape index: {}]   ;;  %s5492_s5 = inlined_call_operand.vmem [shape: f32[1,64], index: 5, kind: input, shape index: {}]   ;;  %s5493_s6 = inlined_call_operand.<no memory space> [shape: f32[1,1], index: 6, kind: input, shape index: {}]   ;;  %s5494_s7 = inlined_call_operand.vmem [shape: bf16[64,8], index: 7, kind: input, shape index: {}]   ;;  %s5495_s8 = inlined_call_operand.vmem [shape: f32[64,1], index: 8, kind: input, shape index: {}]   ;;  %s5496_s9 = inlined_call_operand.vmem [shape: bf16[8,64], index: 9, kind: input, shape index: {}]   ;;  %s5497_s10 = inlined_call_operand.vmem [shape: f32[8,1], index: 10, kind: input, shape index: {}]   ;;  %s5498_s11 = inlined_call_operand.hbm [shape: bf16[2,4,8,128], index: 11, kind: output, shape index: {0}]   ;;  %s5499_s12 = inlined_call_operand.hbm [shape: f32[2,4,1,128], index: 12, kind: output, shape index: {1}]   ;;  %s5500_s13 = inlined_call_operand.vmem [shape: f32[2,8,1], index: 13, kind: output, shape index: {2}]  }
   0x1   :  { %5541 = sst [smem:[#allocation14_spill]] %s5487_s0  ;;  %v19_v0 = vstv %s5493_s6 }
   0x2   :  { %5542 = sst [smem:[#allocation15_spill]] %s5488_s1  ;;  %20 = vst [vmem:[#allocation5] sm:$0x1] %v19_v0 }
   0x3   :  { %5543 = sst [smem:[#allocation16_spill]] %s5489_s2 }
   0x4   :  { %5544 = sst [smem:[#allocation17_spill]] %s5490_s3 }
   0x5   :  { %5545 = sst [smem:[#allocation18_spill]] %s5491_s4 }
   0x6   :  { %21 = vsyncpa [#allocation7], 0 }
   0x7   :  { %23 = vsyncpa [#allocation7 + $0x1], 0 }
   0x8   :  { %24 = vsyncpa [#allocation9], 0 }
   0x9   :  { %26 = vsyncpa [#allocation9 + $0x1], 0  ;;  %s4181_s27 = smov 0   ;;  %s4183_s28 = smov 0  }
   0xa   :  { %s4185_s29 = smov 0   ;;  %s4187_s30 = smov 0  }
   0xb LB: > { %5546 = sst [smem:[#allocation12_spill]] %s4094_s29  ;;  %s4202_s6 = sadd.s32 4294967295, %s4098_s30   ;;  %s4098_s30 = sphi %s4187_s30, %s5606_s30   ;;  %s4094_s29 = sphi %s4185_s29, %s5603_s29   ;;  %s4090_s28 = sphi %s4183_s28, %s5605_s28   ;;  %s4086_s27 = sphi %s4181_s27, %s5604_s27  }
   0xc   : > { %s3074_s14 = sadd.s32 4294967294, %s4098_s30   ;;  %s4206_s15 = sadd.s32 1, %s4098_s30  }
   0xd   : > { %s275_s16 = sadd.s32 1, %s4094_s29  ;;  %s272_s17 = ssub.s32 %s4098_s30, %s4206_s15 }
   0xe   : > { %p285_p0 = scmp.ne.s32.totalorder %s4094_s29, %s4090_s28  ;;  %p273_p1 = scmp.eq.s32.totalorder %s272_s17, 0 }
   0xf   : > { %p286_p2 = scmp.eq.s32.totalorder %s4202_s6, 1  ;;  %p291_p3 = scmp.ne.s32.totalorder %s4090_s28, %s4086_s27 }
  0x10   : > { %p292_p4 = scmp.eq.s32.totalorder %s3074_s14, 1  ;;  %p3077_p7 = scmp.ge.s32.totalorder %s4098_s30, 1 }
  0x11   : > { %s4217_s18 = scalar_select %p273_p1, %s4094_s29, %s275_s16  }
  0x12   : > { %p4219_p5 = por %p286_p2, %p285_p0  ;;  %p4223_p6 = por %p292_p4, %p291_p3 }
  0x13   : > { %5547 = sst [smem:[#allocation13_spill]] %s4217_s18  ;;  %p400_p8 = scmp.lt.s32.totalorder %s4098_s30, 3 }
  0x15   : > { %p401_p9 = pnand %p3077_p7, %p400_p8 }
  0x16   : > { %p453_p10 = scmp.lt.s32.totalorder (!%p401_p9), %s4202_s6, 1  ;;  %s5550_s2 = sld [smem:[#allocation16_spill]] (!%p401_p9) }
  0x17   : > { %404 = sbr.rel (%p401_p9) target bundleno = 2396 (0x95c), region = 64  ;;  %s5551_s0 = sld [smem:[#allocation14_spill]] (!%p401_p9) }
  0x18   : > { %s5552_s1 = sld [smem:[#allocation15_spill]] (!%p401_p9)  ;;  %s5270_s24 = sand.u32 (!%p401_p9), 1, %s4090_s28  }
  0x19   : > { %s5575_s4 = sld [smem:[#allocation18_spill]] (!%p401_p9)  ;;  %s3079_s25 = sshll.u32 (!%p401_p9), %s5270_s24, 2 }
  0x1a   : > { %s5576_s3 = sld [smem:[#allocation17_spill]] (!%p401_p9)  ;;  %s3391_s21 = sshll.u32 (!%p401_p9), %s4202_s6, 2 }
  0x1b   : > { %s2948_s29 = scalar_lea.hbm (!%p401_p9), %s5499_s12, %s3391_s21  ;;  %s2917_s14 = scalar_lea.sflag (!%p401_p9), [#allocation9], %s5270_s24 }
  0x1c   : > { %v4100_v1 = vmov 0   ;;  %v471_v2 = vld [vmem:[%s5550_s2] sm:$0xff]  ;;  %s4234_s23 = scalar_select %p453_p10, %s4202_s6, 1  ;;  %v473_v3 = vld [vmem:[%s5550_s2 + $0x10] sm:$0xff]  ;;  %vm554_vm0 = vcmask 1043456   ;;  %v472_v16 = vld [vmem:[%s5550_s2 + $0x8] sm:$0xff] }
  0x1d   : > { %3839 = vset.pattern.permute.xlu0 %v4100_v1  ;;  %3840 = vset.pattern.permute.xlu1 %v4100_v1  ;;  %vm541_vm1 = vcmask 64512   ;;  %v474_v18 = vld [vmem:[%s5550_s2 + $0x18] sm:$0xff]  ;;  %v477_v20 = vld [vmem:[%s5550_s2 + $0x30] sm:$0xff]  ;;  %v475_v22 = vld [vmem:[%s5550_s2 + $0x20] sm:$0xff]  ;;  %vm732_vm11 = vcmask 519168   ;;  %vm1791_vm12 = vcmask 523264  }
  0x1e   : > { %483 = vperm.xlu0 %3839, %v471_v2   ;;  %3841 = vset.pattern.permute.xlu2 %v4100_v1  ;;  %s3394_s26 = sshll.u32 %s4234_s23, 5  ;;  %v3395_v15 = vld [vmem:[%s5552_s1] sm:$0xff]  ;;  %v3396_v19 = vld [vmem:[%s5552_s1 + $0x8] sm:$0xff]  ;;  %v478_v21 = vld [vmem:[%s5550_s2 + $0x38] sm:$0xff] }
  0x1f   : > { %493 = vperm.xlu1 %3840, %v473_v3   ;;  %s4243_s17 = scalar_lea.vmem %s5551_s0, %s3394_s26  ;;  %503 = vperm.xlu2 %3841, %v475_v22   ;;  %v476_v23 = vld [vmem:[%s5550_s2 + $0x28] sm:$0xff]  ;;  %v3397_v24 = vld [vmem:[%s5552_s1 + $0x10] sm:$0xff]  ;;  %v3398_v25 = vld [vmem:[%s5552_s1 + $0x18] sm:$0xff]  ;;  %s5276_s26 = scalar_lea.vmem [#allocation8], %s3079_s25 }
  0x20   : > { %v479_v4 = vld [vmem:[%s4243_s17] sm:$0xff]  ;;  %v3103_v5 = vld [vmem:[%s4243_s17 + $0x8] sm:$0xff]  ;;  %v3108_v6 = vld [vmem:[%s4243_s17 + $0x10] sm:$0xff]  ;;  %s2949_s18 = sshll.u32 %s5276_s26, 4  ;;  %s2951_s25 = sshll.u32 %s2948_s29, 4  ;;  %s2950_s18 = int_to_ptr.vmem [resolvable:$true] %s2949_s18  ;;  %s2952_s25 = int_to_ptr.hbm [resolvable:$true] %s2951_s25 }
  0x21   : > { %v480_v7 = vpack.c.bf16 %v479_v4, %v479_v4  ;;  %v751_v8 = vpack.c.bf16 %v3103_v5, %v3103_v5  ;;  %v942_v9 = vpack.c.bf16 %v3108_v6, %v3108_v6  ;;  %v3113_v10 = vld [vmem:[%s4243_s17 + $0x18] sm:$0xff]  ;;  %s4018_s16 = sshra.s32 %s2952_s25, 4  ;;  %s4019_s16 = int_to_ptr.hbm [resolvable:$true] %s4018_s16 }
  0x22   : > { %v1133_v11 = vpack.c.bf16 %v3113_v10, %v3113_v10  ;;  %p4025_p0 = scmp.lt.s32.totalorder %s4019_s16, %s5499_s12 }
  0x23   : > { %v556_v12 = vsel %vm554_vm0, %v480_v7, 0  ;;  %v753_v13 = vsel %vm554_vm0, %v751_v8, 0  ;;  %v944_v14 = vsel %vm554_vm0, %v942_v9, 0  ;;  %v4101_v7 = vmov 64.0  }
  0x24   : > { %565 = vmatpush.bf16.msra.mxu0 %v556_v12  ;;  %762 = vmatpush.bf16.msra.mxu1 %v753_v13  ;;  %v1135_v17 = vsel %vm554_vm0, %v1133_v11, 0  ;;  %3942 = vrcp.f32 %v4101_v7 }
  0x25   : > { %953 = vmatpush.bf16.msra.mxu2 %v944_v14  ;;  %1144 = vmatpush.bf16.msra.mxu3 %v1135_v17 }
  0x26   : > { %488 = vperm.xlu0 %3839, %v472_v16  }
  0x27   : > { %3099 = vmatmul.msk.bf16.vlgmr.msra.gmra.mxu0 %vm541_vm1, %v3395_v15  ;;  %3104 = vmatmul.msk.bf16.vlgmr.msra.gmra.mxu1 %vm541_vm1, %v3395_v15 }
  0x28   : > { %3109 = vmatmul.msk.bf16.vlgmr.msra.gmra.mxu2 %vm541_vm1, %v3395_v15  ;;  %3114 = vmatmul.msk.bf16.vlgmr.msra.gmra.mxu3 %vm541_vm1, %v3395_v15 }
  0x29   : > { %498 = vperm.xlu1 %3840, %v474_v18   ;;  %508 = vperm.xlu2 %3841, %v476_v23  }
  0x2e   : > { %513 = vperm.xlu0 %3839, %v477_v20  }
  0x31   : > { %518 = vperm.xlu1 %3840, %v478_v21  }
  0x37   : > { %3100 = vmatmul.msk.bf16.gmra.mxu0 %vm541_vm1, %v3396_v19  ;;  %3105 = vmatmul.msk.bf16.gmra.mxu1 %vm541_vm1, %v3396_v19 }
  0x38   : > { %3110 = vmatmul.msk.bf16.gmra.mxu2 %vm541_vm1, %v3396_v19  ;;  %3115 = vmatmul.msk.bf16.gmra.mxu3 %vm541_vm1, %v3396_v19 }
  0x47   : > { %3101 = vmatmul.msk.bf16.gmra.mxu0 %vm541_vm1, %v3397_v24  ;;  %3106 = vmatmul.msk.bf16.gmra.mxu1 %vm541_vm1, %v3397_v24 }
  0x48   : > { %3111 = vmatmul.msk.bf16.gmra.mxu2 %vm541_vm1, %v3397_v24  ;;  %3116 = vmatmul.msk.bf16.gmra.mxu3 %vm541_vm1, %v3397_v24 }
  0x57   : > { %3102 = vmatmul.msk.bf16.gmra.mxu0 %vm541_vm1, %v3398_v25  ;;  %3107 = vmatmul.msk.bf16.gmra.mxu1 %vm541_vm1, %v3398_v25 }
  0x58   : > { %3112 = vmatmul.msk.bf16.gmra.mxu2 %vm541_vm1, %v3398_v25  ;;  %3117 = vmatmul.msk.bf16.gmra.mxu3 %vm541_vm1, %v3398_v25 }
  0x79   : > { %v4307_v52 = vpop.permute.xlu2 %503 }
  0x83   : > { %v509_v15 = vpop.permute.xlu2 %508 }
  0x90   : > { %v484_v36 = vpop.permute.xlu0 %483 }
  0x91   : > { %v494_v41 = vpop.permute.xlu1 %493 }
  0x98   : > { %v489_v42 = vpop.permute.xlu0 %488 }
  0x9b   : > { %v499_v53 = vpop.permute.xlu1 %498 }
  0xa4   : > { %v567_v26 = vpop.f32.mrf.mxu0  ;;  %v764_v27 = vpop.f32.mrf.mxu1 }
  0xa5   : > { %v4299_v43 = vadd.f32 %v567_v26, %v484_v36  ;;  %v4309_v54 = vadd.f32 %v764_v27, %v484_v36 }
  0xa7   : > { %v587_v49 = vmax.f32 %v4299_v43, 0.0  ;;  %v784_v0 = vmax.f32 %v4309_v54, 0.0 }
  0xab   : > { %v955_v28 = vpop.f32.mrf.mxu2  ;;  %v1146_v29 = vpop.f32.mrf.mxu3 }
  0xac   : > { %v569_v30 = vpop.f32.mrf.mxu0  ;;  %v766_v31 = vpop.f32.mrf.mxu1  ;;  %v4334_v8 = vadd.f32 %v955_v28, %v484_v36  ;;  %v4336_v9 = vadd.f32 %v1146_v29, %v484_v36 }
  0xad   : > { %v4301_v44 = vadd.f32 %v569_v30, %v489_v42  ;;  %v4318_v60 = vadd.f32 %v766_v31, %v489_v42  ;;  %v4364_v30 = vpop.eup %3942 }
  0xae   : > { %v5504_v26 = vmax.f32 %v4334_v8, 0.0  ;;  %v5507_v27 = vmax.f32 %v4336_v9, 0.0  ;;  %vm613_vm2 = vweird.f32 %v4364_v30 }
  0xaf   : > { %v588_v50 = vmax.f32 %v4301_v44, 0.0  ;;  %v785_v4 = vmax.f32 %v4318_v60, 0.0 }
  0xb1   : > { %v595_v56 = vadd.f32 %v588_v50, %v587_v49  ;;  %v792_v23 = vadd.f32 %v785_v4, %v784_v0 }
  0xb3   : > { %v957_v32 = vpop.f32.mrf.mxu2  ;;  %v1148_v33 = vpop.f32.mrf.mxu3 }
  0xb4   : > { %v572_v34 = vpop.f32.mrf.mxu0  ;;  %v769_v35 = vpop.f32.mrf.mxu1  ;;  %v4330_v5 = vadd.f32 %v957_v32, %v489_v42  ;;  %v4332_v6 = vadd.f32 %v1148_v33, %v489_v42 }
  0xb5   : > { %v4305_v51 = vadd.f32 %v572_v34, %v494_v41  ;;  %v4320_v63 = vadd.f32 %v769_v35, %v494_v41  ;;  %v514_v35 = vpop.permute.xlu0 %513 }
  0xb6   : > { %v5503_v21 = vmax.f32 %v4330_v5, 0.0  ;;  %v5506_v22 = vmax.f32 %v4332_v6, 0.0 }
  0xb7   : > { %v589_v55 = vmax.f32 %v4305_v51, 0.0  ;;  %v786_v11 = vmax.f32 %v4320_v63, 0.0 }
  0xb9   : > { %v596_v1 = vadd.f32 %v595_v56, %v589_v55  ;;  %v793_v31 = vadd.f32 %v792_v23, %v786_v11 }
  0xbb   : > { %v960_v37 = vpop.f32.mrf.mxu2  ;;  %v1151_v38 = vpop.f32.mrf.mxu3 }
  0xbc   : > { %v574_v39 = vpop.f32.mrf.mxu0  ;;  %v771_v40 = vpop.f32.mrf.mxu1  ;;  %v4341_v12 = vadd.f32 %v960_v37, %v494_v41  ;;  %v4343_v13 = vadd.f32 %v1151_v38, %v494_v41  ;;  %v1174_v41 = vadd.f32 %v5506_v22, %v5507_v27 }
  0xbd   : > { %v4316_v57 = vadd.f32 %v574_v39, %v499_v53  ;;  %v4338_v10 = vadd.f32 %v771_v40, %v499_v53  ;;  %v983_v40 = vadd.f32 %v5503_v21, %v5504_v26 }
  0xbe   : > { %v5502_v32 = vmax.f32 %v4341_v12, 0.0  ;;  %v5505_v33 = vmax.f32 %v4343_v13, 0.0 }
  0xbf   : > { %v590_v2 = vmax.f32 %v4316_v57, 0.0  ;;  %v5518_v28 = vmax.f32 %v4338_v10, 0.0 }
  0xc1   : > { %v597_v16 = vadd.f32 %v596_v1, %v590_v2  ;;  %v1175_v1 = vadd.f32 %v1174_v41, %v5505_v33 }
  0xc3   : > { %v962_v45 = vpop.f32.mrf.mxu2  ;;  %v1153_v46 = vpop.f32.mrf.mxu3 }
  0xc4   : > { %v577_v47 = vpop.f32.mrf.mxu0  ;;  %v774_v48 = vpop.f32.mrf.mxu1  ;;  %v4386_v42 = vadd.f32 %v962_v45, %v499_v53 }
  0xc5   : > { %v4327_v3 = vadd.f32 %v577_v47, %v4307_v52  ;;  %v4346_v14 = vadd.f32 %v774_v48, %v4307_v52  ;;  %v4388_v47 = vadd.f32 %v1153_v46, %v499_v53  ;;  %v794_v48 = vadd.f32 %v793_v31, %v5518_v28  ;;  %v519_v46 = vpop.permute.xlu1 %518 }
  0xc7   : > { %v591_v17 = vmax.f32 %v4327_v3, 0.0  ;;  %v5512_v34 = vmax.f32 %v4346_v14, 0.0 }
  0xc9   : > { %v598_v36 = vadd.f32 %v597_v16, %v591_v17  ;;  %v795_v53 = vadd.f32 %v794_v48, %v5512_v34 }
  0xcb   : > { %v965_v58 = vpop.f32.mrf.mxu2  ;;  %v1156_v59 = vpop.f32.mrf.mxu3 }
  0xcc   : > { %v579_v61 = vpop.f32.mrf.mxu0  ;;  %v776_v62 = vpop.f32.mrf.mxu1  ;;  %v4399_v7 = vadd.f32 %v965_v58, %v4307_v52  ;;  %v4402_v45 = vadd.f32 %v1156_v59, %v4307_v52  ;;  %v5510_v58 = vmax.f32 %v4388_v47, 0.0 }
  0xcd   : > { %v4351_v18 = vadd.f32 %v579_v61, %v509_v15  ;;  %v4362_v29 = vadd.f32 %v776_v62, %v509_v15  ;;  %v609_v61 = vmul.f32 64.0, %v4364_v30  ;;  %v984_v62 = vadd.f32 %v983_v40, %v5502_v32 }
  0xce   : > { %v5509_v40 = vmax.f32 %v4386_v42, 0.0  ;;  %v5514_v33 = vmax.f32 %v4399_v7, 0.0  ;;  %v5515_v22 = vmax.f32 %v4402_v45, 0.0 }
  0xcf   : > { %v5523_v37 = vmax.f32 %v4351_v18, 0.0  ;;  %v5511_v56 = vmax.f32 %v4362_v29, 0.0  ;;  %v610_v21 = vsub.f32 1.0, %v609_v61  ;;  %v5553_v3 = vmax.f32 %v4351_v18, 0.0 }
  0xd1   : > { %v599_v16 = vadd.f32 %v598_v36, %v5523_v37  ;;  %v796_v48 = vadd.f32 %v795_v53, %v5511_v56 }
  0xd3   : > { %v967_v19 = vpop.f32.mrf.mxu2  ;;  %v1158_v20 = vpop.f32.mrf.mxu3 }
  0xd4   : > { %v582_v24 = vpop.f32.mrf.mxu0  ;;  %v779_v25 = vpop.f32.mrf.mxu1  ;;  %v4412_v41 = vadd.f32 %v967_v19, %v509_v15  ;;  %v4414_v52 = vadd.f32 %v1158_v20, %v509_v15 }
  0xd5   : > { %v4374_v38 = vadd.f32 %v582_v24, %v514_v35  ;;  %v4376_v39 = vadd.f32 %v779_v25, %v514_v35 }
  0xd7   : > { %v5513_v23 = vmax.f32 %v4374_v38, 0.0  ;;  %v5508_v24 = vmax.f32 %v4376_v39, 0.0 }
  0xd9   : > { %v600_v15 = vadd.f32 %v599_v16, %v5513_v23  ;;  %v797_v20 = vadd.f32 %v796_v48, %v5508_v24 }
  0xdb   : > { %v970_v25 = vpop.f32.mrf.mxu2  ;;  %v1161_v31 = vpop.f32.mrf.mxu3 }
  0xdc   : > { %v584_v59 = vpop.f32.mrf.mxu0  ;;  %v781_v32 = vpop.f32.mrf.mxu1  ;;  %v4424_v27 = vadd.f32 %v970_v25, %v514_v35  ;;  %v4426_v19 = vadd.f32 %v1161_v31, %v514_v35  ;;  %v5519_v25 = vmax.f32 %v4412_v41, 0.0  ;;  %v5522_v35 = vmax.f32 %v4414_v52, 0.0 }
  0xdd   : > { %v4418_v36 = vadd.f32 %v584_v59, %v519_v46  ;;  %v4420_v26 = vadd.f32 %v781_v32, %v519_v46  ;;  %v985_v32 = vadd.f32 %v984_v62, %v5509_v40  ;;  %v1176_v59 = vadd.f32 %v1175_v1, %v5510_v58 }
  0xde   : > { %v5520_v62 = vmax.f32 %v4424_v27, 0.0  ;;  %v5521_v1 = vmax.f32 %v4426_v19, 0.0  ;;  %v611_v58 = vmul.f32 %v4364_v30, %v610_v21 }
  0xdf   : > { %v5517_v53 = vmax.f32 %v4418_v36, 0.0  ;;  %v5516_v61 = vmax.f32 %v4420_v26, 0.0  ;;  %v986_v48 = vadd.f32 %v985_v32, %v5514_v33  ;;  %v1177_v24 = vadd.f32 %v1176_v59, %v5515_v22 }
  0xe1   : > { %v601_v16 = vadd.f32 %v600_v15, %v5517_v53  ;;  %v798_v31 = vadd.f32 %v797_v20, %v5516_v61  ;;  %v987_v15 = vadd.f32 %v986_v48, %v5519_v25  ;;  %v1178_v20 = vadd.f32 %v1177_v24, %v5522_v35 }
  0xe2   : > { %v612_v24 = vadd.f32 %v4364_v30, %v611_v58 }
  0xe3   : > { %v602_v40 = vrot.slane %v601_v16, 4  ;;  %v799_v56 = vrot.slane %v798_v31, 4  ;;  %v972_v34 = vpop.f32.mrf.mxu2  ;;  %v1163_v23 = vpop.f32.mrf.mxu3  ;;  %v988_v61 = vadd.f32 %v987_v15, %v5520_v62  ;;  %v1179_v21 = vadd.f32 %v1178_v20, %v5521_v1 }
  0xe4   : > { %v4455_v32 = vadd.f32 %v972_v34, %v519_v46  ;;  %v4457_v33 = vadd.f32 %v1163_v23, %v519_v46  ;;  %v614_v20 = vsel %vm613_vm2, %v4364_v30, %v612_v24 }
  0xe5   : > { %v603_v59 = vadd.f32 %v602_v40, %v601_v16  ;;  %v800_v22 = vadd.f32 %v799_v56, %v798_v31 }
  0xe6   : > { %v982_v53 = vmax.f32 %v4455_v32, 0.0  ;;  %v1173_v28 = vmax.f32 %v4457_v33, 0.0 }
  0xe7   : > { %v604_v48 = vrot.slane %v603_v59, 2  ;;  %v801_v25 = vrot.slane %v800_v22, 2 }
  0xe8   : > { %v989_v34 = vadd.f32 %v988_v61, %v982_v53  ;;  %v1180_v56 = vadd.f32 %v1179_v21, %v1173_v28 }
  0xe9   : > { %v605_v46 = vadd.f32 %v604_v48, %v603_v59  ;;  %v802_v23 = vadd.f32 %v801_v25, %v800_v22 }
  0xea   : > { %v990_v40 = vrot.slane %v989_v34, 4  ;;  %v1181_v16 = vrot.slane %v1180_v56, 4 }
  0xeb   : > { %v606_v31 = vrot.slane %v605_v46, 1  ;;  %v803_v15 = vrot.slane %v802_v23, 1 }
  0xec   : > { %v991_v35 = vadd.f32 %v990_v40, %v989_v34  ;;  %v1182_v58 = vadd.f32 %v1181_v16, %v1180_v56  ;;  %v5556_v56 = vmax.f32 %v4346_v14, 0.0  ;;  %v5557_v40 = vmax.f32 %v4418_v36, 0.0 }
  0xed   : > { %v607_v62 = vadd.f32 %v606_v31, %v605_v46  ;;  %v804_v1 = vadd.f32 %v803_v15, %v802_v23 }
  0xee   : > { %v992_v21 = vrot.slane %v991_v35, 2  ;;  %v1183_v48 = vrot.slane %v1182_v58, 2 }
  0xef   : > { %v615_v37 = vmul.f32 %v614_v20, %v607_v62  ;;  %v805_v25 = vmul.f32 %v804_v1, %v614_v20 }
  0xf0   : > { %v993_v1 = vadd.f32 %v992_v21, %v991_v35  ;;  %v1184_v24 = vadd.f32 %v1183_v48, %v1182_v58  ;;  %v5558_v21 = vmax.f32 %v4362_v29, 0.0  ;;  %v5560_v29 = vmax.f32 %v4420_v26, 0.0 }
  0xf1   : > { %v4474_v61 = vsub.f32 %v587_v49, %v615_v37  ;;  %v4478_v59 = vsub.f32 %v588_v50, %v615_v37  ;;  %v4482_v22 = vsub.f32 %v589_v55, %v615_v37  ;;  %v4486_v30 = vsub.f32 %v590_v2, %v615_v37 }
  0xf2   : > { %v4494_v44 = vsub.f32 %v591_v17, %v615_v37  ;;  %v4500_v55 = vsub.f32 %v784_v0, %v805_v25  ;;  %v4504_v57 = vsub.f32 %v785_v4, %v805_v25  ;;  %v4508_v2 = vsub.f32 %v786_v11, %v805_v25 }
  0xf3   : > { %v624_v43 = vmul.f32 %v4474_v61, %v4474_v61  ;;  %v625_v49 = vmul.f32 %v4478_v59, %v4478_v59  ;;  %v626_v50 = vmul.f32 %v4482_v22, %v4482_v22  ;;  %v4512_v17 = vsub.f32 %v5553_v3, %v615_v37 }
  0xf4   : > { %v627_v62 = vmul.f32 %v4486_v30, %v4486_v30  ;;  %v5554_v0 = vmax.f32 %v4338_v10, 0.0  ;;  %v814_v60 = vmul.f32 %v4500_v55, %v4500_v55  ;;  %v815_v63 = vmul.f32 %v4504_v57, %v4504_v57 }
  0xf5   : > { %v632_v51 = vadd.f32 %v625_v49, %v624_v43  ;;  %v5555_v4 = vmax.f32 %v4374_v38, 0.0  ;;  %v628_v18 = vmul.f32 %v4494_v44, %v4494_v44  ;;  %v4532_v46 = vsub.f32 %v5556_v56, %v805_v25 }
  0xf6   : > { %v4518_v34 = vsub.f32 %v5554_v0, %v805_v25  ;;  %v816_v10 = vmul.f32 %v4508_v2, %v4508_v2  ;;  %v822_v23 = vadd.f32 %v815_v63, %v814_v60  ;;  %v4538_v16 = vsub.f32 %v5557_v40, %v615_v37 }
  0xf7   : > { %v633_v54 = vadd.f32 %v632_v51, %v626_v50  ;;  %v4526_v11 = vsub.f32 %v5555_v4, %v615_v37  ;;  %v629_v38 = vmul.f32 %v4512_v17, %v4512_v17  ;;  %v994_v31 = vrot.slane %v993_v1, 1 }
  0xf8   : > { %v1185_v15 = vrot.slane %v1184_v24, 1  ;;  %v4544_v48 = vsub.f32 %v5558_v21, %v805_v25  ;;  %v817_v14 = vmul.f32 %v4518_v34, %v4518_v34  ;;  %v823_v43 = vadd.f32 %v822_v23, %v816_v10 }
  0xf9   : > { %v634_v35 = vadd.f32 %v633_v54, %v627_v62  ;;  %v630_v49 = vmul.f32 %v4526_v11, %v4526_v11  ;;  %v5559_v50 = vmax.f32 %v4376_v39, 0.0  ;;  %v818_v3 = vmul.f32 %v4532_v46, %v4532_v46 }
  0xfa   : > { %v1186_v36 = vadd.f32 %v1185_v15, %v1184_v24  ;;  %v824_v62 = vadd.f32 %v823_v43, %v817_v14  ;;  %v4558_v54 = vsub.f32 %v5560_v29, %v805_v25  ;;  %v995_v0 = vadd.f32 %v994_v31, %v993_v1 }
  0xfb   : > { %v635_v58 = vadd.f32 %v634_v35, %v628_v18  ;;  %v4552_v51 = vsub.f32 %v5559_v50, %v805_v25  ;;  %v631_v63 = vmul.f32 %v4538_v16, %v4538_v16  ;;  %v819_v24 = vmul.f32 %v4544_v48, %v4544_v48 }
  0xfc   : > { %v1187_v60 = vmul.f32 %v1186_v36, %v614_v20  ;;  %v825_v39 = vadd.f32 %v824_v62, %v818_v3  ;;  %v5561_v18 = vmax.f32 %v4336_v9, 0.0  ;;  %v5562_v56 = vmax.f32 %v4332_v6, 0.0 }
  0xfd   : > { %v636_v37 = vadd.f32 %v635_v58, %v629_v38  ;;  %v820_v25 = vmul.f32 %v4552_v51, %v4552_v51  ;;  %v821_v23 = vmul.f32 %v4558_v54, %v4558_v54  ;;  %v996_v40 = vmul.f32 %v995_v0, %v614_v20 }
  0xfe   : > { %v4566_v35 = vsub.f32 %v5561_v18, %v1187_v60  ;;  %v4570_v10 = vsub.f32 %v5562_v56, %v1187_v60  ;;  %v826_v1 = vadd.f32 %v825_v39, %v819_v24  ;;  %v5563_v38 = vmax.f32 %v4343_v13, 0.0 }
  0xff   : > { %v637_v4 = vadd.f32 %v636_v37, %v630_v49  ;;  %v5564_v21 = vmax.f32 %v4388_v47, 0.0  ;;  %v5565_v20 = vmax.f32 %v4402_v45, 0.0  ;;  %v5566_v50 = vmax.f32 %v4334_v8, 0.0 }
 0x100   : > { %v4578_v31 = vsub.f32 %v5563_v38, %v1187_v60  ;;  %v827_v15 = vadd.f32 %v826_v1, %v820_v25  ;;  %v1196_v6 = vmul.f32 %v4566_v35, %v4566_v35  ;;  %v1197_v58 = vmul.f32 %v4570_v10, %v4570_v10 }
 0x101   : > { %v638_v26 = vadd.f32 %v637_v4, %v631_v63  ;;  %v4586_v14 = vsub.f32 %v5564_v21, %v1187_v60  ;;  %v4590_v36 = vsub.f32 %v5565_v20, %v1187_v60  ;;  %v4596_v3 = vsub.f32 %v5566_v50, %v996_v40 }
 0x102   : > { %v828_v49 = vadd.f32 %v827_v15, %v821_v23  ;;  %v1198_v13 = vmul.f32 %v4578_v31, %v4578_v31  ;;  %v1204_v37 = vadd.f32 %v1197_v58, %v1196_v6  ;;  %v5567_v62 = vmax.f32 %v4330_v5, 0.0 }
 0x103   : > { %v639_v9 = vrot.slane %v638_v26, 4  ;;  %v5568_v63 = vmax.f32 %v4341_v12, 0.0  ;;  %v5569_v45 = vmax.f32 %v4414_v52, 0.0  ;;  %v1199_v39 = vmul.f32 %v4586_v14, %v4586_v14 }
 0x104   : > { %v4600_v29 = vsub.f32 %v5567_v62, %v996_v40  ;;  %v829_v0 = vrot.slane %v828_v49, 4  ;;  %v1205_v8 = vadd.f32 %v1204_v37, %v1198_v13  ;;  %v1005_v18 = vmul.f32 %v4596_v3, %v4596_v3 }
 0x105   : > { %v640_v43 = vadd.f32 %v639_v9, %v638_v26  ;;  %v4604_v4 = vsub.f32 %v5568_v63, %v996_v40  ;;  %v4608_v24 = vsub.f32 %v5569_v45, %v1187_v60  ;;  %v5570_v26 = vmax.f32 %v4386_v42, 0.0 }
 0x106   : > { %v830_v56 = vadd.f32 %v829_v0, %v828_v49  ;;  %v1006_v12 = vmul.f32 %v4600_v29, %v4600_v29  ;;  %v5571_v52 = vmax.f32 %v4426_v19, 0.0  ;;  %v1200_v23 = vmul.f32 %v4590_v36, %v4590_v36 }
 0x107   : > { %v641_v47 = vrot.slane %v640_v43, 2  ;;  %v4616_v25 = vsub.f32 %v5570_v26, %v996_v40  ;;  %v1206_v38 = vadd.f32 %v1205_v8, %v1199_v39  ;;  %v1007_v6 = vmul.f32 %v4604_v4, %v4604_v4 }
 0x108   : > { %v4622_v1 = vsub.f32 %v5571_v52, %v1187_v60  ;;  %v831_v15 = vrot.slane %v830_v56, 2  ;;  %v1013_v58 = vadd.f32 %v1006_v12, %v1005_v18  ;;  %v4630_v42 = vsub.f32 %v1173_v28, %v1187_v60 }
 0x109   : > { %v642_v5 = vadd.f32 %v641_v47, %v640_v43  ;;  %v1201_v21 = vmul.f32 %v4608_v24, %v4608_v24  ;;  %v1207_v19 = vadd.f32 %v1206_v38, %v1200_v23  ;;  %v5572_v43 = vmax.f32 %v4399_v7, 0.0 }
 0x10a   : > { %v832_v13 = vadd.f32 %v831_v15, %v830_v56  ;;  %v1008_v37 = vmul.f32 %v4616_v25, %v4616_v25  ;;  %v1014_v50 = vadd.f32 %v1013_v58, %v1007_v6  ;;  %v1202_v62 = vmul.f32 %v4622_v1, %v4622_v1 }
 0x10b   : > { %v643_v9 = vrot.slane %v642_v5, 1  ;;  %v4636_v49 = vsub.f32 %v5572_v43, %v996_v40  ;;  %v1208_v33 = vadd.f32 %v1207_v19, %v1201_v21  ;;  %v5573_v28 = vmax.f32 %v4412_v41, 0.0 }
 0x10c   : > { %v833_v0 = vrot.slane %v832_v13, 1  ;;  %v1015_v63 = vadd.f32 %v1014_v50, %v1008_v37  ;;  %v1203_v7 = vmul.f32 %v4630_v42, %v4630_v42  ;;  %v5574_v8 = vmax.f32 %v4424_v27, 0.0 }
 0x10d   : > { %v644_v20 = vadd.f32 %v643_v9, %v642_v5  ;;  %v4644_v60 = vsub.f32 %v5573_v28, %v996_v40  ;;  %v1209_v45 = vadd.f32 %v1208_v33, %v1202_v62  ;;  %v1009_v39 = vmul.f32 %v4636_v49, %v4636_v49 }
 0x10e   : > { %v4652_v18 = vsub.f32 %v5574_v8, %v996_v40  ;;  %v834_v5 = vadd.f32 %v833_v0, %v832_v13  ;;  %v4658_v12 = vsub.f32 %v982_v53, %v996_v40 }
 0x10f   : > { %v645_v47 = vmul.f32 0.015873017, %v644_v20  ;;  %v1210_v56 = vadd.f32 %v1209_v45, %v1203_v7  ;;  %v1010_v41 = vmul.f32 %v4644_v60, %v4644_v60  ;;  %v1016_v26 = vadd.f32 %v1015_v63, %v1009_v39 }
 0x110   : > { %v835_v52 = vmul.f32 0.015873017, %v834_v5  ;;  %v1011_v9 = vmul.f32 %v4652_v18, %v4652_v18  ;;  %v1012_v15 = vmul.f32 %v4658_v12, %v4658_v12 }
 0x111   : > { %3944 = vrsqrt.f32 %v645_v47  ;;  %v1211_v23 = vrot.slane %v1210_v56, 4  ;;  %v1017_v38 = vadd.f32 %v1016_v26, %v1010_v41  ;;  %vm653_vm3 = vcmp.eq.f32.partialorder %v645_v47, inf }
 0x112   : > { %3946 = vrsqrt.f32 %v835_v52  ;;  %vm655_vm4 = vcmp.eq.f32.partialorder %v645_v47, 0.0  ;;  %vm843_vm5 = vcmp.eq.f32.partialorder %v835_v52, inf  ;;  %vm845_vm6 = vcmp.eq.f32.partialorder %v835_v52, 0.0 }
 0x113   : > { %v1212_v6 = vadd.f32 %v1211_v23, %v1210_v56  ;;  %v1018_v58 = vadd.f32 %v1017_v38, %v1011_v9  ;;  %v656_v56 = vand.u32 2147483648, %v645_v47 }
 0x115   : > { %v1213_v19 = vrot.slane %v1212_v6, 2  ;;  %v1019_v43 = vadd.f32 %v1018_v58, %v1012_v15 }
 0x117   : > { %v3945_v27 = vpop.eup %3944  ;;  %v1214_v32 = vadd.f32 %v1213_v19, %v1212_v6  ;;  %v1020_v53 = vrot.slane %v1019_v43, 4 }
 0x118   : > { %v647_v21 = vmul.f32 %v3945_v27, %v645_v47  ;;  %v3947_v40 = vpop.eup %3946 }
 0x119   : > { %v837_v37 = vmul.f32 %v3947_v40, %v835_v52  ;;  %v1215_v50 = vrot.slane %v1214_v32, 1  ;;  %v1021_v62 = vadd.f32 %v1020_v53, %v1019_v43 }
 0x11a   : > { %v648_v20 = vmul.f32 %v3945_v27, %v647_v21 }
 0x11b   : > { %v838_v28 = vmul.f32 %v3947_v40, %v837_v37  ;;  %v1216_v0 = vadd.f32 %v1215_v50, %v1214_v32  ;;  %v1022_v63 = vrot.slane %v1021_v62, 2 }
 0x11c   : > { %v649_v13 = vmul.f32 0.5, %v648_v20 }
 0x11d   : > { %v839_v45 = vmul.f32 0.5, %v838_v28  ;;  %v4664_v39 = vmul.f32 0.015873017, %v1216_v0  ;;  %v1023_v8 = vadd.f32 %v1022_v63, %v1021_v62 }
 0x11e   : > { %v650_v33 = vsub.f32 1.5, %v649_v13 }
 0x11f   : > { %v840_v41 = vsub.f32 1.5, %v839_v45  ;;  %3948 = vrsqrt.f32 %v4664_v39  ;;  %v1024_v23 = vrot.slane %v1023_v8, 1  ;;  %vm1225_vm7 = vcmp.eq.f32.partialorder %v4664_v39, inf }
 0x120   : > { %v651_v7 = vmul.f32 %v3945_v27, %v650_v33  ;;  %v846_v27 = vand.u32 2147483648, %v835_v52  ;;  %vm1227_vm8 = vcmp.eq.f32.partialorder %v4664_v39, 0.0 }
 0x121   : > { %v841_v9 = vmul.f32 %v3947_v40, %v840_v41  ;;  %v1025_v6 = vadd.f32 %v1024_v23, %v1023_v8 }
 0x122   : > { %v652_v5 = vmul.f32 %v651_v7, %v645_v47 }
 0x123   : > { %v842_v58 = vmul.f32 %v841_v9, %v835_v52  ;;  %v4667_v21 = vmul.f32 0.015873017, %v1025_v6 }
 0x124   : > { %v654_v26 = vsel %vm653_vm3, %v645_v47, %v652_v5 }
 0x125   : > { %v657_v38 = vsel %vm655_vm4, %v656_v56, %v654_v26  ;;  %v3949_v19 = vpop.eup %3948  ;;  %v844_v43 = vsel %vm843_vm5, %v835_v52, %v842_v58  ;;  %vm1034_vm9 = vcmp.eq.f32.partialorder %v4667_v21, inf  ;;  %vm1036_vm10 = vcmp.eq.f32.partialorder %v4667_v21, 0.0 }
 0x126   : > { %v658_v15 = vadd.f32 0.0001, %v657_v38  ;;  %v847_v20 = vsel %vm845_vm6, %v846_v27, %v844_v43  ;;  %v1219_v32 = vmul.f32 %v3949_v19, %v4664_v39 }
 0x127   : > { %v848_v47 = vadd.f32 0.0001, %v847_v20 }
 0x128   : > { %3950 = vrcp.f32 %v658_v15  ;;  %v1220_v53 = vmul.f32 %v3949_v19, %v1219_v32 }
 0x129   : > { %3952 = vrsqrt.f32 %v4667_v21 }
 0x12a   : > { %3954 = vrcp.f32 %v848_v47  ;;  %v1221_v13 = vmul.f32 0.5, %v1220_v53 }
 0x12c   : > { %v1222_v28 = vsub.f32 1.5, %v1221_v13 }
 0x12e   : > { %v3951_v40 = vpop.eup %3950 }
 0x12f   : > { %v4672_v37 = vmul.f32 %v3951_v40, %v4494_v44  ;;  %v4675_v50 = vmul.f32 %v3951_v40, %v4512_v17  ;;  %v4678_v62 = vmul.f32 %v3951_v40, %v4526_v11  ;;  %v4681_v52 = vmul.f32 %v3951_v40, %v4538_v16  ;;  %v3953_v33 = vpop.eup %3952 }
 0x130   : > { %v660_v0 = vmul.f32 %v3951_v40, %v4474_v61  ;;  %v661_v63 = vmul.f32 %v3951_v40, %v4478_v59  ;;  %v662_v7 = vmul.f32 %v3951_v40, %v4482_v22  ;;  %v1028_v11 = vmul.f32 %v3953_v33, %v4667_v21  ;;  %v3955_v8 = vpop.eup %3954 }
 0x131   : > { %v3469_v44 = vpack.c.bf16 %v4675_v50, %v4672_v37  ;;  %v3474_v17 = vpack.c.bf16 %v4681_v52, %v4678_v62  ;;  %v4692_v45 = vmul.f32 %v3951_v40, %v4486_v30  ;;  %v1223_v16 = vmul.f32 %v3949_v19, %v1222_v28 }
 0x132   : > { %684 = vxpose.xlu1.b32.start [1/8] (short) %v660_v0, 128  ;;  %v3459_v61 = vpack.c.bf16 %v661_v63, %v660_v0  ;;  %v1228_v59 = vand.u32 2147483648, %v4664_v39  ;;  %v1029_v22 = vmul.f32 %v3953_v33, %v1028_v11  ;;  %v4699_v56 = vmul.f32 %v3955_v8, %v4552_v51 }
 0x133   : > { %3729 = vst [vmem:[#allocation2 + $0x58] sm:$0xff] %v3469_v44   ;;  %v3464_v5 = vpack.c.bf16 %v4692_v45, %v662_v7  ;;  %v4702_v30 = vmul.f32 %v3955_v8, %v4558_v54  ;;  %v1224_v41 = vmul.f32 %v1223_v16, %v4664_v39  ;;  %v850_v26 = vmul.f32 %v3955_v8, %v4500_v55 }
 0x134   : > { %3730 = vst [vmem:[#allocation2 + $0x18] sm:$0xff] %v3474_v17   ;;  %v1030_v23 = vmul.f32 0.5, %v1029_v22  ;;  %v4707_v38 = vmul.f32 %v3955_v8, %v4504_v57  ;;  %v4710_v9 = vmul.f32 %v3955_v8, %v4508_v2  ;;  %v4713_v15 = vmul.f32 %v3955_v8, %v4518_v34 }
 0x135   : > { %3460 = vst [vmem:[#allocation2 + $0x30] sm:$0xff] %v3459_v61   ;;  %v3494_v51 = vpack.c.bf16 %v4702_v30, %v4699_v56  ;;  %v1226_v54 = vsel %vm1225_vm7, %v4664_v39, %v1224_v41  ;;  %v4721_v55 = vmul.f32 %v3955_v8, %v4532_v46  ;;  %v4724_v57 = vmul.f32 %v3955_v8, %v4544_v48 }
 0x136   : > { %3728 = vst [vmem:[#allocation2] sm:$0xff] %v3464_v5   ;;  %v1229_v2 = vsel %vm1227_vm8, %v1228_v59, %v1226_v54  ;;  %v1031_v6 = vsub.f32 1.5, %v1030_v23  ;;  %v3479_v34 = vpack.c.bf16 %v4707_v38, %v850_v26  ;;  %v3484_v58 = vpack.c.bf16 %v4713_v15, %v4710_v9 }
 0x137   : > { %3733 = vst [vmem:[#allocation2 + $0x48] sm:$0xff] %v3494_v51   ;;  %v1230_v27 = vadd.f32 0.0001, %v1229_v2  ;;  %v3489_v19 = vpack.c.bf16 %v4724_v57, %v4721_v55  ;;  %v1037_v39 = vand.u32 2147483648, %v4667_v21  ;;  %vm1903_vm8 = vcmask 7168  }
 0x138   : > { %v1032_v43 = vmul.f32 %v3953_v33, %v1031_v6  ;;  %3480 = vst [vmem:[#allocation2 + $0x50] sm:$0xff] %v3479_v34  }
 0x139   : > { %3956 = vrcp.f32 %v1230_v27  ;;  %3731 = vst [vmem:[#allocation2 + $0x68] sm:$0xff] %v3484_v58  }
 0x13a   : > { %685 = vxpose.xlu1.b32.cont [2/8] (short) %v661_v63, 128  ;;  %v1033_v46 = vmul.f32 %v1032_v43, %v4667_v21  ;;  %3732 = vst [vmem:[#allocation2 + $0x8] sm:$0xff] %v3489_v19   ;;  %v3437_v53 = vld [vmem:[#allocation2 + $0x58] sm:$0xff] }
 0x13b   : > { %v3438_v48 = vld [vmem:[#allocation2 + $0x18] sm:$0xff] }
 0x13c   : > { %v1035_v20 = vsel %vm1034_vm9, %v4667_v21, %v1033_v46  ;;  %3782 = vmatpush.bf16.msrb.mxu3 %v3438_v48  ;;  %vm2162_vm9 = vcmask 15368  }
 0x13d   : > { %v1038_v32 = vsel %vm1036_vm10, %v1037_v39, %v1035_v20  ;;  %v3436_v11 = vld [vmem:[#allocation2] sm:$0xff] }
 0x13e   : > { %v1039_v47 = vadd.f32 0.0001, %v1038_v32 }
 0x13f   : > { %v3957_v40 = vpop.eup %3956 }
 0x140   : > { %v4739_v13 = vmul.f32 %v3957_v40, %v4622_v1  ;;  %v4742_v33 = vmul.f32 %v3957_v40, %v4630_v42  ;;  %3958 = vrcp.f32 %v1039_v47  ;;  %v1232_v28 = vmul.f32 %v3957_v40, %v4566_v35  ;;  %3783 = vmatpush.bf16.msrb.mxu3 %v3437_v53 }
 0x141   : > { %v1233_v0 = vmul.f32 %v3957_v40, %v4570_v10  ;;  %v1234_v21 = vmul.f32 %v3957_v40, %v4578_v31  ;;  %v1235_v63 = vmul.f32 %v3957_v40, %v4586_v14  ;;  %v1236_v44 = vmul.f32 %v3957_v40, %v4590_v36  ;;  %v3435_v31 = vld [vmem:[#allocation2 + $0x30] sm:$0xff] }
 0x142   : > { %686 = vxpose.xlu1.b32.cont [3/8] (short) %v662_v7, 128  ;;  %v3534_v1 = vpack.c.bf16 %v4742_v33, %v4739_v13  ;;  %v3842_v17 = vpack.i.bf16 %v850_v26, %v1232_v28  ;;  %v1237_v42 = vmul.f32 %v3957_v40, %v4608_v24 }
 0x143   : > { %v3519_v16 = vpack.c.bf16 %v1233_v0, %v1232_v28  ;;  %v3524_v61 = vpack.c.bf16 %v1235_v63, %v1234_v21 }
 0x144   : > { %3739 = vst [vmem:[#allocation2 + $0x28] sm:$0xff] %v3534_v1   ;;  %3843 = vxpose.xlu2.b32.start [1/8] (short) %v3842_v17, 128  ;;  %3784 = vmatpush.bf16.msrb.mxu3 %v3436_v11  ;;  %v3529_v35 = vpack.c.bf16 %v1237_v42, %v1236_v44 }
 0x145   : > { %3520 = vst [vmem:[#allocation2 + $0x60] sm:$0xff] %v3519_v16  }
 0x146   : > { %v3959_v10 = vpop.eup %3958  ;;  %3737 = vst [vmem:[#allocation2 + $0x70] sm:$0xff] %v3524_v61  }
 0x147   : > { %v1041_v14 = vmul.f32 %v3959_v10, %v4596_v3  ;;  %v1042_v36 = vmul.f32 %v3959_v10, %v4600_v29  ;;  %v1043_v7 = vmul.f32 %v3959_v10, %v4604_v4  ;;  %v1044_v8 = vmul.f32 %v3959_v10, %v4616_v25  ;;  %3738 = vst [vmem:[#allocation2 + $0x78] sm:$0xff] %v3529_v35  }
 0x148   : > { %3785 = vmatpush.bf16.msrb.mxu3 %v3435_v31  ;;  %v1045_v24 = vmul.f32 %v3959_v10, %v4636_v49  ;;  %v1046_v59 = vmul.f32 %v3959_v10, %v4644_v60  ;;  %v1047_v22 = vmul.f32 %v3959_v10, %v4652_v18  ;;  %v1048_v5 = vmul.f32 %v3959_v10, %v4658_v12  ;;  %v1351_v31 = vld [vmem:[%s5575_s4 + $0x28] sm:$0xff] }
 0x149   : > { %1066 = vxpose.xlu0.b32.start [1/8] (short) %v1041_v14, 128  ;;  %v3499_v41 = vpack.c.bf16 %v1042_v36, %v1041_v14  ;;  %v3504_v3 = vpack.c.bf16 %v1044_v8, %v1043_v7  ;;  %v3844_v29 = vpack.i.bf16 %v4707_v38, %v1233_v0  ;;  %v3846_v25 = vpack.i.bf16 %v4710_v9, %v1234_v21 }
 0x14a   : > { %687 = vxpose.xlu1.b32.cont [4/8] (short) %v4692_v45, 128  ;;  %v3509_v4 = vpack.c.bf16 %v1046_v59, %v1045_v24  ;;  %v3514_v26 = vpack.c.bf16 %v1048_v5, %v1047_v22  ;;  %v3848_v49 = vpack.i.bf16 %v4713_v15, %v1235_v63  ;;  %v3850_v60 = vpack.i.bf16 %v4721_v55, %v1236_v44 }
 0x14b   : > { %3500 = vst [vmem:[#allocation2 + $0x40] sm:$0xff] %v3499_v41   ;;  %v3852_v18 = vpack.i.bf16 %v4724_v57, %v1237_v42  ;;  %v3854_v12 = vpack.i.bf16 %v4699_v56, %v4739_v13 }
 0x14c   : > { %3845 = vxpose.xlu2.b32.cont [2/8] (short) %v3844_v29, 128  ;;  %3734 = vst [vmem:[#allocation2 + $0x20] sm:$0xff] %v3504_v3  }
 0x14d   : > { %3735 = vst [vmem:[#allocation2 + $0x10] sm:$0xff] %v3509_v4  }
 0x14e   : > { %3736 = vst [vmem:[#allocation2 + $0x38] sm:$0xff] %v3514_v26  }
 0x151   : > { %1067 = vxpose.xlu0.b32.cont [2/8] (short) %v1042_v36, 128 }
 0x152   : > { %688 = vxpose.xlu1.b32.cont [5/8] (short) %v4672_v37, 128  ;;  %v3856_v37 = vpack.i.bf16 %v4702_v30, %v4742_v33 }
 0x154   : > { %3847 = vxpose.xlu2.b32.cont [3/8] (short) %v3846_v25, 128 }
 0x159   : > { %1068 = vxpose.xlu0.b32.cont [3/8] (short) %v1043_v7, 128 }
 0x15a   : > { %689 = vxpose.xlu1.b32.cont [6/8] (short) %v4675_v50, 128 }
 0x15c   : > { %3849 = vxpose.xlu2.b32.cont [4/8] (short) %v3848_v49, 128 }
 0x161   : > { %1069 = vxpose.xlu0.b32.cont [4/8] (short) %v1044_v8, 128 }
 0x162   : > { %690 = vxpose.xlu1.b32.cont [7/8] (short) %v4678_v62, 128 }
 0x164   : > { %3851 = vxpose.xlu2.b32.cont [5/8] (short) %v3850_v60, 128 }
 0x169   : > { %1070 = vxpose.xlu0.b32.cont [5/8] (short) %v1045_v24, 128 }
 0x16a   : > { %691 = vxpose.xlu1.b32.end [8/8] (short) %v4681_v52, 128 }
 0x16c   : > { %3853 = vxpose.xlu2.b32.cont [6/8] (short) %v3852_v18, 128  ;;  %v1349_v18 = vld [vmem:[%s5575_s4 + $0x18] sm:$0xff] }
 0x171   : > { %1071 = vxpose.xlu0.b32.cont [6/8] (short) %v1046_v59, 128 }
 0x174   : > { %3855 = vxpose.xlu2.b32.cont [7/8] (short) %v3854_v12, 128 }
 0x179   : > { %1072 = vxpose.xlu0.b32.cont [7/8] (short) %v1047_v22, 128 }
 0x17c   : > { %3857 = vxpose.xlu2.b32.end [8/8] (short) %v3856_v37, 128 }
 0x181   : > { %1073 = vxpose.xlu0.b32.end [8/8] (short) %v1048_v5, 128 }
 0x1d6   : > { %v700_v50 = vpop.trf.xlu1 }
 0x1d7   : > { %v716_v62 = vpack.c.bf16 %v700_v50, %v700_v50 }
 0x1d9   : > { %733 = vst.msk [vmem:[#allocation3] sm:$0xf] %vm732_vm11, %v716_v62 }
 0x1dd   : > { %v3858_v52 = vpop.trf.xlu2 }
 0x1de   : > { %v701_v45 = vpop.trf.xlu1  ;;  %v3862_v23 = vunpack.i.h.bf16 %v3858_v52  ;;  %v3859_v38 = vunpack.i.l.bf16 %v3858_v52 }
 0x1df   : > { %v717_v9 = vpack.c.bf16 %v701_v45, %v701_v45 }
 0x1e0   : > { %v907_v15 = vpack.c.bf16 %v3862_v23, %v3862_v23  ;;  %v1289_v51 = vpack.c.bf16 %v3859_v38, %v3859_v38 }
 0x1e1   : > { %734 = vst.msk [vmem:[#allocation3 + $0x4] sm:$0xf] %vm732_vm11, %v717_v9 }
 0x1e2   : > { %924 = vst.msk [vmem:[#allocation3 + $0x40] sm:$0xf] %vm732_vm11, %v907_v15 }
 0x1e3   : > { %1306 = vst.msk [vmem:[#allocation3 + $0xc0] sm:$0xf] %vm732_vm11, %v1289_v51 }
 0x1e5   : > { %v3863_v56 = vpop.trf.xlu2 }
 0x1e6   : > { %v702_v30 = vpop.trf.xlu1  ;;  %v3867_v54 = vunpack.i.h.bf16 %v3863_v56  ;;  %v3864_v55 = vunpack.i.l.bf16 %v3863_v56  ;;  %v1346_v56 = vld [vmem:[%s5575_s4] sm:$0xff] }
 0x1e7   : > { %v718_v57 = vpack.c.bf16 %v702_v30, %v702_v30 }
 0x1e8   : > { %v908_v2 = vpack.c.bf16 %v3867_v54, %v3867_v54  ;;  %v1290_v6 = vpack.c.bf16 %v3864_v55, %v3864_v55 }
 0x1e9   : > { %735 = vst.msk [vmem:[#allocation3 + $0x8] sm:$0xf] %vm732_vm11, %v718_v57 }
 0x1ea   : > { %925 = vst.msk [vmem:[#allocation3 + $0x44] sm:$0xf] %vm732_vm11, %v908_v2 }
 0x1eb   : > { %1307 = vst.msk [vmem:[#allocation3 + $0xc4] sm:$0xf] %vm732_vm11, %v1290_v6 }
 0x1ed   : > { %v1082_v34 = vpop.trf.xlu0  ;;  %v3868_v58 = vpop.trf.xlu2 }
 0x1ee   : > { %v1098_v27 = vpack.c.bf16 %v1082_v34, %v1082_v34  ;;  %v3872_v19 = vunpack.i.h.bf16 %v3868_v58  ;;  %v703_v43 = vpop.trf.xlu1  ;;  %v3869_v46 = vunpack.i.l.bf16 %v3868_v58 }
 0x1ef   : > { %v719_v48 = vpack.c.bf16 %v703_v43, %v703_v43 }
 0x1f0   : > { %1115 = vst.msk [vmem:[#allocation3 + $0x80] sm:$0xf] %vm732_vm11, %v1098_v27  ;;  %v909_v39 = vpack.c.bf16 %v3872_v19, %v3872_v19  ;;  %v1291_v20 = vpack.c.bf16 %v3869_v46, %v3869_v46 }
 0x1f1   : > { %736 = vst.msk [vmem:[#allocation3 + $0xc] sm:$0xf] %vm732_vm11, %v719_v48  ;;  %v4789_v42 = vld [vmem:[#allocation3 + $0x40] sm:$0xff]  }
 0x1f2   : > { %926 = vst.msk [vmem:[#allocation3 + $0x48] sm:$0xf] %vm732_vm11, %v909_v39  ;;  %v5533_v8 = vunpack.c.l.bf16 %v4789_v42  ;;  %v5532_v24 = vunpack.c.h.bf16 %v4789_v42 }
 0x1f3   : > { %1308 = vst.msk [vmem:[#allocation3 + $0xc8] sm:$0xf] %vm732_vm11, %v1291_v20 }
 0x1f5   : > { %v1083_v32 = vpop.trf.xlu0  ;;  %v3873_v47 = vpop.trf.xlu2 }
 0x1f6   : > { %v1099_v53 = vpack.c.bf16 %v1083_v32, %v1083_v32  ;;  %v3877_v40 = vunpack.i.h.bf16 %v3873_v47  ;;  %v704_v13 = vpop.trf.xlu1  ;;  %v3874_v33 = vunpack.i.l.bf16 %v3873_v47 }
 0x1f7   : > { %v720_v28 = vpack.c.bf16 %v704_v13, %v704_v13 }
 0x1f8   : > { %1116 = vst.msk [vmem:[#allocation3 + $0x84] sm:$0xf] %vm732_vm11, %v1099_v53  ;;  %v910_v0 = vpack.c.bf16 %v3877_v40, %v3877_v40  ;;  %v1292_v21 = vpack.c.bf16 %v3874_v33, %v3874_v33 }
 0x1f9   : > { %737 = vst.msk [vmem:[#allocation3 + $0x10] sm:$0xf] %vm732_vm11, %v720_v28 }
 0x1fa   : > { %927 = vst.msk [vmem:[#allocation3 + $0x4c] sm:$0xf] %vm732_vm11, %v910_v0 }
 0x1fb   : > { %1309 = vst.msk [vmem:[#allocation3 + $0xcc] sm:$0xf] %vm732_vm11, %v1292_v21 }
 0x1fd   : > { %v1084_v63 = vpop.trf.xlu0  ;;  %v3878_v44 = vpop.trf.xlu2 }
 0x1fe   : > { %v1100_v1 = vpack.c.bf16 %v1084_v63, %v1084_v63  ;;  %v3882_v17 = vunpack.i.h.bf16 %v3878_v44  ;;  %v705_v11 = vpop.trf.xlu1  ;;  %v3879_v16 = vunpack.i.l.bf16 %v3878_v44 }
 0x1ff   : > { %v721_v61 = vpack.c.bf16 %v705_v11, %v705_v11  ;;  %v4791_v35 = vld [vmem:[#allocation3 + $0x80] sm:$0xff]  }
 0x200   : > { %1117 = vst.msk [vmem:[#allocation3 + $0x88] sm:$0xf] %vm732_vm11, %v1100_v1  ;;  %v911_v10 = vpack.c.bf16 %v3882_v17, %v3882_v17  ;;  %v5525_v14 = vunpack.c.l.bf16 %v4791_v35  ;;  %v5524_v36 = vunpack.c.h.bf16 %v4791_v35  ;;  %v1293_v7 = vpack.c.bf16 %v3879_v16, %v3879_v16 }
 0x201   : > { %738 = vst.msk [vmem:[#allocation3 + $0x14] sm:$0xf] %vm732_vm11, %v721_v61  ;;  %v4825_v23 = vld [vmem:[#allocation3 + $0x48] sm:$0xff]  }
 0x202   : > { %928 = vst.msk [vmem:[#allocation3 + $0x50] sm:$0xf] %vm732_vm11, %v911_v10  ;;  %v4808_v59 = vsub.f32 %v5533_v8, %v5525_v14  ;;  %v4814_v22 = vsub.f32 %v5532_v24, %v5524_v36  ;;  %v5537_v57 = vunpack.c.l.bf16 %v4825_v23  ;;  %v5536_v2 = vunpack.c.h.bf16 %v4825_v23 }
 0x203   : > { %1310 = vst.msk [vmem:[#allocation3 + $0xd0] sm:$0xf] %vm732_vm11, %v1293_v7 }
 0x204   : > { %1754 = vperm.xlu1 %3840, %v1351_v31   ;;  %v1353_v31 = vld [vmem:[%s5575_s4 + $0x38] sm:$0xff] }
 0x205   : > { %v1085_v5 = vpop.trf.xlu0  ;;  %v3883_v41 = vpop.trf.xlu2 }
 0x206   : > { %v1101_v29 = vpack.c.bf16 %v1085_v5, %v1085_v5  ;;  %v3887_v4 = vunpack.i.h.bf16 %v3883_v41  ;;  %v706_v26 = vpop.trf.xlu1  ;;  %v3884_v25 = vunpack.i.l.bf16 %v3883_v41 }
 0x207   : > { %v722_v49 = vpack.c.bf16 %v706_v26, %v706_v26 }
 0x208   : > { %1118 = vst.msk [vmem:[#allocation3 + $0x8c] sm:$0xf] %vm732_vm11, %v1101_v29  ;;  %v912_v60 = vpack.c.bf16 %v3887_v4, %v3887_v4  ;;  %v1294_v12 = vpack.c.bf16 %v3884_v25, %v3884_v25 }
 0x209   : > { %739 = vst.msk [vmem:[#allocation3 + $0x18] sm:$0xf] %vm732_vm11, %v722_v49 }
 0x20a   : > { %929 = vst.msk [vmem:[#allocation3 + $0x54] sm:$0xf] %vm732_vm11, %v912_v60 }
 0x20b   : > { %1311 = vst.msk [vmem:[#allocation3 + $0xd4] sm:$0xf] %vm732_vm11, %v1294_v12 }
 0x20c   : > { %1744 = vperm.xlu1 %3840, %v1349_v18  }
 0x20d   : > { %v1086_v37 = vpop.trf.xlu0  ;;  %v3888_v50 = vpop.trf.xlu2 }
 0x20e   : > { %v1102_v62 = vpack.c.bf16 %v1086_v37, %v1086_v37  ;;  %v3892_v52 = vunpack.i.h.bf16 %v3888_v50  ;;  %v707_v45 = vpop.trf.xlu1  ;;  %v3889_v38 = vunpack.i.l.bf16 %v3888_v50  ;;  %v1350_v50 = vld [vmem:[%s5575_s4 + $0x20] sm:$0xff] }
 0x20f   : > { %v723_v9 = vpack.c.bf16 %v707_v45, %v707_v45  ;;  %v4827_v15 = vld [vmem:[#allocation3 + $0x88] sm:$0xff]  }
 0x210   : > { %1119 = vst.msk [vmem:[#allocation3 + $0x90] sm:$0xf] %vm732_vm11, %v1102_v62  ;;  %v913_v51 = vpack.c.bf16 %v3892_v52, %v3892_v52  ;;  %v5527_v30 = vunpack.c.l.bf16 %v4827_v15  ;;  %v5526_v54 = vunpack.c.h.bf16 %v4827_v15  ;;  %v1295_v55 = vpack.c.bf16 %v3889_v38, %v3889_v38  ;;  %v1352_v62 = vld [vmem:[%s5575_s4 + $0x30] sm:$0xff] }
 0x211   : > { %740 = vst.msk [vmem:[#allocation3 + $0x1c] sm:$0xf] %vm732_vm11, %v723_v9  ;;  %v4858_v0 = vld [vmem:[#allocation3 + $0x50] sm:$0xff]  }
 0x212   : > { %930 = vst.msk [vmem:[#allocation3 + $0x58] sm:$0xf] %vm732_vm11, %v913_v51  ;;  %v4844_v6 = vsub.f32 %v5537_v57, %v5527_v30  ;;  %v4850_v34 = vsub.f32 %v5536_v2, %v5526_v54  ;;  %v3578_v61 = vunpack.c.l.bf16 %v4858_v0  ;;  %v5540_v10 = vunpack.c.h.bf16 %v4858_v0 }
 0x213   : > { %1312 = vst.msk [vmem:[#allocation3 + $0xd8] sm:$0xf] %vm732_vm11, %v1295_v55 }
 0x214   : > { %1729 = vperm.xlu1 %3840, %v1346_v56  }
 0x215   : > { %v1087_v58 = vpop.trf.xlu0  ;;  %v3893_v27 = vpop.trf.xlu2 }
 0x216   : > { %v1103_v43 = vpack.c.bf16 %v1087_v58, %v1087_v58  ;;  %v3897_v46 = vunpack.i.h.bf16 %v3893_v27  ;;  %v708_v48 = vpop.trf.xlu1  ;;  %v3894_v39 = vunpack.i.l.bf16 %v3893_v27 }
 0x217   : > { %v724_v20 = vpack.c.bf16 %v708_v48, %v708_v48 }
 0x218   : > { %1120 = vst.msk [vmem:[#allocation3 + $0x94] sm:$0xf] %vm732_vm11, %v1103_v43  ;;  %v914_v32 = vpack.c.bf16 %v3897_v46, %v3897_v46  ;;  %v1296_v47 = vpack.c.bf16 %v3894_v39, %v3894_v39 }
 0x219   : > { %741 = vst.msk [vmem:[#allocation3 + $0x20] sm:$0xf] %vm732_vm11, %v724_v20 }
 0x21a   : > { %931 = vst.msk [vmem:[#allocation3 + $0x5c] sm:$0xf] %vm732_vm11, %v914_v32 }
 0x21b   : > { %1313 = vst.msk [vmem:[#allocation3 + $0xdc] sm:$0xf] %vm732_vm11, %v1296_v47  ;;  %v1348_v47 = vld [vmem:[%s5575_s4 + $0x10] sm:$0xff] }
 0x21d   : > { %v1088_v53 = vpop.trf.xlu0  ;;  %v3898_v40 = vpop.trf.xlu2 }
 0x21e   : > { %v1104_v13 = vpack.c.bf16 %v1088_v53, %v1088_v53  ;;  %v3902_v33 = vunpack.i.h.bf16 %v3898_v40  ;;  %v709_v28 = vpop.trf.xlu1  ;;  %v3899_v21 = vunpack.i.l.bf16 %v3898_v40 }
 0x21f   : > { %v725_v63 = vpack.c.bf16 %v709_v28, %v709_v28  ;;  %v4860_v44 = vld [vmem:[#allocation3 + $0x90] sm:$0xff]  }
 0x220   : > { %1121 = vst.msk [vmem:[#allocation3 + $0x98] sm:$0xf] %vm732_vm11, %v1104_v13  ;;  %v915_v1 = vpack.c.bf16 %v3902_v33, %v3902_v33  ;;  %v5529_v17 = vunpack.c.l.bf16 %v4860_v44  ;;  %v5528_v11 = vunpack.c.h.bf16 %v4860_v44  ;;  %v1297_v16 = vpack.c.bf16 %v3899_v21, %v3899_v21  ;;  %v1347_v13 = vld [vmem:[%s5575_s4 + $0x8] sm:$0xff] }
 0x221   : > { %742 = vst.msk [vmem:[#allocation3 + $0x24] sm:$0xf] %vm732_vm11, %v725_v63  ;;  %v4897_v56 = vld [vmem:[#allocation3 + $0x58] sm:$0xff]  }
 0x222   : > { %932 = vst.msk [vmem:[#allocation3 + $0x60] sm:$0xf] %vm732_vm11, %v915_v1  ;;  %v4877_v7 = vsub.f32 %v3578_v61, %v5529_v17  ;;  %v4883_v5 = vsub.f32 %v5540_v10, %v5528_v11  ;;  %v3582_v20 = vunpack.c.l.bf16 %v4897_v56  ;;  %v3583_v32 = vunpack.c.h.bf16 %v4897_v56  ;;  %v3413_v17 = vld [vmem:[#allocation3 + $0x50] sm:$0xff]  ;;  %v3427_v10 = vld [vmem:[#allocation3 + $0xc0] sm:$0xff] }
 0x223   : > { %1314 = vst.msk [vmem:[#allocation3 + $0xe0] sm:$0xf] %vm732_vm11, %v1297_v16 }
 0x225   : > { %v1089_v41 = vpop.trf.xlu0  ;;  %1764 = vperm.xlu2 %3841, %v1353_v31   ;;  %v3903_v29 = vpop.trf.xlu2 }
 0x226   : > { %v1105_v26 = vpack.c.bf16 %v1089_v41, %v1089_v41  ;;  %v3907_v25 = vunpack.i.h.bf16 %v3903_v29  ;;  %v710_v49 = vpop.trf.xlu1  ;;  %v3904_v60 = vunpack.i.l.bf16 %v3903_v29 }
 0x227   : > { %v726_v18 = vpack.c.bf16 %v710_v49, %v710_v49 }
 0x228   : > { %1122 = vst.msk [vmem:[#allocation3 + $0x9c] sm:$0xf] %vm732_vm11, %v1105_v26  ;;  %v916_v12 = vpack.c.bf16 %v3907_v25, %v3907_v25  ;;  %v1298_v37 = vpack.c.bf16 %v3904_v60, %v3904_v60  ;;  %v1355_v25 = vld [vmem:[#allocation5] sm:$0x1] }
 0x229   : > { %743 = vst.msk [vmem:[#allocation3 + $0x28] sm:$0xf] %vm732_vm11, %v726_v18 }
 0x22a   : > { %933 = vst.msk [vmem:[#allocation3 + $0x64] sm:$0xf] %vm732_vm11, %v916_v12 }
 0x22b   : > { %1315 = vst.msk [vmem:[#allocation3 + $0xe4] sm:$0xf] %vm732_vm11, %v1298_v37 }
 0x22d   : > { %v1090_v52 = vpop.trf.xlu0  ;;  %1749 = vperm.xlu2 %3841, %v1350_v50   ;;  %v3908_v45 = vpop.trf.xlu2 }
 0x22e   : > { %v1106_v38 = vpack.c.bf16 %v1090_v52, %v1090_v52  ;;  %v3912_v9 = vunpack.i.h.bf16 %v3908_v45  ;;  %v711_v51 = vpop.trf.xlu1  ;;  %v3909_v55 = vunpack.i.l.bf16 %v3908_v45 }
 0x22f   : > { %1759 = vperm.xlu0 %3839, %v1352_v62   ;;  %v727_v58 = vpack.c.bf16 %v711_v51, %v711_v51  ;;  %v4899_v27 = vld [vmem:[#allocation3 + $0x98] sm:$0xff]  }
 0x230   : > { %1123 = vst.msk [vmem:[#allocation3 + $0xa0] sm:$0xf] %vm732_vm11, %v1106_v38  ;;  %v917_v43 = vpack.c.bf16 %v3912_v9, %v3912_v9  ;;  %v5531_v46 = vunpack.c.l.bf16 %v4899_v27  ;;  %v5530_v48 = vunpack.c.h.bf16 %v4899_v27  ;;  %v1299_v39 = vpack.c.bf16 %v3909_v55, %v3909_v55 }
 0x231   : > { %744 = vst.msk [vmem:[#allocation3 + $0x2c] sm:$0xf] %vm732_vm11, %v727_v58  ;;  %v4933_v50 = vld [vmem:[#allocation3 + $0x60] sm:$0xff]  }
 0x232   : > { %934 = vst.msk [vmem:[#allocation3 + $0x68] sm:$0xf] %vm732_vm11, %v917_v43  ;;  %v4916_v53 = vsub.f32 %v3582_v20, %v5531_v46  ;;  %v4922_v40 = vsub.f32 %v3583_v32, %v5530_v48  ;;  %v3586_v58 = vunpack.c.l.bf16 %v4933_v50  ;;  %v3587_v43 = vunpack.c.h.bf16 %v4933_v50  ;;  %v3415_v36 = vld [vmem:[#allocation3 + $0x60] sm:$0xff] }
 0x233   : > { %1316 = vst.msk [vmem:[#allocation3 + $0xe8] sm:$0xf] %vm732_vm11, %v1299_v39  ;;  %v3431_v54 = vld [vmem:[#allocation3 + $0xe0] sm:$0xff] }
 0x235   : > { %v1091_v33 = vpop.trf.xlu0  ;;  %1739 = vperm.xlu2 %3841, %v1348_v47   ;;  %v3913_v28 = vpop.trf.xlu2 }
 0x236   : > { %v1107_v63 = vpack.c.bf16 %v1091_v33, %v1091_v33  ;;  %v3917_v1 = vunpack.i.h.bf16 %v3913_v28  ;;  %v712_v16 = vpop.trf.xlu1  ;;  %v3914_v31 = vunpack.i.l.bf16 %v3913_v28 }
 0x237   : > { %1734 = vperm.xlu0 %3839, %v1347_v13   ;;  %v728_v41 = vpack.c.bf16 %v712_v16, %v712_v16 }
 0x238   : > { %1124 = vst.msk [vmem:[#allocation3 + $0xa4] sm:$0xf] %vm732_vm11, %v1107_v63  ;;  %v918_v29 = vpack.c.bf16 %v3917_v1, %v3917_v1  ;;  %v1300_v26 = vpack.c.bf16 %v3914_v31, %v3914_v31 }
 0x239   : > { %745 = vst.msk [vmem:[#allocation3 + $0x30] sm:$0xf] %vm732_vm11, %v728_v41 }
 0x23a   : > { %935 = vst.msk [vmem:[#allocation3 + $0x6c] sm:$0xf] %vm732_vm11, %v918_v29 }
 0x23b   : > { %1317 = vst.msk [vmem:[#allocation3 + $0xec] sm:$0xf] %vm732_vm11, %v1300_v26 }
 0x23d   : > { %v1092_v49 = vpop.trf.xlu0  ;;  %1843 = vperm.xlu2 %3841, %v1355_v25   ;;  %v3918_v60 = vpop.trf.xlu2 }
 0x23e   : > { %v1108_v18 = vpack.c.bf16 %v1092_v49, %v1092_v49  ;;  %v3922_v12 = vunpack.i.h.bf16 %v3918_v60  ;;  %v713_v37 = vpop.trf.xlu1  ;;  %v3919_v62 = vunpack.i.l.bf16 %v3918_v60 }
 0x23f   : > { %v729_v52 = vpack.c.bf16 %v713_v37, %v713_v37  ;;  %v4935_v45 = vld [vmem:[#allocation3 + $0xa0] sm:$0xff]  }
 0x240   : > { %1125 = vst.msk [vmem:[#allocation3 + $0xa8] sm:$0xf] %vm732_vm11, %v1108_v18  ;;  %v919_v38 = vpack.c.bf16 %v3922_v12, %v3922_v12  ;;  %v5535_v9 = vunpack.c.l.bf16 %v4935_v45  ;;  %v5534_v51 = vunpack.c.h.bf16 %v4935_v45  ;;  %v1301_v55 = vpack.c.bf16 %v3919_v62, %v3919_v62 }
 0x241   : > { %746 = vst.msk [vmem:[#allocation3 + $0x34] sm:$0xf] %vm732_vm11, %v729_v52  ;;  %v4963_v37 = vld [vmem:[#allocation3 + $0x68] sm:$0xff]  }
 0x242   : > { %936 = vst.msk [vmem:[#allocation3 + $0x70] sm:$0xf] %vm732_vm11, %v919_v38  ;;  %v4949_v39 = vsub.f32 %v3586_v58, %v5535_v9  ;;  %v4955_v47 = vsub.f32 %v3587_v43, %v5534_v51  ;;  %v3416_v28 = vld [vmem:[#allocation3 + $0x68] sm:$0xff] }
 0x243   : > { %1318 = vst.msk [vmem:[#allocation3 + $0xf0] sm:$0xf] %vm732_vm11, %v1301_v55  ;;  %v3412_v51 = vld [vmem:[#allocation3 + $0x48] sm:$0xff] }
 0x244   : > { %v3428_v9 = vld [vmem:[#allocation3 + $0xc8] sm:$0xff] }
 0x245   : > { %v1093_v13 = vpop.trf.xlu0  ;;  %v3923_v33 = vpop.trf.xlu2 }
 0x246   : > { %v1109_v63 = vpack.c.bf16 %v1093_v13, %v1093_v13  ;;  %v3927_v1 = vunpack.i.h.bf16 %v3923_v33  ;;  %v714_v16 = vpop.trf.xlu1  ;;  %v3924_v31 = vunpack.i.l.bf16 %v3923_v33 }
 0x247   : > { %v730_v41 = vpack.c.bf16 %v714_v16, %v714_v16  ;;  %v3591_v16 = vunpack.c.h.bf16 %v4963_v37 }
 0x248   : > { %1126 = vst.msk [vmem:[#allocation3 + $0xac] sm:$0xf] %vm732_vm11, %v1109_v63  ;;  %v920_v29 = vpack.c.bf16 %v3927_v1, %v3927_v1  ;;  %v1302_v26 = vpack.c.bf16 %v3924_v31, %v3924_v31  ;;  %v3590_v1 = vunpack.c.l.bf16 %v4963_v37  ;;  %v3745_v8 = vld [vmem:[#allocation3 + $0x30] sm:$0xff]  }
 0x249   : > { %747 = vst.msk [vmem:[#allocation3 + $0x38] sm:$0xf] %vm732_vm11, %v730_v41 }
 0x24a   : > { %937 = vst.msk [vmem:[#allocation3 + $0x74] sm:$0xf] %vm732_vm11, %v920_v29 }
 0x24b   : > { %1319 = vst.msk [vmem:[#allocation3 + $0xf4] sm:$0xf] %vm732_vm11, %v1302_v26 }
 0x24d   : > { %v1094_v25 = vpop.trf.xlu0  ;;  %v3928_v49 = vpop.trf.xlu2 }
 0x24e   : > { %v1110_v60 = vpack.c.bf16 %v1094_v25, %v1094_v25  ;;  %v3932_v18 = vunpack.i.h.bf16 %v3928_v49  ;;  %v715_v12 = vpop.trf.xlu1  ;;  %v3929_v62 = vunpack.i.l.bf16 %v3928_v49  ;;  %v3432_v25 = vld [vmem:[#allocation3 + $0xe8] sm:$0xff] }
 0x24f   : > { %v731_v52 = vpack.c.bf16 %v715_v12, %v715_v12  ;;  %v4965_v38 = vld [vmem:[#allocation3 + $0xa8] sm:$0xff]  }
 0x250   : > { %1127 = vst.msk [vmem:[#allocation3 + $0xb0] sm:$0xf] %vm732_vm11, %v1110_v60  ;;  %v921_v55 = vpack.c.bf16 %v3932_v18, %v3932_v18  ;;  %v5539_v13 = vunpack.c.l.bf16 %v4965_v38  ;;  %v5538_v33 = vunpack.c.h.bf16 %v4965_v38  ;;  %v1303_v63 = vpack.c.bf16 %v3929_v62, %v3929_v62  ;;  %v3424_v24 = vld [vmem:[#allocation3 + $0xa8] sm:$0xff] }
 0x251   : > { %748 = vst.msk [vmem:[#allocation3 + $0x3c] sm:$0xf] %vm732_vm11, %v731_v52 }
 0x252   : > { %938 = vst.msk [vmem:[#allocation3 + $0x78] sm:$0xf] %vm732_vm11, %v921_v55  ;;  %v4979_v31 = vsub.f32 %v3590_v1, %v5539_v13  ;;  %v4985_v41 = vsub.f32 %v3591_v16, %v5538_v33  ;;  %v3563_v33 = vunpack.c.h.bf16 %v3745_v8  ;;  %v3423_v13 = vld [vmem:[#allocation3 + $0xa0] sm:$0xff] }
 0x253   : > { %1320 = vst.msk [vmem:[#allocation3 + $0xf8] sm:$0xf] %vm732_vm11, %v1303_v63  ;;  %v4992_v63 = vld [vmem:[#allocation3 + $0x70] sm:$0xff]  }
 0x255   : > { %v1095_v29 = vpop.trf.xlu0  ;;  %v3933_v26 = vpop.trf.xlu2 }
 0x256   : > { %v1111_v49 = vpack.c.bf16 %v1095_v29, %v1095_v29  ;;  %v3937_v60 = vunpack.i.h.bf16 %v3933_v26  ;;  %v3934_v18 = vunpack.i.l.bf16 %v3933_v26 }
 0x258   : > { %1128 = vst.msk [vmem:[#allocation3 + $0xb4] sm:$0xf] %vm732_vm11, %v1111_v49  ;;  %v922_v12 = vpack.c.bf16 %v3937_v60, %v3937_v60  ;;  %v1304_v62 = vpack.c.bf16 %v3934_v18, %v3934_v18  ;;  %v3594_v49 = vunpack.c.l.bf16 %v4992_v63  ;;  %v3595_v60 = vunpack.c.h.bf16 %v4992_v63  ;;  %v3742_v63 = vld [vmem:[#allocation3 + $0x18] sm:$0xff]  }
 0x25a   : > { %939 = vst.msk [vmem:[#allocation3 + $0x7c] sm:$0xf] %vm732_vm11, %v922_v12 }
 0x25b   : > { %1321 = vst.msk [vmem:[#allocation3 + $0xfc] sm:$0xf] %vm732_vm11, %v1304_v62 }
 0x25d   : > { %v1096_v52 = vpop.trf.xlu0 }
 0x25e   : > { %v1112_v55 = vpack.c.bf16 %v1096_v52, %v1096_v52 }
 0x25f   : > { %v4994_v3 = vld [vmem:[#allocation3 + $0xb0] sm:$0xff]  }
 0x260   : > { %1129 = vst.msk [vmem:[#allocation3 + $0xb8] sm:$0xf] %vm732_vm11, %v1112_v55  ;;  %v3690_v29 = vunpack.c.l.bf16 %v4994_v3  ;;  %v3691_v26 = vunpack.c.h.bf16 %v4994_v3  ;;  %v3417_v55 = vld [vmem:[#allocation3 + $0x70] sm:$0xff]  ;;  %v5078_v3 = vld [vmem:[%s5576_s3 + $0x8] sm:$0xff] }
 0x261   : > { %v3418_v19 = vld [vmem:[#allocation3 + $0x78] sm:$0xff] }
 0x262   : > { %v3434_v18 = vld [vmem:[#allocation3 + $0xf8] sm:$0xff]  ;;  %1561 = vmatpush.bf16.msrb.mxu1 %v3418_v19  ;;  %v5005_v12 = vsub.f32 %v3594_v49, %v3690_v29  ;;  %v5011_v62 = vsub.f32 %v3595_v60, %v3691_v26  ;;  %v3433_v19 = vld [vmem:[#allocation3 + $0xf0] sm:$0xff] }
 0x263   : > { %1678 = vmatpush.bf16.msrb.mxu2 %v3434_v18  ;;  %v3753_v14 = vld [vmem:[#allocation3 + $0x78] sm:$0xff]  }
 0x264   : > { %v3598_v11 = vunpack.c.l.bf16 %v3753_v14  ;;  %v3599_v4 = vunpack.c.h.bf16 %v3753_v14 }
 0x265   : > { %v1097_v52 = vpop.trf.xlu0 }
 0x266   : > { %v1113_v21 = vpack.c.bf16 %v1097_v52, %v1097_v52  ;;  %1562 = vmatpush.bf16.msrb.mxu1 %v3417_v55 }
 0x267   : > { %1679 = vmatpush.bf16.msrb.mxu2 %v3433_v19  ;;  %v3430_v19 = vld [vmem:[#allocation3 + $0xd8] sm:$0xff] }
 0x268   : > { %1130 = vst.msk [vmem:[#allocation3 + $0xbc] sm:$0xf] %vm732_vm11, %v1113_v21  ;;  %v3414_v21 = vld [vmem:[#allocation3 + $0x58] sm:$0xff] }
 0x26a   : > { %1563 = vmatpush.bf16.msrb.mxu1 %v3416_v28 }
 0x26b   : > { %1680 = vmatpush.bf16.msrb.mxu2 %v3432_v25 }
 0x26e   : > { %1564 = vmatpush.bf16.msrb.mxu1 %v3415_v36  ;;  %v3425_v36 = vld [vmem:[#allocation3 + $0xb0] sm:$0xff] }
 0x26f   : > { %v3426_v30 = vld [vmem:[#allocation3 + $0xb8] sm:$0xff]  ;;  %1681 = vmatpush.bf16.msrb.mxu2 %v3431_v54 }
 0x270   : > { %v5016_v18 = vld [vmem:[#allocation3 + $0xb8] sm:$0xff]   ;;  %1460 = vmatpush.bf16.msrb.mxu0 %v3426_v30  ;;  %v3429_v30 = vld [vmem:[#allocation3 + $0xd0] sm:$0xff] }
 0x271   : > { %v3694_v52 = vunpack.c.l.bf16 %v5016_v18  ;;  %v3695_v55 = vunpack.c.h.bf16 %v5016_v18  ;;  %v3746_v54 = vld [vmem:[#allocation3 + $0x38] sm:$0xff]   ;;  %v5065_v18 = vld [vmem:[%s5576_s3 + $0x20] sm:$0xff] }
 0x272   : > { %1565 = vmatpush.bf16.msrb.mxu1 %v3414_v21  ;;  %v3566_v48 = vunpack.c.l.bf16 %v3746_v54  ;;  %v3567_v46 = vunpack.c.h.bf16 %v3746_v54  ;;  %v3562_v21 = vunpack.c.l.bf16 %v3745_v8  ;;  %v1982_v8 = vsub.f32 %v3563_v33, %v3595_v60  ;;  %v3441_v60 = vld [vmem:[#allocation2 + $0x8] sm:$0xff] }
 0x273   : > { %v5022_v28 = vsub.f32 %v3598_v11, %v3694_v52  ;;  %v5026_v25 = vsub.f32 %v3599_v4, %v3695_v55  ;;  %1682 = vmatpush.bf16.msrb.mxu2 %v3430_v19  ;;  %v3744_v19 = vld [vmem:[#allocation3 + $0x28] sm:$0xff]  }
 0x274   : > { %1461 = vmatpush.bf16.msrb.mxu0 %v3425_v36  ;;  %v1983_v2 = vsub.f32 %v3566_v48, %v3598_v11  ;;  %v1984_v57 = vsub.f32 %v3567_v46, %v3599_v4  ;;  %v3411_v36 = vld [vmem:[#allocation3 + $0x40] sm:$0xff]  ;;  %v3558_v14 = vunpack.c.l.bf16 %v3744_v19  ;;  %v3559_v11 = vunpack.c.h.bf16 %v3744_v19  ;;  %v3422_v46 = vld [vmem:[#allocation3 + $0x98] sm:$0xff]  ;;  %v3442_v48 = vld [vmem:[#allocation2 + $0x48] sm:$0xff] }
 0x275   : > { %v3743_v4 = vld [vmem:[#allocation3 + $0x20] sm:$0xff]   ;;  %v3551_v19 = vunpack.c.h.bf16 %v3742_v63 }
 0x276   : > { %1566 = vmatpush.bf16.msrb.mxu1 %v3413_v17  ;;  %v1992_v54 = vpack.c.bf16 %v1984_v57, %v1983_v2  ;;  %v5033_v17 = vld [vmem:[%s5576_s3] sm:$0xff]  ;;  %v3554_v2 = vunpack.c.l.bf16 %v3743_v4  ;;  %v3555_v33 = vunpack.c.h.bf16 %v3743_v4 }
 0x277   : > { %1683 = vmatpush.bf16.msrb.mxu2 %v3429_v30  ;;  %v5042_v57 = vld [vmem:[%s5576_s3 + $0x40] sm:$0xff] }
 0x278   : > { %1462 = vmatpush.bf16.msrb.mxu0 %v3424_v24  ;;  %v1981_v24 = vsub.f32 %v3562_v21, %v3594_v49  ;;  %v3421_v49 = vld [vmem:[#allocation3 + $0x90] sm:$0xff]  ;;  %v1977_v30 = vsub.f32 %v3554_v2, %v3586_v58  ;;  %v3550_v21 = vunpack.c.l.bf16 %v3742_v63  ;;  %v1978_v37 = vsub.f32 %v3555_v33, %v3587_v43 }
 0x279   : > { %v3439_v33 = vld [vmem:[#allocation2 + $0x50] sm:$0xff] }
 0x27a   : > { %1567 = vmatpush.bf16.msrb.mxu1 %v3412_v51  ;;  %v1979_v51 = vsub.f32 %v3558_v14, %v3590_v1  ;;  %v3741_v14 = vld [vmem:[#allocation3 + $0x10] sm:$0xff]   ;;  %v1975_v58 = vsub.f32 %v3550_v21, %v3582_v20 }
 0x27b   : > { %1684 = vmatpush.bf16.msrb.mxu2 %v3428_v9  ;;  %v1991_v9 = vpack.c.bf16 %v1982_v8, %v1981_v24  ;;  %v3440_v24 = vld [vmem:[#allocation2 + $0x68] sm:$0xff]  ;;  %v3780_v8 = vld [vmem:[#allocation3 + $0xf0] sm:$0xff]   ;;  %v3546_v50 = vunpack.c.l.bf16 %v3741_v14  ;;  %v3547_v43 = vunpack.c.h.bf16 %v3741_v14 }
 0x27c   : > { %1463 = vmatpush.bf16.msrb.mxu0 %v3423_v13  ;;  %v1980_v13 = vsub.f32 %v3559_v11, %v3591_v16  ;;  %v3722_v2 = vunpack.c.l.bf16 %v3780_v8 }
 0x27e   : > { %1568 = vmatpush.bf16.msrb.mxu1 %v3411_v36  ;;  %v1990_v36 = vpack.c.bf16 %v1980_v13, %v1979_v51  ;;  %v3740_v51 = vld [vmem:[#allocation3 + $0x8] sm:$0xff]   ;;  %v3419_v13 = vld [vmem:[#allocation3 + $0x80] sm:$0xff]  ;;  %v2499_v20 = vsub.f32 %v3690_v29, %v3722_v2 }
 0x27f   : > { %1685 = vmatpush.bf16.msrb.mxu2 %v3427_v10  ;;  %v3781_v10 = vld [vmem:[#allocation3 + $0xf8] sm:$0xff]   ;;  %v3542_v63 = vunpack.c.l.bf16 %v3740_v51  ;;  %v3537_v29 = vld [vmem:[#allocation3] sm:$0xff]  }
 0x280   : > { %1464 = vmatpush.bf16.msrb.mxu0 %v3422_v46  ;;  %v3726_v1 = vunpack.c.l.bf16 %v3781_v10  ;;  %v3727_v16 = vunpack.c.h.bf16 %v3781_v10  ;;  %v1989_v46 = vpack.c.bf16 %v1978_v37, %v1977_v30  ;;  %v5577_v30 = vunpack.c.h.bf16 %v4858_v0 }
 0x281   : > { %1569 = vmatmul.bf16.vlgmr.msrb.gmra.mxu1 %v5033_v17  ;;  %v5578_v0 = vunpack.c.l.bf16 %v4965_v38 }
 0x282   : > { %1993 = vmatpush.bf16.msra.mxu1 %v1992_v54  ;;  %1686 = vmatmul.bf16.vlgmr.msrb.gmra.mxu2 %v5042_v57  ;;  %v3420_v54 = vld [vmem:[#allocation3 + $0x88] sm:$0xff]  ;;  %v2501_v11 = vsub.f32 %v3694_v52, %v3726_v1  ;;  %v2502_v4 = vsub.f32 %v3695_v55, %v3727_v16  ;;  %v1974_v21 = vsub.f32 %v3547_v43, %v5577_v30  ;;  %v5579_v16 = vunpack.c.h.bf16 %v4965_v38  ;;  %v3777_v38 = vld [vmem:[#allocation3 + $0xd8] sm:$0xff]  }
 0x283   : > { %2082 = vmatpush.bf16.msra.mxu2 %v3442_v48  ;;  %v1976_v48 = vsub.f32 %v3551_v19, %v3583_v32  ;;  %v3779_v52 = vld [vmem:[#allocation3 + $0xe8] sm:$0xff]   ;;  %v1973_v32 = vsub.f32 %v3546_v50, %v3578_v61  ;;  %v5581_v50 = vunpack.c.h.bf16 %v4825_v23  ;;  %v5586_v30 = vunpack.c.l.bf16 %v4899_v27 }
 0x284   : > { %1465 = vmatpush.bf16.msrb.mxu0 %v3421_v49  ;;  %v2510_v55 = vpack.c.bf16 %v2502_v4, %v2501_v11  ;;  %v3543_v49 = vunpack.c.h.bf16 %v3740_v51  ;;  %v3718_v19 = vunpack.c.l.bf16 %v3779_v52  ;;  %v5083_v61 = vld [vmem:[%s5576_s3 + $0x48] sm:$0xff]  ;;  %v3539_v11 = vunpack.c.h.bf16 %v3537_v29  ;;  %v4001_v4 = vld [vmem:[#allocation2 + $0x58] sm:$0xff] }
 0x285   : > { %v1988_v10 = vpack.c.bf16 %v1976_v48, %v1975_v58  ;;  %v1987_v58 = vpack.c.bf16 %v1974_v21, %v1973_v32 }
 0x286   : > { %1994 = vmatpush.bf16.msra.mxu1 %v1991_v9  ;;  %v3723_v9 = vunpack.c.h.bf16 %v3780_v8  ;;  %v2497_v1 = vsub.f32 %v5578_v0, %v3718_v19  ;;  %v3538_v8 = vunpack.c.l.bf16 %v3537_v29  ;;  %v1972_v43 = vsub.f32 %v3543_v49, %v5581_v50  ;;  %v3775_v0 = vld [vmem:[#allocation3 + $0xc8] sm:$0xff]  }
 0x287   : > { %2083 = vmatpush.bf16.msra.mxu2 %v3441_v60  ;;  %v4000_v60 = vld [vmem:[#allocation2 + $0x18] sm:$0xff]  ;;  %v3711_v49 = vunpack.c.h.bf16 %v3777_v38 }
 0x288   : > { %1466 = vmatpush.bf16.msrb.mxu0 %v3420_v54  ;;  %v2500_v56 = vsub.f32 %v3691_v26, %v3723_v9  ;;  %v3778_v26 = vld [vmem:[#allocation3 + $0xe0] sm:$0xff]   ;;  %v5580_v54 = vunpack.c.l.bf16 %v4825_v23  ;;  %v5582_v9 = vunpack.c.l.bf16 %v4935_v45 }
 0x289   : > { %v3715_v48 = vunpack.c.h.bf16 %v3778_v26  ;;  %v4002_v23 = vld [vmem:[#allocation2] sm:$0xff] }
 0x28a   : > { %1995 = vmatpush.bf16.msra.mxu1 %v1990_v36  ;;  %v3719_v36 = vunpack.c.h.bf16 %v3779_v52  ;;  %v2509_v37 = vpack.c.bf16 %v2500_v56, %v2499_v20  ;;  %v5584_v52 = vunpack.c.l.bf16 %v4789_v42  ;;  %v5585_v56 = vunpack.c.h.bf16 %v4789_v42  ;;  %v5111_v42 = vld [vmem:[%s5576_s3 + $0x28] sm:$0xff] }
 0x28b   : > { %2084 = vmatpush.bf16.msra.mxu2 %v3440_v24  ;;  %v1971_v24 = vsub.f32 %v3542_v63, %v5580_v54  ;;  %v3710_v63 = vunpack.c.l.bf16 %v3777_v38 }
 0x28c   : > { %1467 = vmatpush.bf16.msrb.mxu0 %v3419_v13  ;;  %v2498_v14 = vsub.f32 %v5579_v16, %v3719_v36  ;;  %v5583_v13 = vunpack.c.h.bf16 %v4935_v45  ;;  %v1970_v32 = vsub.f32 %v3539_v11, %v5585_v56  ;;  %v5587_v45 = vunpack.c.h.bf16 %v4899_v27  ;;  %v4003_v36 = vld [vmem:[#allocation2 + $0x30] sm:$0xff] }
 0x28d   : > { %v1986_v20 = vpack.c.bf16 %v1972_v43, %v1971_v24  ;;  %v2493_v21 = vsub.f32 %v5586_v30, %v3710_v63  ;;  %v5588_v16 = vunpack.c.l.bf16 %v4860_v44  ;;  %v5589_v27 = vunpack.c.h.bf16 %v4860_v44  ;;  %v3401_v11 = vld [vmem:[%s5576_s3 + $0x10] sm:$0xff] }
 0x28e   : > { %1996 = vmatpush.bf16.msra.mxu1 %v1989_v46  ;;  %v3714_v46 = vunpack.c.l.bf16 %v3778_v26  ;;  %v2508_v2 = vpack.c.bf16 %v2498_v14, %v2497_v1  ;;  %v2494_v19 = vsub.f32 %v5587_v45, %v3711_v49  ;;  %v3702_v24 = vunpack.c.l.bf16 %v3775_v0 }
 0x28f   : > { %2085 = vmatpush.bf16.msra.mxu2 %v3439_v33  ;;  %1468 = vmatmul.bf16.vlgmr.msrb.gmra.mxu0 %v5065_v18  ;;  %v2496_v33 = vsub.f32 %v5583_v13, %v3715_v48  ;;  %v5590_v43 = vunpack.c.l.bf16 %v4827_v15 }
 0x290   : > { %1808 = vmatpush.bf16.msra.mxu0 %v4000_v60  ;;  %v2495_v51 = vsub.f32 %v5582_v9, %v3714_v46  ;;  %v3776_v60 = vld [vmem:[#allocation3 + $0xd0] sm:$0xff]   ;;  %v2506_v1 = vpack.c.bf16 %v2494_v19, %v2493_v21  ;;  %v5591_v46 = vunpack.c.h.bf16 %v4827_v15 }
 0x291   : > { %1574 = vmatmul.bf16.gmra.mxu1 %v5078_v3  ;;  %v3706_v26 = vunpack.c.l.bf16 %v3776_v60  ;;  %v2489_v44 = vsub.f32 %v5590_v43, %v3702_v24  ;;  %v5138_v15 = vld [vmem:[%s5576_s3 + $0x30] sm:$0xff] }
 0x292   : > { %1997 = vmatpush.bf16.msra.mxu1 %v1988_v10  ;;  %1691 = vmatmul.bf16.gmra.mxu2 %v5083_v61  ;;  %v2507_v10 = vpack.c.bf16 %v2496_v33, %v2495_v51  ;;  %v5592_v51 = vunpack.c.l.bf16 %v4791_v35  ;;  %v5593_v33 = vunpack.c.h.bf16 %v4791_v35  ;;  %v5153_v35 = vld [vmem:[%s5576_s3 + $0x38] sm:$0xff] }
 0x293   : > { %2511 = vmatpush.bf16.msrb.mxu2 %v2510_v55  ;;  %v1969_v55 = vsub.f32 %v3538_v8, %v5584_v52  ;;  %v2491_v14 = vsub.f32 %v5588_v16, %v3706_v26  ;;  %v3703_v8 = vunpack.c.h.bf16 %v3775_v0 }
 0x294   : > { %1809 = vmatpush.bf16.msra.mxu0 %v4001_v4  ;;  %v5123_v4 = vld [vmem:[%s5576_s3 + $0x50] sm:$0xff] }
 0x295   : > { %v1985_v29 = vpack.c.bf16 %v1970_v32, %v1969_v55  ;;  %v2490_v48 = vsub.f32 %v5591_v46, %v3703_v8 }
 0x296   : > { %1998 = vmatpush.bf16.msra.mxu1 %v1987_v58  ;;  %v3697_v58 = vld [vmem:[#allocation3 + $0xc0] sm:$0xff]  }
 0x297   : > { %2512 = vmatpush.bf16.msrb.mxu2 %v2509_v37  ;;  %v3707_v37 = vunpack.c.h.bf16 %v3776_v60  ;;  %v3698_v38 = vunpack.c.l.bf16 %v3697_v58  ;;  %v2504_v9 = vpack.c.bf16 %v2490_v48, %v2489_v44 }
 0x298   : > { %1810 = vmatpush.bf16.msra.mxu0 %v4002_v23  ;;  %v3402_v23 = vld [vmem:[%s5576_s3 + $0x18] sm:$0xff] }
 0x299   : > { %v2492_v54 = vsub.f32 %v5589_v27, %v3707_v37  ;;  %v2487_v13 = vsub.f32 %v5592_v51, %v3698_v38 }
 0x29a   : > { %1999 = vmatpush.bf16.msra.mxu1 %v1986_v20  ;;  %v5146_v20 = vld [vmem:[%s5576_s3 + $0x58] sm:$0xff]  ;;  %s4024_s3 = scalar_lea.hbm %s5499_s12, 8 }
 0x29b   : > { %2513 = vmatpush.bf16.msrb.mxu2 %v2508_v2  ;;  %v2505_v50 = vpack.c.bf16 %v2492_v54, %v2491_v14  ;;  %v3699_v2 = vunpack.c.h.bf16 %v3697_v58 }
 0x29c   : > { %1811 = vmatpush.bf16.msra.mxu0 %v4003_v36 }
 0x29d   : > { %v2488_v52 = vsub.f32 %v5593_v33, %v3699_v2 }
 0x29e   : > { %2000 = vmatpush.bf16.msra.mxu1 %v1985_v29 }
 0x29f   : > { %2514 = vmatpush.bf16.msrb.mxu2 %v2507_v10  ;;  %1473 = vmatmul.bf16.gmra.mxu0 %v5111_v42  ;;  %v2503_v55 = vpack.c.bf16 %v2488_v52, %v2487_v13 }
 0x2a1   : > { %1579 = vmatmul.bf16.gmra.mxu1 %v3401_v11 }
 0x2a2   : > { %1696 = vmatmul.bf16.gmra.mxu2 %v5123_v4 }
 0x2a3   : > { %2515 = vmatpush.bf16.msrb.mxu2 %v2506_v1 }
 0x2a7   : > { %2516 = vmatpush.bf16.msrb.mxu2 %v2505_v50 }
 0x2ab   : > { %2517 = vmatpush.bf16.msrb.mxu2 %v2504_v9 }
 0x2af   : > { %2518 = vmatpush.bf16.msrb.mxu2 %v2503_v55  ;;  %1478 = vmatmul.bf16.gmra.mxu0 %v5138_v15 }
 0x2b1   : > { %1584 = vmatmul.bf16.gmra.mxu1 %v3402_v23 }
 0x2b2   : > { %1701 = vmatmul.bf16.gmra.mxu2 %v5146_v20 }
 0x2bf   : > { %1483 = vmatmul.bf16.gmra.mxu0 %v5153_v35 }
 0x2c1   : > { %2001 = vmatmul.bf16.vlgmr.msra.gmra.mxu1 %v5033_v17 }
 0x2d1   : > { %2006 = vmatmul.bf16.gmra.mxu1 %v5078_v3 }
 0x2e1   : > { %2011 = vmatmul.bf16.gmra.mxu1 %v3401_v11 }
 0x2f1   : > { %2016 = vmatmul.bf16.gmra.mxu1 %v3402_v23 }
 0x2fe   : > { %v1570_v56 = vpop.f32.mrf.mxu1 }
 0x305   : > { %v1687_v32 = vpop.f32.mrf.mxu2 }
 0x306   : > { %v1572_v63 = vpop.f32.mrf.mxu1 }
 0x30c   : > { %v1469_v49 = vpop.f32.mrf.mxu0 }
 0x30d   : > { %v1689_v60 = vpop.f32.mrf.mxu2  ;;  %v1571_v30 = vadd.f32 %v1570_v56, %v1469_v49 }
 0x30e   : > { %v1575_v10 = vpop.f32.mrf.mxu1 }
 0x30f   : > { %v1707_v36 = vadd.f32 %v1687_v32, %v1571_v30 }
 0x314   : > { %v1471_v21 = vpop.f32.mrf.mxu0 }
 0x315   : > { %v1573_v45 = vadd.f32 %v1572_v63, %v1471_v21  ;;  %v1692_v19 = vpop.f32.mrf.mxu2 }
 0x316   : > { %v1577_v26 = vpop.f32.mrf.mxu1 }
 0x317   : > { %v1708_v29 = vadd.f32 %v1689_v60, %v1573_v45 }
 0x319   : > { %v1715_v37 = vpack.c.bf16 %v1708_v29, %v1707_v36 }
 0x31b   : > { %3278 = vmatmul.msk.bf16.vlgmr.msra.gmra.mxu0 %vm1791_vm12, %v1715_v37 }
 0x31c   : > { %v1474_v17 = vpop.f32.mrf.mxu0 }
 0x31d   : > { %v1694_v3 = vpop.f32.mrf.mxu2  ;;  %v1576_v1 = vadd.f32 %v1575_v10, %v1474_v17 }
 0x31e   : > { %v1580_v0 = vpop.f32.mrf.mxu1 }
 0x31f   : > { %v1709_v27 = vadd.f32 %v1692_v19, %v1576_v1 }
 0x324   : > { %v1476_v16 = vpop.f32.mrf.mxu0 }
 0x325   : > { %v1578_v14 = vadd.f32 %v1577_v26, %v1476_v16  ;;  %v1697_v8 = vpop.f32.mrf.mxu2 }
 0x326   : > { %v1582_v24 = vpop.f32.mrf.mxu1 }
 0x327   : > { %v1710_v54 = vadd.f32 %v1694_v3, %v1578_v14 }
 0x329   : > { %v1716_v11 = vpack.c.bf16 %v1710_v54, %v1709_v27 }
 0x32b   : > { %3279 = vmatmul.msk.bf16.vlgmr.msrb.gmra.mxu3 %vm1791_vm12, %v1716_v11 }
 0x32c   : > { %v1479_v58 = vpop.f32.mrf.mxu0 }
 0x32d   : > { %v1699_v43 = vpop.f32.mrf.mxu2  ;;  %v1581_v44 = vadd.f32 %v1580_v0, %v1479_v58 }
 0x32e   : > { %v1585_v50 = vpop.f32.mrf.mxu1 }
 0x32f   : > { %v1711_v38 = vadd.f32 %v1697_v8, %v1581_v44  ;;  %v5194_v44 = vpop.permute.xlu2 %1764 }
 0x334   : > { %v1481_v46 = vpop.f32.mrf.mxu0 }
 0x335   : > { %v1583_v48 = vadd.f32 %v1582_v24, %v1481_v46  ;;  %v1702_v13 = vpop.f32.mrf.mxu2  ;;  %v5196_v46 = vpop.permute.xlu1 %1754 }
 0x336   : > { %v1587_v9 = vpop.f32.mrf.mxu1 }
 0x337   : > { %v1712_v2 = vadd.f32 %v1699_v43, %v1583_v48 }
 0x339   : > { %v1717_v51 = vpack.c.bf16 %v1712_v2, %v1711_v38 }
 0x33b   : > { %3280 = vmatmul.msk.bf16.gmra.mxu3 %vm1791_vm12, %v1717_v51 }
 0x33c   : > { %v1484_v33 = vpop.f32.mrf.mxu0 }
 0x33d   : > { %v1586_v55 = vadd.f32 %v1585_v50, %v1484_v33  ;;  %v1704_v32 = vpop.f32.mrf.mxu2 }
 0x33e   : > { %v2002_v52 = vpop.f32.mrf.mxu1 }
 0x33f   : > { %v1713_v63 = vadd.f32 %v1702_v13, %v1586_v55  ;;  %v5161_v10 = vadd.f32 %v2002_v52, %v1707_v36  ;;  %v5206_v13 = vpop.permute.xlu1 %1744 }
 0x344   : > { %v1486_v23 = vpop.f32.mrf.mxu0 }
 0x345   : > { %v1588_v56 = vadd.f32 %v1587_v9, %v1486_v23  ;;  %v5202_v9 = vpop.permute.xlu0 %1759 }
 0x346   : > { %v2004_v60 = vpop.f32.mrf.mxu1 }
 0x347   : > { %v1714_v49 = vadd.f32 %v1704_v32, %v1588_v56  ;;  %v5163_v30 = vadd.f32 %v2004_v60, %v1708_v29 }
 0x349   : > { %v1718_v21 = vpack.c.bf16 %v1714_v49, %v1713_v63  ;;  %v2030_v45 = vpack.c.bf16 %v5163_v30, %v5161_v10 }
 0x34b   : > { %3281 = vmatmul.msk.bf16.gmra.mxu3 %vm1791_vm12, %v1718_v21  ;;  %3300 = vmatmul.msk.bf16.vlgmr.msra.gmra.mxu2 %vm1791_vm12, %v2030_v45 }
 0x34e   : > { %v2007_v19 = vpop.f32.mrf.mxu1 }
 0x34f   : > { %v5169_v37 = vadd.f32 %v2007_v19, %v1709_v27  ;;  %v5214_v19 = vpop.permute.xlu0 %1734 }
 0x356   : > { %v2009_v26 = vpop.f32.mrf.mxu1 }
 0x357   : > { %v5171_v17 = vadd.f32 %v2009_v26, %v1710_v54 }
 0x359   : > { %v2031_v36 = vpack.c.bf16 %v5171_v17, %v5169_v37 }
 0x35b   : > { %3301 = vmatmul.msk.bf16.gmra.mxu2 %vm1791_vm12, %v2031_v36 }
 0x35e   : > { %v2012_v29 = vpop.f32.mrf.mxu1 }
 0x35f   : > { %v5176_v0 = vadd.f32 %v2012_v29, %v1711_v38  ;;  %v5217_v29 = vpop.permute.xlu1 %1729 }
 0x366   : > { %v2014_v3 = vpop.f32.mrf.mxu1 }
 0x367   : > { %v5178_v1 = vadd.f32 %v2014_v3, %v1712_v2  ;;  %v5200_v2 = vpop.permute.xlu2 %1749 }
 0x369   : > { %v2032_v16 = vpack.c.bf16 %v5178_v1, %v5176_v0 }
 0x36b   : > { %3302 = vmatmul.msk.bf16.gmra.mxu2 %vm1791_vm12, %v2032_v16 }
 0x36e   : > { %v2017_v14 = vpop.f32.mrf.mxu1 }
 0x36f   : > { %v5183_v54 = vadd.f32 %v2017_v14, %v1713_v63  ;;  %v5211_v63 = vpop.permute.xlu2 %1739 }
 0x376   : > { %v2019_v27 = vpop.f32.mrf.mxu1 }
 0x377   : > { %v5185_v24 = vadd.f32 %v2019_v27, %v1714_v49 }
 0x379   : > { %v2033_v8 = vpack.c.bf16 %v5185_v24, %v5183_v54 }
 0x37b   : > { %3303 = vmatmul.msk.bf16.gmra.mxu2 %vm1791_vm12, %v2033_v8  ;;  %v5223_v8 = vld [vmem:[%s5492_s5] sm:$0x1] }
 0x38b   : > { %2519 = vmatmul.bf16.vlgmr.msrb.gmra.mxu2 %v5042_v57 }
 0x398   : > { %v1813_v57 = vpop.f32.mrf.mxu0 }
 0x399   : > { %v1814_v3 = vadd.f32 %v1813_v57, %v5217_v29  ;;  %v5597_v57 = vpack.c.bf16 %v4955_v47, %v4949_v39 }
 0x39b   : > { %2524 = vmatmul.bf16.gmra.mxu2 %v5083_v61  ;;  %v1833_v27 = vmax.f32 %v1814_v3, 0.0 }
 0x3a0   : > { %v1815_v49 = vpop.f32.mrf.mxu0 }
 0x3a1   : > { %v1816_v26 = vadd.f32 %v1815_v49, %v5214_v19 }
 0x3a3   : > { %v1834_v14 = vmax.f32 %v1816_v26, 0.0 }
 0x3ab   : > { %2529 = vmatmul.bf16.gmra.mxu2 %v5123_v4 }
 0x3ae   : > { %v1818_v11 = vpop.f32.mrf.mxu3 }
 0x3af   : > { %v1819_v60 = vadd.f32 %v1818_v11, %v5211_v63 }
 0x3b1   : > { %v1835_v16 = vmax.f32 %v1819_v60, 0.0 }
 0x3b6   : > { %v1820_v58 = vpop.f32.mrf.mxu3 }
 0x3b7   : > { %v1821_v56 = vadd.f32 %v1820_v58, %v5206_v13  ;;  %v5594_v58 = vpack.c.bf16 %v5026_v25, %v5022_v28  ;;  %v5599_v28 = vpack.c.bf16 %v4883_v5, %v4877_v7 }
 0x3b9   : > { %v1836_v36 = vmax.f32 %v1821_v56, 0.0  ;;  %v3444_v56 = vld [vmem:[#allocation2 + $0x20] sm:$0xff] }
 0x3bb   : > { %2534 = vmatmul.bf16.gmra.mxu2 %v5146_v20 }
 0x3be   : > { %v1823_v50 = vpop.f32.mrf.mxu3 }
 0x3bf   : > { %v1824_v55 = vadd.f32 %v1823_v50, %v5200_v2  ;;  %v5595_v50 = vpack.c.bf16 %v5011_v62, %v5005_v12  ;;  %v5600_v62 = vpack.c.bf16 %v4850_v34, %v4844_v6 }
 0x3c1   : > { %v1837_v21 = vmax.f32 %v1824_v55, 0.0 }
 0x3c6   : > { %v1825_v43 = vpop.f32.mrf.mxu3 }
 0x3c7   : > { %v1826_v33 = vadd.f32 %v1825_v43, %v5196_v46 }
 0x3c9   : > { %v1838_v32 = vmax.f32 %v1826_v33, 0.0 }
 0x3ce   : > { %v1828_v48 = vpop.f32.mrf.mxu3  ;;  %v5198_v38 = vpop.f32.mrf.mxu2 }
 0x3cf   : > { %v1829_v4 = vadd.f32 %v1828_v48, %v5202_v9  ;;  %v5596_v48 = vpack.c.bf16 %v4985_v41, %v4979_v31  ;;  %v5601_v31 = vpack.c.bf16 %v4814_v22, %v4808_v59 }
 0x3d1   : > { %v1839_v23 = vmax.f32 %v1829_v4, 0.0  ;;  %v5598_v4 = vpack.c.bf16 %v4922_v40, %v4916_v53 }
 0x3d6   : > { %v1830_v61 = vpop.f32.mrf.mxu3  ;;  %v2089_v20 = vpop.f32.mrf.mxu2 }
 0x3d7   : > { %v1831_v51 = vadd.f32 %v1830_v61, %v5194_v44  ;;  %v2090_v25 = vadd.f32 %v2089_v20, %v5214_v19  ;;  %v3445_v20 = vld [vmem:[#allocation2 + $0x10] sm:$0xff] }
 0x3d9   : > { %v1840_v52 = vmax.f32 %v1831_v51, 0.0 }
 0x3db   : > { %1858 = vmatpush.msrb.mxu0 %v1840_v52  ;;  %v2108_v52 = vmax.f32 %v2090_v25, 0.0 }
 0x3dd   : > { %1859 = vmatpush.msrb.mxu0 %v1839_v23  ;;  %v3446_v23 = vld [vmem:[#allocation2 + $0x38] sm:$0xff] }
 0x3de   : > { %v2092_v45 = vpop.f32.mrf.mxu2 }
 0x3df   : > { %1860 = vmatpush.msrb.mxu0 %v1838_v32  ;;  %v2093_v59 = vadd.f32 %v2092_v45, %v5211_v63  ;;  %v3443_v32 = vld [vmem:[#allocation2 + $0x40] sm:$0xff] }
 0x3e1   : > { %1861 = vmatpush.msrb.mxu0 %v1837_v21  ;;  %v2109_v33 = vmax.f32 %v2093_v59, 0.0 }
 0x3e3   : > { %1862 = vmatpush.msrb.mxu0 %v1836_v36 }
 0x3e5   : > { %1863 = vmatpush.msrb.mxu0 %v1835_v16 }
 0x3e6   : > { %v2094_v11 = vpop.f32.mrf.mxu2 }
 0x3e7   : > { %1864 = vmatpush.msrb.mxu0 %v1834_v14  ;;  %v2095_v6 = vadd.f32 %v2094_v11, %v5206_v13 }
 0x3e9   : > { %1865 = vmatpush.msrb.mxu0 %v1833_v27  ;;  %v2110_v51 = vmax.f32 %v2095_v6, 0.0 }
 0x3ea   : > { %3282 = vmatmul.msk.f32.vlgmr.msrb.gmra.mxu0 %vm1791_vm12, %v5223_v8 }
 0x3eb   : > { %2252 = vmatpush.bf16.msra.mxu0 %v5594_v58 }
 0x3ee   : > { %v2097_v43 = vpop.f32.mrf.mxu2 }
 0x3ef   : > { %2253 = vmatpush.bf16.msra.mxu0 %v5595_v50  ;;  %v2098_v5 = vadd.f32 %v2097_v43, %v5200_v2 }
 0x3f1   : > { %v2111_v22 = vmax.f32 %v2098_v5, 0.0 }
 0x3f3   : > { %2254 = vmatpush.bf16.msra.mxu0 %v5596_v48 }
 0x3f6   : > { %v2099_v61 = vpop.f32.mrf.mxu2 }
 0x3f7   : > { %2255 = vmatpush.bf16.msra.mxu0 %v5597_v57  ;;  %v2100_v53 = vadd.f32 %v2099_v61, %v5196_v46  ;;  %v5274_v57 = vld [vmem:[%s4243_s17] sm:$0xff] }
 0x3f9   : > { %v2112_v34 = vmax.f32 %v2100_v53, 0.0 }
 0x3fb   : > { %2256 = vmatpush.bf16.msra.mxu0 %v5598_v4 }
 0x3fe   : > { %v2102_v12 = vpop.f32.mrf.mxu2 }
 0x3ff   : > { %2257 = vmatpush.bf16.msra.mxu0 %v5599_v28  ;;  %v2103_v47 = vadd.f32 %v2102_v12, %v5202_v9 }
 0x401   : > { %v2113_v40 = vmax.f32 %v2103_v47, 0.0 }
 0x403   : > { %2258 = vmatpush.bf16.msra.mxu0 %v5600_v62 }
 0x406   : > { %v2104_v39 = vpop.f32.mrf.mxu2 }
 0x407   : > { %2259 = vmatpush.bf16.msra.mxu0 %v5601_v31  ;;  %v2105_v41 = vadd.f32 %v2104_v39, %v5194_v44 }
 0x409   : > { %v2114_v7 = vmax.f32 %v2105_v41, 0.0 }
 0x40a   : > { %2260 = vmatmul.bf16.vlgmr.msra.gmra.mxu0 %v5065_v18  ;;  %v2088_v18 = vadd.f32 %v5198_v38, %v5217_v29  ;;  %v1844_v38 = vpop.permute.xlu2 %1843 }
 0x40b   : > { %2123 = vmatpush.msra.mxu3 %v2114_v7  ;;  %v5266_v49 = vperm.slane %v1844_v38, 0 }
 0x40c   : > { %v2107_v55 = vmax.f32 %v2088_v18, 0.0 }
 0x40d   : > { %2124 = vmatpush.msra.mxu3 %v2113_v40 }
 0x40e   : > { %v2520_v36 = vpop.f32.mrf.mxu2 }
 0x40f   : > { %2125 = vmatpush.msra.mxu3 %v2112_v34 }
 0x411   : > { %2126 = vmatpush.msra.mxu3 %v2111_v22 }
 0x413   : > { %2127 = vmatpush.msra.mxu3 %v2110_v51 }
 0x415   : > { %2128 = vmatpush.msra.mxu3 %v2109_v33 }
 0x416   : > { %v2522_v50 = vpop.f32.mrf.mxu2 }
 0x417   : > { %2129 = vmatpush.msra.mxu3 %v2108_v52 }
 0x419   : > { %2130 = vmatpush.msra.mxu3 %v2107_v55 }
 0x41a   : > { %2265 = vmatmul.bf16.gmra.mxu0 %v5111_v42  ;;  %3304 = vmatmul.msk.f32.vlgmr.msra.gmra.mxu3 %vm1791_vm12, %v5223_v8 }
 0x41b   : > { %2341 = vmatpush.bf16.msrb.mxu3 %v3446_v23 }
 0x41e   : > { %v2525_v12 = vpop.f32.mrf.mxu2 }
 0x41f   : > { %2342 = vmatpush.bf16.msrb.mxu3 %v3445_v20 }
 0x423   : > { %2343 = vmatpush.bf16.msrb.mxu3 %v3444_v56 }
 0x426   : > { %v2527_v40 = vpop.f32.mrf.mxu2 }
 0x427   : > { %2344 = vmatpush.bf16.msrb.mxu3 %v3443_v32 }
 0x42a   : > { %2270 = vmatmul.bf16.gmra.mxu0 %v5138_v15 }
 0x42e   : > { %v2530_v25 = vpop.f32.mrf.mxu2 }
 0x436   : > { %v2532_v20 = vpop.f32.mrf.mxu2 }
 0x43a   : > { %2275 = vmatmul.bf16.gmra.mxu0 %v5153_v35 }
 0x467   : > { %v1867_v42 = vpop.f32.mrf.mxu0 }
 0x468   : > { %v1868_v60 = vadd.f32 %v1867_v42, %v5266_v49 }
 0x46a   : > { %v3283_v21 = vmul.f32 -1.442695, %v1868_v60 }
 0x46c   : > { %3960 = vpow2.f32 %v3283_v21 }
 0x472   : > { %v3961_v45 = vpop.eup %3960 }
 0x473   : > { %v1873_v26 = vadd.f32 1.0, %v3961_v45 }
 0x475   : > { %3962 = vrcp.f32 %v1873_v26  ;;  %v1885_v35 = vand.u32 2147483648, %v1873_v26  ;;  %v1883_v27 = vand.u32 2147483647, %v1873_v26  ;;  %vm1879_vm14 = vweird.f32 %v1873_v26 }
 0x477   : > { %v1886_v58 = vor.u32 1.1754944e-38, %v1885_v35  ;;  %vm1884_vm2 = vcmp.eq.f32.partialorder %v1883_v27, 8.507059e+37 }
 0x47b   : > { %v3963_v3 = vpop.eup %3962 }
 0x47c   : > { %v1875_v16 = vmul.f32 %v3963_v3, %v1873_v26  ;;  %vm1880_vm13 = vweird.f32 %v3963_v3 }
 0x47d   : > { %vm1881_vm15 = vmor %vm1879_vm14, %vm1880_vm13 }
 0x47e   : > { %v1876_v15 = vsub.f32 1.0, %v1875_v16 }
 0x480   : > { %v1877_v14 = vmul.f32 %v3963_v3, %v1876_v15 }
 0x482   : > { %v1878_v11 = vadd.f32 %v3963_v3, %v1877_v14 }
 0x484   : > { %v1882_v43 = vsel %vm1881_vm15, %v3963_v3, %v1878_v11  ;;  %vm2421_vm15 = vcmask 23568  }
 0x485   : > { %v1887_v48 = vsel %vm1884_vm2, %v1886_v58, %v1882_v43  ;;  %v5309_v58 = vld [vmem:[%s4243_s17 + $0x8] sm:$0xff] }
 0x486   : > { %v1891_v61 = vperm.slane %v1887_v48, 0  ;;  %1889 = vst [vmem:[%s5276_s26] sm:$0x1] %v1887_v48 }
 0x487   : > { %v2261_v4 = vpop.f32.mrf.mxu0 }
 0x488   : > { %v1892_v28 = vmul.f32 %v1891_v61, %v5274_v57  ;;  %v2281_v62 = vadd.f32 %v2261_v4, %v5161_v10 }
 0x48a   : > { %1893 = vadd.xlane.f32.xlu0 %v1892_v28  ;;  %v5282_v47 = vadd.f32 %v2520_v36, %v2281_v62  ;;  %v2535_v36 = vpop.f32.mrf.mxu2 }
 0x48f   : > { %v2263_v31 = vpop.f32.mrf.mxu0 }
 0x490   : > { %v2282_v39 = vadd.f32 %v2263_v31, %v5163_v30 }
 0x492   : > { %v2289_v41 = vpack.c.bf16 %v2282_v39, %v2281_v62  ;;  %v5284_v53 = vadd.f32 %v2522_v50, %v2282_v39  ;;  %v2537_v61 = vpop.f32.mrf.mxu2 }
 0x494   : > { %v2548_v7 = vpack.c.bf16 %v5284_v53, %v5282_v47  ;;  %3324 = vmatmul.msk.bf16.vlgmr.msrb.gmra.mxu3 %vm1791_vm12, %v2289_v41  ;;  %v4102_v41 = vmov 128.0  }
 0x497   : > { %v2266_v5 = vpop.f32.mrf.mxu0 }
 0x498   : > { %v2283_v6 = vadd.f32 %v2266_v5, %v5169_v37  ;;  %v2817_v5 = vld [vmem:[%s5497_s10] sm:$0xff] }
 0x49a   : > { %v5292_v51 = vadd.f32 %v2525_v12, %v2283_v6 }
 0x49d   : > { %v2132_v34 = vpop.f32.mrf.mxu3 }
 0x49e   : > { %v2133_v10 = vadd.f32 %v2132_v34, %v5266_v49 }
 0x49f   : > { %v2268_v59 = vpop.f32.mrf.mxu0 }
 0x4a0   : > { %v2284_v30 = vadd.f32 %v2268_v59, %v5171_v17  ;;  %v3305_v22 = vmul.f32 -1.442695, %v2133_v10 }
 0x4a2   : > { %v2290_v18 = vpack.c.bf16 %v2284_v30, %v2283_v6  ;;  %v5294_v33 = vadd.f32 %v2527_v40, %v2284_v30  ;;  %3964 = vpow2.f32 %v3305_v22 }
 0x4a4   : > { %v2549_v52 = vpack.c.bf16 %v5294_v33, %v5292_v51  ;;  %3325 = vmatmul.msk.bf16.gmra.mxu3 %vm1791_vm12, %v2290_v18 }
 0x4a7   : > { %v2271_v37 = vpop.f32.mrf.mxu0 }
 0x4a8   : > { %v3965_v55 = vpop.eup %3964  ;;  %v2285_v17 = vadd.f32 %v2271_v37, %v5176_v0 }
 0x4a9   : > { %v2138_v23 = vadd.f32 1.0, %v3965_v55 }
 0x4aa   : > { %v5301_v42 = vadd.f32 %v2530_v25, %v2285_v17 }
 0x4ab   : > { %3966 = vrcp.f32 %v2138_v23  ;;  %v2150_v0 = vand.u32 2147483648, %v2138_v23  ;;  %vm2144_vm4 = vweird.f32 %v2138_v23 }
 0x4ac   : > { %3968 = vrcp.f32 %v4102_v41 }
 0x4ad   : > { %v2151_v14 = vor.u32 1.1754944e-38, %v2150_v0 }
 0x4af   : > { %v2273_v56 = vpop.f32.mrf.mxu0 }
 0x4b0   : > { %v2286_v32 = vadd.f32 %v2273_v56, %v5178_v1  ;;  %v2148_v1 = vand.u32 2147483647, %v2138_v23 }
 0x4b1   : > { %v3967_v38 = vpop.eup %3966 }
 0x4b2   : > { %v2291_v60 = vpack.c.bf16 %v2286_v32, %v2285_v17  ;;  %v5303_v21 = vadd.f32 %v2532_v20, %v2286_v32  ;;  %v2140_v45 = vmul.f32 %v3967_v38, %v2138_v23  ;;  %vm2145_vm3 = vweird.f32 %v3967_v38  ;;  %v3969_v40 = vpop.eup %3968 }
 0x4b3   : > { %vm2146_vm5 = vmor %vm2144_vm4, %vm2145_vm3  ;;  %vm2149_vm6 = vcmp.eq.f32.partialorder %v2148_v1, 8.507059e+37  ;;  %v1896_v6 = vmul.f32 128.0, %v3969_v40  ;;  %vm1900_vm7 = vweird.f32 %v3969_v40 }
 0x4b4   : > { %v2550_v26 = vpack.c.bf16 %v5303_v21, %v5301_v42  ;;  %3326 = vmatmul.msk.bf16.gmra.mxu3 %vm1791_vm12, %v2291_v60  ;;  %v2141_v3 = vsub.f32 1.0, %v2140_v45 }
 0x4b5   : > { %v1897_v34 = vsub.f32 1.0, %v1896_v6 }
 0x4b6   : > { %v2142_v15 = vmul.f32 %v3967_v38, %v2141_v3 }
 0x4b7   : > { %v2276_v16 = vpop.f32.mrf.mxu0  ;;  %v1898_v59 = vmul.f32 %v3969_v40, %v1897_v34 }
 0x4b8   : > { %v2143_v35 = vadd.f32 %v3967_v38, %v2142_v15  ;;  %v2287_v43 = vadd.f32 %v2276_v16, %v5183_v54  ;;  %v2699_v54 = vld [vmem:[%s5495_s8 + $0x38] sm:$0xff] }
 0x4b9   : > { %v1899_v10 = vadd.f32 %v3969_v40, %v1898_v59  ;;  %v5364_v59 = vld [vmem:[%s4243_s17 + $0x10] sm:$0xff] }
 0x4ba   : > { %v2147_v27 = vsel %vm2146_vm5, %v3967_v38, %v2143_v35  ;;  %v5315_v12 = vadd.f32 %v2535_v36, %v2287_v43 }
 0x4bb   : > { %v2152_v11 = vsel %vm2149_vm6, %v2151_v14, %v2147_v27  ;;  %v5331_v30 = vsel %vm1900_vm7, %v3969_v40, %v1899_v10  ;;  %vm2680_vm6 = vcmask 31768   ;;  %vm2858_vm7 = vcmask 31744  }
 0x4bc   : > { %v2157_v50 = vperm.slane %v2152_v11, 0  ;;  %3306 = vst [vmem:[%s5276_s26 + $0x1] sm:$0x1] %v2152_v11 }
 0x4be   : > { %v2158_v4 = vmul.f32 %v5309_v58, %v2157_v50 }
 0x4bf   : > { %v2278_v48 = vpop.f32.mrf.mxu0 }
 0x4c0   : > { %v2288_v28 = vadd.f32 %v2278_v48, %v5185_v24  ;;  %2159 = vadd.xlane.f32.xlu1 %v2158_v4  ;;  %v2695_v24 = vld [vmem:[%s5495_s8 + $0x18] sm:$0xff] }
 0x4c2   : > { %v2292_v62 = vpack.c.bf16 %v2288_v28, %v2287_v43  ;;  %v5317_v31 = vadd.f32 %v2537_v61, %v2288_v28  ;;  %v3450_v28 = vld [vmem:[#allocation2 + $0x28] sm:$0xff] }
 0x4c4   : > { %v2551_v39 = vpack.c.bf16 %v5317_v31, %v5315_v12  ;;  %3327 = vmatmul.msk.bf16.gmra.mxu3 %vm1791_vm12, %v2292_v62  ;;  %v3449_v62 = vld [vmem:[#allocation2 + $0x78] sm:$0xff] }
 0x4d9   : > { %2737 = vperm.xlu1 %3840, %v2699_v54   ;;  %v3448_v54 = vld [vmem:[#allocation2 + $0x70] sm:$0xff] }
 0x4e1   : > { %2717 = vperm.xlu1 %3840, %v2695_v24   ;;  %v3447_v24 = vld [vmem:[#allocation2 + $0x60] sm:$0xff] }
 0x4e9   : > { %2820 = vperm.xlu1 %3840, %v2817_v5  }
 0x4fd   : > { %v1894_v22 = vpop.xlane.xlu0 %1893 }
 0x4fe   : > { %v1902_v25 = vmul.f32 %v5331_v30, %v1894_v22 }
 0x500   : > { %1904 = vst.msk [vmem:[#allocation4] sm:$0xff] %vm1903_vm8, %v1902_v25 }
 0x517   : > { %v2346_v18 = vpop.f32.mrf.mxu3 }
 0x518   : > { %v2347_v43 = vadd.f32 %v2346_v18, %v5217_v29 }
 0x51a   : > { %v2366_v4 = vmax.f32 %v2347_v43, 0.0 }
 0x51f   : > { %v2348_v37 = vpop.f32.mrf.mxu3 }
 0x520   : > { %v2349_v11 = vadd.f32 %v2348_v37, %v5214_v19 }
 0x522   : > { %v2367_v61 = vmax.f32 %v2349_v11, 0.0 }
 0x527   : > { %v2351_v55 = vpop.f32.mrf.mxu3 }
 0x528   : > { %v2352_v14 = vadd.f32 %v2351_v55, %v5211_v63 }
 0x52a   : > { %v2368_v48 = vmax.f32 %v2352_v14, 0.0 }
 0x52f   : > { %v2353_v23 = vpop.f32.mrf.mxu3 }
 0x530   : > { %v2354_v1 = vadd.f32 %v2353_v23, %v5206_v13  ;;  %v2698_v23 = vld [vmem:[%s5495_s8 + $0x30] sm:$0xff] }
 0x532   : > { %v2369_v50 = vmax.f32 %v2354_v1, 0.0 }
 0x533   : > { %v2160_v20 = vpop.xlane.xlu1 %2159 }
 0x534   : > { %v2161_v17 = vmul.f32 %v2160_v20, %v5331_v30 }
 0x536   : > { %2163 = vst.msk [vmem:[#allocation4] sm:$0xff] %vm2162_vm9, %v2161_v17  ;;  %v2694_v17 = vld [vmem:[%s5495_s8 + $0x10] sm:$0xff] }
 0x537   : > { %v2356_v56 = vpop.f32.mrf.mxu3 }
 0x538   : > { %v2357_v16 = vadd.f32 %v2356_v56, %v5200_v2 }
 0x53a   : > { %v2370_v27 = vmax.f32 %v2357_v16, 0.0 }
 0x53f   : > { %v2358_v32 = vpop.f32.mrf.mxu3 }
 0x540   : > { %v2359_v3 = vadd.f32 %v2358_v32, %v5196_v46  ;;  %v2693_v32 = vld [vmem:[%s5495_s8 + $0x8] sm:$0xff] }
 0x542   : > { %v2371_v35 = vmax.f32 %v2359_v3, 0.0 }
 0x547   : > { %v2361_v38 = vpop.f32.mrf.mxu3 }
 0x548   : > { %v2362_v45 = vadd.f32 %v2361_v38, %v5202_v9 }
 0x54a   : > { %v2372_v15 = vmax.f32 %v2362_v45, 0.0 }
 0x54f   : > { %v2363_v60 = vpop.f32.mrf.mxu3 }
 0x550   : > { %v2364_v36 = vadd.f32 %v2363_v60, %v5194_v44 }
 0x552   : > { %v2373_v0 = vmax.f32 %v2364_v36, 0.0 }
 0x554   : > { %2382 = vmatpush.msrb.mxu1 %v2373_v0 }
 0x556   : > { %2383 = vmatpush.msrb.mxu1 %v2372_v15 }
 0x558   : > { %2384 = vmatpush.msrb.mxu1 %v2371_v35 }
 0x55a   : > { %2385 = vmatpush.msrb.mxu1 %v2370_v27 }
 0x55c   : > { %2386 = vmatpush.msrb.mxu1 %v2369_v50 }
 0x55e   : > { %2387 = vmatpush.msrb.mxu1 %v2368_v48 }
 0x560   : > { %2388 = vmatpush.msrb.mxu1 %v2367_v61 }
 0x562   : > { %2389 = vmatpush.msrb.mxu1 %v2366_v4 }
 0x563   : > { %3328 = vmatmul.msk.f32.vlgmr.msrb.gmra.mxu1 %vm1791_vm12, %v5223_v8 }
 0x564   : > { %2600 = vmatpush.bf16.msra.mxu1 %v3450_v28 }
 0x568   : > { %2601 = vmatpush.bf16.msra.mxu1 %v3449_v62 }
 0x56c   : > { %2602 = vmatpush.bf16.msra.mxu1 %v3448_v54 }
 0x570   : > { %2603 = vmatpush.bf16.msra.mxu1 %v3447_v24 }
 0x573   : > { %3348 = vmatmul.msk.bf16.vlgmr.msra.gmra.mxu1 %vm1791_vm12, %v2548_v7 }
 0x583   : > { %3349 = vmatmul.msk.bf16.gmra.mxu1 %vm1791_vm12, %v2549_v52 }
 0x593   : > { %3350 = vmatmul.msk.bf16.gmra.mxu1 %vm1791_vm12, %v2550_v26 }
 0x5a3   : > { %3351 = vmatmul.msk.bf16.gmra.mxu1 %vm1791_vm12, %v2551_v39 }
 0x5e0   : > { %v2391_v41 = vpop.f32.mrf.mxu1 }
 0x5e1   : > { %v2392_v47 = vadd.f32 %v2391_v41, %v5266_v49 }
 0x5e3   : > { %v3329_v53 = vmul.f32 -1.442695, %v2392_v47  ;;  %v5390_v47 = vld [vmem:[%s4243_s17 + $0x18] sm:$0xff]  ;;  %s4020_s17 = scalar_lea.hbm %s4019_s16, 4 }
 0x5e4   : > { %p4021_p11 = scmp.ne.s32.totalorder %s4019_s16, %s4020_s17  ;;  %p4026_p1 = scmp.lt.s32.totalorder %s4024_s3, %s4020_s17 }
 0x5e5   : > { %3970 = vpow2.f32 %v3329_v53 }
 0x5e6   : > { %p4022_p12 = pnand %p4021_p11, %p4219_p5  ;;  %p4027_p2 = por %p4026_p1, %p4025_p0 }
 0x5e8   : > { %p4023_p13 = pneg %p4022_p12 }
 0x5ea   : > { %p4028_p3 = pnand %p4027_p2, %p4023_p13 }
 0x5eb   : > { %v3971_v7 = vpop.eup %3970 }
 0x5ec   : > { %v2397_v5 = vadd.f32 1.0, %v3971_v7 }
 0x5ee   : > { %3972 = vrcp.f32 %v2397_v5  ;;  %v2409_v26 = vand.u32 2147483648, %v2397_v5  ;;  %v2407_v12 = vand.u32 2147483647, %v2397_v5  ;;  %vm2403_vm11 = vweird.f32 %v2397_v5 }
 0x5f0   : > { %v2605_v51 = vpop.f32.mrf.mxu1  ;;  %v2410_v39 = vor.u32 1.1754944e-38, %v2409_v26  ;;  %vm2408_vm14 = vcmp.eq.f32.partialorder %v2407_v12, 8.507059e+37  ;;  %v3451_v12 = vld [vmem:[%s5494_s7] sm:$0xff] }
 0x5f4   : > { %v3973_v33 = vpop.eup %3972 }
 0x5f5   : > { %v2399_v52 = vmul.f32 %v3973_v33, %v2397_v5  ;;  %vm2404_vm10 = vweird.f32 %v3973_v33  ;;  %v2696_v5 = vld [vmem:[%s5495_s8 + $0x20] sm:$0xff] }
 0x5f6   : > { %vm2405_vm13 = vmor %vm2403_vm11, %vm2404_vm10 }
 0x5f7   : > { %v2400_v42 = vsub.f32 1.0, %v2399_v52 }
 0x5f8   : > { %v2607_v21 = vpop.f32.mrf.mxu1 }
 0x5f9   : > { %v2401_v40 = vmul.f32 %v3973_v33, %v2400_v42 }
 0x5fb   : > { %v2402_v31 = vadd.f32 %v3973_v33, %v2401_v40 }
 0x5fd   : > { %v2406_v6 = vsel %vm2405_vm13, %v3973_v33, %v2402_v31  ;;  %v2692_v33 = vld [vmem:[%s5495_s8] sm:$0xff]  ;;  %v3452_v31 = vld [vmem:[%s5494_s7 + $0x8] sm:$0xff] }
 0x5fe   : > { %v2411_v34 = vsel %vm2408_vm14, %v2410_v39, %v2406_v6  ;;  %v3454_v39 = vld [vmem:[%s5494_s7 + $0x18] sm:$0xff] }
 0x5ff   : > { %v2416_v10 = vperm.slane %v2411_v34, 0  ;;  %3330 = vst [vmem:[%s5276_s26 + $0x2] sm:$0x1] %v2411_v34 }
 0x600   : > { %v2610_v22 = vpop.f32.mrf.mxu1 }
 0x601   : > { %v2417_v25 = vmul.f32 %v5364_v59, %v2416_v10  ;;  %v2611_v1 = vadd.f32 %v2610_v22, %v5211_v63 }
 0x603   : > { %2418 = vadd.xlane.f32.xlu2 %v2417_v25 }
 0x608   : > { %v2612_v18 = vpop.f32.mrf.mxu1 }
 0x609   : > { %v2613_v16 = vadd.f32 %v2612_v18, %v5206_v13 }
 0x60b   : > { %v2628_v14 = vmax.f32 %v2613_v16, 0.0 }
 0x610   : > { %v2615_v37 = vpop.f32.mrf.mxu1 }
 0x611   : > { %v2616_v3 = vadd.f32 %v2615_v37, %v5200_v2 }
 0x613   : > { %v2629_v35 = vmax.f32 %v2616_v3, 0.0 }
 0x618   : > { %v2617_v55 = vpop.f32.mrf.mxu1 }
 0x619   : > { %v2618_v45 = vadd.f32 %v2617_v55, %v5196_v46  ;;  %v2627_v46 = vmax.f32 %v2611_v1, 0.0 }
 0x61b   : > { %2732 = vperm.xlu2 %3841, %v2698_v23   ;;  %v2630_v15 = vmax.f32 %v2618_v45, 0.0 }
 0x620   : > { %v2620_v20 = vpop.f32.mrf.mxu1 }
 0x621   : > { %v2621_v38 = vadd.f32 %v2620_v20, %v5202_v9  ;;  %v2608_v9 = vadd.f32 %v2607_v21, %v5214_v19  ;;  %v2738_v20 = vpop.permute.xlu1 %2737 }
 0x623   : > { %2712 = vperm.xlu2 %3841, %v2694_v17   ;;  %v2631_v0 = vmax.f32 %v2621_v38, 0.0  ;;  %v2626_v27 = vmax.f32 %v2608_v9, 0.0 }
 0x628   : > { %v2622_v56 = vpop.f32.mrf.mxu1 }
 0x629   : > { %v2623_v60 = vadd.f32 %v2622_v56, %v5194_v44  ;;  %v2606_v44 = vadd.f32 %v2605_v51, %v5217_v29  ;;  %v2697_v51 = vld [vmem:[%s5495_s8 + $0x28] sm:$0xff]  ;;  %v2718_v3 = vpop.permute.xlu1 %2717 }
 0x62b   : > { %v2632_v36 = vmax.f32 %v2623_v60, 0.0  ;;  %2707 = vperm.xlu2 %3841, %v2693_v32   ;;  %v2625_v2 = vmax.f32 %v2606_v44, 0.0 }
 0x62d   : > { %2641 = vmatpush.msra.mxu3 %v2632_v36 }
 0x62f   : > { %2642 = vmatpush.msra.mxu3 %v2631_v0 }
 0x631   : > { %2643 = vmatpush.msra.mxu3 %v2630_v15 }
 0x633   : > { %2644 = vmatpush.msra.mxu3 %v2629_v35 }
 0x635   : > { %2645 = vmatpush.msra.mxu3 %v2628_v14 }
 0x637   : > { %2646 = vmatpush.msra.mxu3 %v2627_v46 }
 0x639   : > { %2647 = vmatpush.msra.mxu3 %v2626_v27 }
 0x63b   : > { %2648 = vmatpush.msra.mxu3 %v2625_v2 }
 0x63c   : > { %3352 = vmatmul.msk.f32.vlgmr.msra.gmra.mxu3 %vm1791_vm12, %v5223_v8 }
 0x676   : > { %v2419_v13 = vpop.xlane.xlu2 %2418 }
 0x677   : > { %v2420_v63 = vmul.f32 %v2419_v13, %v5331_v30 }
 0x679   : > { %2422 = vst.msk [vmem:[#allocation4] sm:$0xff] %vm2421_vm15, %v2420_v63 }
 0x67e   : > { %v2733_v37 = vpop.permute.xlu2 %2732 }
 0x686   : > { %v2713_v17 = vpop.permute.xlu2 %2712 }
 0x68e   : > { %v2708_v1 = vpop.permute.xlu2 %2707 }
 0x6bf   : > { %v2650_v19 = vpop.f32.mrf.mxu3 }
 0x6c0   : > { %v2651_v11 = vadd.f32 %v2650_v19, %v5266_v49 }
 0x6c2   : > { %v3353_v50 = vmul.f32 -1.442695, %v2651_v11 }
 0x6c4   : > { %3974 = vpow2.f32 %v3353_v50 }
 0x6ca   : > { %v3975_v29 = vpop.eup %3974 }
 0x6cb   : > { %v2656_v43 = vadd.f32 1.0, %v3975_v29 }
 0x6cd   : > { %3976 = vrcp.f32 %v2656_v43  ;;  %v2668_v28 = vand.u32 2147483648, %v2656_v43  ;;  %v2666_v62 = vand.u32 2147483647, %v2656_v43  ;;  %vm2662_vm3 = vweird.f32 %v2656_v43 }
 0x6cf   : > { %v2669_v24 = vor.u32 1.1754944e-38, %v2668_v28  ;;  %vm2667_vm5 = vcmp.eq.f32.partialorder %v2666_v62, 8.507059e+37 }
 0x6d3   : > { %v3977_v48 = vpop.eup %3976 }
 0x6d4   : > { %v2658_v61 = vmul.f32 %v3977_v48, %v2656_v43  ;;  %vm2663_vm2 = vweird.f32 %v3977_v48 }
 0x6d5   : > { %vm2664_vm4 = vmor %vm2662_vm3, %vm2663_vm2 }
 0x6d6   : > { %v2659_v4 = vsub.f32 1.0, %v2658_v61  ;;  %v2821_v61 = vpop.permute.xlu1 %2820 }
 0x6d8   : > { %v2660_v8 = vmul.f32 %v3977_v48, %v2659_v4 }
 0x6da   : > { %v2661_v54 = vadd.f32 %v3977_v48, %v2660_v8 }
 0x6dc   : > { %v2665_v41 = vsel %vm2664_vm4, %v3977_v48, %v2661_v54  ;;  %v2812_v48 = vld [vmem:[%s5496_s9] sm:$0xf] }
 0x6dd   : > { %v2670_v49 = vsel %vm2667_vm5, %v2669_v24, %v2665_v41 }
 0x6de   : > { %v2675_v53 = vperm.slane %v2670_v49, 0  ;;  %3354 = vst [vmem:[%s5276_s26 + $0x3] sm:$0x1] %v2670_v49 }
 0x6e0   : > { %v2676_v7 = vmul.f32 %v5390_v47, %v2675_v53 }
 0x6e2   : > { %2677 = vadd.xlane.f32.xlu0 %v2676_v7 }
 0x6f6   : > { %2722 = vperm.xlu0 %3839, %v2696_v5  }
 0x6fe   : > { %2727 = vperm.xlu0 %3839, %v2697_v51  }
 0x706   : > { %2702 = vperm.xlu0 %3839, %v2692_v33  }
 0x755   : > { %v2678_v52 = vpop.xlane.xlu0 %2677 }
 0x756   : > { %v2679_v42 = vmul.f32 %v2678_v52, %v5331_v30  ;;  %v3453_v30 = vld [vmem:[%s5494_s7 + $0x10] sm:$0xff] }
 0x758   : > { %2681 = vst.msk [vmem:[#allocation4] sm:$0xff] %vm2680_vm6, %v2679_v42 }
 0x75f   : > { %v2682_v21 = vld [vmem:[#allocation4] sm:$0xff] }
 0x760   : > { %v2683_v26 = vpack.c.bf16 %v2682_v21, %v2682_v21 }
 0x762   : > { %v2773_v40 = vsel %vm554_vm0, %v2683_v26, 0 }
 0x763   : > { %2782 = vmatpush.bf16.msrb.mxu3 %v2773_v40 }
 0x766   : > { %3372 = vmatmul.msk.bf16.vlgmr.msrb.gmra.mxu3 %vm541_vm1, %v3451_v12 }
 0x768   : > { %v2723_v55 = vpop.permute.xlu0 %2722 }
 0x770   : > { %v2728_v32 = vpop.permute.xlu0 %2727 }
 0x776   : > { %3373 = vmatmul.msk.bf16.gmra.mxu3 %vm541_vm1, %v3452_v31 }
 0x778   : > { %v2703_v14 = vpop.permute.xlu0 %2702 }
 0x786   : > { %3374 = vmatmul.msk.bf16.gmra.mxu3 %vm541_vm1, %v3453_v30 }
 0x796   : > { %3375 = vmatmul.msk.bf16.gmra.mxu3 %vm541_vm1, %v3454_v39 }
 0x7e9   : > { %v2784_v6 = vpop.f32.mrf.mxu3 }
 0x7ea   : > { %v2785_v27 = vadd.f32 %v2784_v6, %v2703_v14 }
 0x7f1   : > { %v2786_v34 = vpop.f32.mrf.mxu3 }
 0x7f2   : > { %v2787_v9 = vadd.f32 %v2786_v34, %v2708_v1 }
 0x7f9   : > { %v2789_v10 = vpop.f32.mrf.mxu3 }
 0x7fa   : > { %v2790_v16 = vadd.f32 %v2789_v10, %v2713_v17 }
 0x801   : > { %v2791_v22 = vpop.f32.mrf.mxu3 }
 0x802   : > { %v2792_v0 = vadd.f32 %v2791_v22, %v2718_v3 }
 0x809   : > { %v2794_v25 = vpop.f32.mrf.mxu3 }
 0x80a   : > { %v2795_v36 = vadd.f32 %v2794_v25, %v2723_v55 }
 0x811   : > { %v2796_v18 = vpop.f32.mrf.mxu3 }
 0x812   : > { %v2797_v60 = vadd.f32 %v2796_v18, %v2728_v32 }
 0x819   : > { %v2799_v23 = vpop.f32.mrf.mxu3 }
 0x81a   : > { %v2800_v56 = vadd.f32 %v2799_v23, %v2733_v37 }
 0x81c   : > { %3978 = vtanh.f32 %v2800_v56 }
 0x821   : > { %v2801_v38 = vpop.f32.mrf.mxu3 }
 0x822   : > { %v2802_v45 = vadd.f32 %v2801_v38, %v2738_v20  ;;  %v3979_v15 = vpop.eup %3978 }
 0x824   : > { %3980 = vtanh.f32 %v2802_v45 }
 0x825   : > { %3982 = vtanh.f32 %v2797_v60 }
 0x826   : > { %3984 = vtanh.f32 %v2795_v36 }
 0x827   : > { %3986 = vtanh.f32 %v2792_v0 }
 0x828   : > { %3988 = vtanh.f32 %v2790_v16 }
 0x829   : > { %3990 = vtanh.f32 %v2787_v9 }
 0x82a   : > { %v3981_v35 = vpop.eup %3980  ;;  %3992 = vtanh.f32 %v2785_v27 }
 0x82b   : > { %v2816_v44 = vpack.c.bf16 %v3981_v35, %v3979_v15  ;;  %v3983_v46 = vpop.eup %3982 }
 0x82c   : > { %v3985_v2 = vpop.eup %3984 }
 0x82d   : > { %2830 = vmatpush.bf16.msrb.mxu0 %v2816_v44  ;;  %v2815_v13 = vpack.c.bf16 %v3983_v46, %v3985_v2  ;;  %v3987_v63 = vpop.eup %3986 }
 0x82e   : > { %v3989_v19 = vpop.eup %3988 }
 0x82f   : > { %v2814_v11 = vpack.c.bf16 %v3987_v63, %v3989_v19  ;;  %v3991_v50 = vpop.eup %3990 }
 0x830   : > { %v3993_v29 = vpop.eup %3992 }
 0x831   : > { %2831 = vmatpush.bf16.msrb.mxu0 %v2815_v13  ;;  %v2813_v43 = vpack.c.bf16 %v3991_v50, %v3993_v29 }
 0x835   : > { %2832 = vmatpush.bf16.msrb.mxu0 %v2814_v11 }
 0x839   : > { %2833 = vmatpush.bf16.msrb.mxu0 %v2813_v43 }
 0x83c   : > { %3376 = vmatmul.msk.bf16.vlgmr.msrb.gmra.mxu0 %vm1791_vm12, %v2812_v48 }
 0x8b9   : > { %v2835_v4 = vpop.f32.mrf.mxu0 }
 0x8ba   : > { %v2836_v28 = vadd.f32 %v2835_v4, %v2821_v61 }
 0x8bc   : > { %v3377_v8 = vmul.f32 -1.442695, %v2836_v28 }
 0x8be   : > { %3994 = vpow2.f32 %v3377_v8 }
 0x8c1   : > { %v2837_v62 = vpop.f32.mrf.mxu0 }
 0x8c4   : > { %v3995_v54 = vpop.eup %3994 }
 0x8c5   : > { %v2842_v24 = vadd.f32 1.0, %v3995_v54 }
 0x8c7   : > { %3996 = vrcp.f32 %v2842_v24  ;;  %v2854_v7 = vand.u32 2147483648, %v2842_v24  ;;  %v2852_v51 = vand.u32 2147483647, %v2842_v24  ;;  %vm2848_vm1 = vweird.f32 %v2842_v24 }
 0x8c9   : > { %v2855_v52 = vor.u32 1.1754944e-38, %v2854_v7  ;;  %vm2853_vm9 = vcmp.eq.f32.partialorder %v2852_v51, 8.507059e+37 }
 0x8cd   : > { %v3997_v41 = vpop.eup %3996 }
 0x8ce   : > { %v2844_v49 = vmul.f32 %v3997_v41, %v2842_v24  ;;  %vm2849_vm0 = vweird.f32 %v3997_v41 }
 0x8cf   : > { %vm2850_vm12 = vmor %vm2848_vm1, %vm2849_vm0 }
 0x8d0   : > { %v2845_v53 = vsub.f32 1.0, %v2844_v49 }
 0x8d2   : > { %v2846_v5 = vmul.f32 %v3997_v41, %v2845_v53 }
 0x8d4   : > { %v2847_v33 = vadd.f32 %v3997_v41, %v2846_v5 }
 0x8d6   : > { %v2851_v42 = vsel %vm2850_vm12, %v3997_v41, %v2847_v33 }
 0x8d7   : > { %v2856_v21 = vsel %vm2853_vm9, %v2855_v52, %v2851_v42 }
 0x8d8   : > { %v2859_v26 = vsel %vm2858_vm7, %v2856_v21, 0.0 }
 0x8d9   : > { %2860 = vadd.xlane.f32.xlu0 %v2859_v26 }
 0x8da   : > { %4031 = shalt.err (!%p4028_p3)
}
 0x8db   : > { %s4103_s21 = smov 16   ;;  %s4104_s22 = smov 1   ;;  %v4105_v40 = vmov 4.0   ;;  %v3938_v10 = vld [vmem:[%s5276_s26] ss:$0 sm:$0xff] }
 0x8dc   : > { %3787 = dma.vmem_to_hbm [thread:$0]  (%p4219_p5), %s2950_s18, 64, %s2952_s25, %s2917_s14, %s4103_s21, %s4103_s21, %s4104_s22   ;;  %3998 = vrcp.f32 %v4105_v40  ;;  %v2877_v23 = vmul.f32 %v3938_v10, %v5274_v57 }
 0x8dd   : > { %s3082_s1 = sshll.u32 %s4234_s23, 3  ;;  %v3939_v22 = vld [vmem:[%s5276_s26 + $0x1] ss:$0 sm:$0xff]  ;;  %v3940_v25 = vld [vmem:[%s5276_s26 + $0x2] ss:$0 sm:$0xff]  ;;  %s3078_s29 = sshll.u32 %s5270_s24, 4 }
 0x8de   : > { %s461_s4 = scalar_lea.vmem %s5500_s13, %s3082_s1  ;;  %v3941_v18 = vld [vmem:[%s5276_s26 + $0x3] ss:$0 sm:$0xff]  ;;  %s3455_s18 = sshll.u32 %s4202_s6, 4  ;;  %v2886_v17 = vmul.f32 %v3939_v22, %v5309_v58  ;;  %v2896_v56 = vmul.f32 %v3940_v25, %v5364_v59 }
 0x8df   : > { %v2906_v32 = vmul.f32 %v3941_v18, %v5390_v47  ;;  %s2932_s14 = scalar_lea.hbm %s5498_s11, %s3455_s18  ;;  %s439_s6 = scalar_lea.vmem [#allocation6], %s3078_s29 }
 0x8e0   : > { %s2933_s26 = sshll.u32 %s439_s6, 4  ;;  %s2935_s16 = sshll.u32 %s2932_s14, 4  ;;  %s2934_s26 = int_to_ptr.vmem [resolvable:$true] %s2933_s26  ;;  %s2936_s16 = int_to_ptr.hbm [resolvable:$true] %s2935_s16 }
 0x8e1   : > { %s2912_s17 = scalar_lea.sflag [#allocation7], %s5270_s24  ;;  %s4046_s0 = sshra.s32 %s2936_s16, 4  ;;  %s4047_s0 = int_to_ptr.hbm [resolvable:$true] %s4046_s0 }
 0x8e2   : > { %v3999_v12 = vpop.eup %3998  ;;  %s4048_s21 = scalar_lea.hbm %s4047_s0, 16  ;;  %s4052_s2 = scalar_lea.hbm %s5498_s11, 32 }
 0x8e3   : > { %v2863_v31 = vmul.f32 4.0, %v3999_v12  ;;  %vm2867_vm10 = vweird.f32 %v3999_v12  ;;  %p4049_p4 = scmp.ne.s32.totalorder %s4047_s0, %s4048_s21  ;;  %p4053_p9 = scmp.lt.s32.totalorder %s4047_s0, %s5498_s11 }
 0x8e4   : > { %p4054_p10 = scmp.lt.s32.totalorder %s4052_s2, %s4048_s21 }
 0x8e5   : > { %v2864_v30 = vsub.f32 1.0, %v2863_v31  ;;  %p4050_p7 = pnand %p4049_p4, %p4219_p5 }
 0x8e6   : > { %p4055_p11 = por %p4054_p10, %p4053_p9 }
 0x8e7   : > { %v2865_v39 = vmul.f32 %v3999_v12, %v2864_v30  ;;  %p4051_p8 = pneg %p4050_p7 }
 0x8e9   : > { %v2866_v6 = vadd.f32 %v3999_v12, %v2865_v39  ;;  %p4056_p12 = pnand %p4055_p11, %p4051_p8 }
 0x8eb   : > { %v2868_v34 = vsel %vm2867_vm10, %v3999_v12, %v2866_v6 }
 0x94c   : > { %v2861_v37 = vpop.xlane.xlu0 %2860 }
 0x94d   : > { %v2869_v55 = vmul.f32 %v2868_v34, %v2861_v37 }
 0x94f   : > { %2870 = vst.msk [vmem:[%s461_s4] sm:$0xff] %vm1903_vm8, %v2869_v55  ;;  %v2871_v20 = vadd.f32 1.0, %v2869_v55 }
 0x951   : > { %v2878_v38 = vmul.f32 %v2877_v23, %v2871_v20  ;;  %v2887_v60 = vmul.f32 %v2886_v17, %v2871_v20  ;;  %v2897_v45 = vmul.f32 %v2896_v56, %v2871_v20  ;;  %v2907_v36 = vmul.f32 %v2906_v32, %v2871_v20 }
 0x953   : > { %v2879_v57 = vpack.c.bf16 %v2878_v38, %v2878_v38  ;;  %v2888_v3 = vpack.c.bf16 %v2887_v60, %v2887_v60  ;;  %v2898_v58 = vpack.c.bf16 %v2897_v45, %v2897_v45  ;;  %v2908_v0 = vpack.c.bf16 %v2907_v36, %v2907_v36 }
 0x955   : > { %2880 = vst [vmem:[%s439_s6] sm:$0xf] %v2879_v57 }
 0x956   : > { %3380 = vst [vmem:[%s439_s6 + $0x4] sm:$0xf] %v2888_v3 }
 0x957   : > { %3383 = vst [vmem:[%s439_s6 + $0x8] sm:$0xf] %v2898_v58 }
 0x958   : > { %3386 = vst [vmem:[%s439_s6 + $0xc] sm:$0xf] %v2908_v0 }
 0x959   : > { %4059 = shalt.err (!%p4056_p12)
}
 0x95a   : > { %s4106_s24 = smov 64   ;;  %s4107_s29 = smov 4  }
 0x95b   : > { %3786 = dma.vmem_to_hbm [thread:$0]  (%p4219_p5), %s2934_s26, 256, %s2936_s16, %s2912_s17, %s4106_s24, %s4106_s24, %s4107_s29  }
 0x95c PF: > { %p3797_p13 = scmp.ge.s32.totalorder %s4098_s30, 2  ;;  %s2969_s18 = sand.u32 1, %s4086_s27  }
 0x95d   : > { %s2970_s23 = scalar_lea.sflag [#allocation7], %s2969_s18 }
 0x95e   : > { %p3791_p0 = pnand %p3797_p13, %p4223_p6 }
 0x960   : > { %p3792_p1 = pneg %p3791_p0 }
 0x962   : > { %4077 = dma.done.wait (%p3792_p1), %s2970_s23, 256  }
 0x963   : > { %4079 = vsyncadd (%p3792_p1), %s2970_s23, 4294967040  ;;  %s2980_s25 = scalar_lea.sflag [#allocation9], %s2969_s18 }
 0x964   : > { %4081 = dma.done.wait (%p3792_p1), %s2980_s25, 64  }
 0x965   : > { %4083 = vsyncadd (%p3792_p1), %s2980_s25, 4294967232  ;;  %s5602_s14 = sld [smem:[#allocation12_spill]]  ;;  %p29_p5 = scmp.ge.s32.totalorder %s4206_s15, 4  }
 0x966   : > { %s5603_s29 = sld [smem:[#allocation13_spill]]  ;;  %s5604_s27 = smov %s4090_s28 }
 0x967   : > { %s5606_s30 = smov %s4206_s15  ;;  %31 = sbr.rel (!%p29_p5) target bundleno = 11 (0xb), region = 143 }
 0x96b   : > { %s5605_s28 = smov %s5602_s14 }
 0x96c   :  { %2993 = vsyncpa [#allocation7], 1 }
 0x96d   :  { %2995 = vsyncpa [#allocation7 + $0x1], 1 }
 0x96e   :  { %2996 = vsyncpa [#allocation9], 1 }
 0x96f   :  { %2998 = vsyncpa [#allocation9 + $0x1], 1 }

</bundles_post_ra>
